<compile_context>
chip_gen: v6e
topology: v6e:2x2x1
jax: 0.10.0
libtpu: 0.0.40
codegen_flags: <defaults>
</compile_context>

<pallas_src>
import math
import functools

import jax
import jax.numpy as jnp
from jax import lax
from jax.experimental import pallas as pl
from jax.experimental.pallas import tpu as pltpu


def _round_up(n, m):
    return ((n + m - 1) // m) * m


# ----------------------------------------------------------------------------
# Fused whole-forward kernel (one batch TILE of Bt elements per grid step)
# ----------------------------------------------------------------------------
def _memory_dt_kernel(
    packed_ref, pe_bias_ref, w_in_ref,
    wqkv_ref, bqkv_ref, wo_ref, bo_ref,
    ln1_g_ref, ln1_b_ref, ln2_g_ref, ln2_b_ref,
    w1_ref, b1_ref, w2_ref, b2_ref,
    head_w_ref, head_b_ref,
    o_ref,
    *, n_layer, n_head, seq_t, batch_tile, eps=1e-5,
):
    E = wo_ref.shape[-1]
    hd = E // n_head
    S = 3 * seq_t
    Bt = batch_tile
    M = Bt * S
    scale = 1.0 / math.sqrt(hd)
    bf16 = jnp.bfloat16

    # ---- fused token embeddings: ONE (M, Wp) @ (Wp, E) matmul ---------------
    # Wrapper packed (rtg | state | one-hot action) into disjoint columns of
    # the correct row blocks, and folded the encoder biases + positional
    # encoding into pe_bias.
    packed = packed_ref[...].reshape(M, packed_ref.shape[-1])
    x = jnp.dot(packed.astype(bf16), w_in_ref[...],
                preferred_element_type=jnp.float32) + pe_bias_ref[...]

    # ---- causal additive mask, built once per grid step ----------------------
    row = lax.broadcasted_iota(jnp.int32, (S, S), 0)
    col = lax.broadcasted_iota(jnp.int32, (S, S), 1)
    neg_mask = jnp.where(col <= row, jnp.float32(0.0), jnp.float32(-1e30))

    def layer_norm(v, g, b):
        mu = jnp.mean(v, axis=-1, keepdims=True)
        var = jnp.mean((v - mu) ** 2, axis=-1, keepdims=True)
        return (v - mu) * lax.rsqrt(var + eps) * g + b

    # Statically unrolled layer loop (L is small here).
    # TODO(synk): for large n_layer/n_embed switch to lax.fori_loop with
    #             dynamic wqkv_ref[l] indexing and per-layer weight streaming
    #             (pipeline_mode=pl.Buffered(1) on consts) to fit v7x VMEM.
    for l in range(n_layer):
        # Fused QKV projection: one (M,E)@(E,3E) matmul per layer.
        qkv = jnp.dot(x.astype(bf16), wqkv_ref[l],
                      preferred_element_type=jnp.float32) + bqkv_ref[l]

        # Attention is per batch element (sequences independent); heads come
        # from static lane slices of the fused QKV result.
        ctx_rows = []
        for b in range(Bt):
            qkv_b = qkv[b * S:(b + 1) * S, :]
            ctx_heads = []
            for h in range(n_head):
                q_h = qkv_b[:, h * hd:(h + 1) * hd]
                k_h = qkv_b[:, E + h * hd:E + (h + 1) * hd]
                v_h = qkv_b[:, 2 * E + h * hd:2 * E + (h + 1) * hd]
                s = lax.dot_general(
                    q_h.astype(bf16), k_h.astype(bf16),
                    (((1,), (1,)), ((), ())),
                    preferred_element_type=jnp.float32) * scale + neg_mask
                s = s - jnp.max(s, axis=-1, keepdims=True)
                p = jnp.exp(s)
                p = p / jnp.sum(p, axis=-1, keepdims=True)   # exact softmax
                ctx_heads.append(jnp.dot(p.astype(bf16), v_h.astype(bf16),
                                         preferred_element_type=jnp.float32))
            ctx_rows.append(jnp.concatenate(ctx_heads, axis=-1))   # (S, E)
        ctx = jnp.concatenate(ctx_rows, axis=0)                    # (M, E)

        # Single full-width out-projection (== concat heads @ Wo + bo).
        attn = jnp.dot(ctx.astype(bf16), wo_ref[l],
                       preferred_element_type=jnp.float32) + bo_ref[l]

        # residual + LayerNorm 1 (post-norm, like nn.TransformerEncoderLayer)
        x = layer_norm(x + attn, ln1_g_ref[l], ln1_b_ref[l])

        # feed-forward (ReLU)
        h1 = jnp.dot(x.astype(bf16), w1_ref[l],
                     preferred_element_type=jnp.float32) + b1_ref[l]
        h1 = jnp.maximum(h1, 0.0)
        h2 = jnp.dot(h1.astype(bf16), w2_ref[l],
                     preferred_element_type=jnp.float32) + b2_ref[l]

        # residual + LayerNorm 2
        x = layer_norm(x + h2, ln2_g_ref[l], ln2_b_ref[l])

    # ---- action head on the state-token rows [T, 2T) of every element -------
    sp = x.reshape(Bt, S, E)[:, seq_t:2 * seq_t, :].reshape(Bt * seq_t, E)
    logits = jnp.dot(sp.astype(bf16), head_w_ref[...],
                     preferred_element_type=jnp.float32) + head_b_ref[...]
    o_ref[...] = logits.reshape(Bt, seq_t, head_w_ref.shape[-1])


# ----------------------------------------------------------------------------
# Parameters, positional encoding, jitted forward
# ----------------------------------------------------------------------------
def make_positional_encoding(max_len, d_model):
    position = jnp.arange(max_len, dtype=jnp.float32)[:, None]
    div_term = jnp.exp(
        jnp.arange(0, d_model, 2, dtype=jnp.float32) * (-math.log(10000.0) / d_model)
    )
    pe = jnp.zeros((max_len, d_model), jnp.float32)
    pe = pe.at[:, 0::2].set(jnp.sin(position * div_term))
    pe = pe.at[:, 1::2].set(jnp.cos(position * div_term))
    return pe


def init_params(key, state_dim, n_actions, n_embed, n_layer, n_head):
    """Weights stored pre-transposed (in, out) in fused layouts:
       wqkv lanes are [Q | K | V], each head-major (head h -> lanes h*hd:(h+1)*hd);
       wo's rows follow the same head-major ordering."""
    assert n_embed % n_head == 0
    E, L = n_embed, n_layer
    F = 4 * E
    keys = jax.random.split(key, 8)

    def nrm(k, shape, scale=0.02):
        return scale * jax.random.normal(k, shape, jnp.float32)

    return {
        "state_w": nrm(keys[0], (state_dim, E)),
        "state_b": jnp.zeros((1, E), jnp.float32),
        "ret_w": nrm(keys[1], (1, E)),
        "ret_b": jnp.zeros((1, E), jnp.float32),
        "act_emb": nrm(keys[2], (n_actions, E)),
        "head_w": nrm(keys[3], (E, n_actions)),
        "head_b": jnp.zeros((1, n_actions), jnp.float32),
        "wqkv": nrm(keys[4], (L, E, 3 * E)),
        "bqkv": jnp.zeros((L, 1, 3 * E), jnp.float32),
        "wo": nrm(keys[5], (L, E, E)),
        "bo": jnp.zeros((L, 1, E), jnp.float32),
        "ln1_g": jnp.ones((L, 1, E), jnp.float32),
        "ln1_b": jnp.zeros((L, 1, E), jnp.float32),
        "ln2_g": jnp.ones((L, 1, E), jnp.float32),
        "ln2_b": jnp.zeros((L, 1, E), jnp.float32),
        "w1": nrm(keys[6], (L, E, F)),
        "b1": jnp.zeros((L, 1, F), jnp.float32),
        "w2": nrm(keys[7], (L, F, E)),
        "b2": jnp.zeros((L, 1, E), jnp.float32),
    }


@functools.partial(jax.jit, static_argnames=("n_head",))
def memory_dt_forward(params, states, actions, rtgs, n_head):
    """Matches MemoryDecisionTransformer.forward (eval mode, dropout=identity)."""
    B, T = states.shape[0], states.shape[1]
    if states.ndim > 3:
        states = states.reshape(B, T, -1)
    states = jnp.nan_to_num(states.astype(jnp.float32))
    if actions.ndim == 3 and actions.shape[-1] == 1:
        actions = actions[..., 0]
    if rtgs.ndim == 2:
        rtgs = rtgs[..., None]
    rtgs = rtgs.astype(jnp.float32)

    state_dim, E = params["state_w"].shape
    n_actions = params["head_w"].shape[1]
    L = params["wqkv"].shape[0]
    S = 3 * T

    # Padded geometry (zero-padding contracting dims / output lanes is exact).
    SDp = _round_up(max(state_dim, 1), 8)
    NAp = _round_up(max(n_actions, 1), 8)
    Wp = _round_up(SDp + NAp + 1, 128)          # packed-input lane width
    NP = _round_up(n_actions, 128)              # lane-dense logits store

    # Batch tiling: several batch elements per grid step -> matmul M = Bt*3T.
    Bt = B if B < 8 else 8
    Bp = _round_up(B, Bt)
    nb = Bp // Bt

    # ---- pack (rtg | state | one-hot action) into ONE (Bp, S, Wp) array -----
    # Row blocks follow the reference sequence order [returns | states | actions]
    # (the PyTorch model block-concatenates, it does NOT interleave), so one
    # (Bt*S, Wp)@(Wp, E) matmul in-kernel yields all token embeddings.
    onehot = jax.nn.one_hot(actions, n_actions, dtype=jnp.float32)
    packed = jnp.zeros((Bp, S, Wp), jnp.float32)
    packed = packed.at[:B, :T, SDp + NAp].set(rtgs[..., 0])
    packed = packed.at[:B, T:2 * T, :state_dim].set(states)
    packed = packed.at[:B, 2 * T:, SDp:SDp + n_actions].set(onehot)

    # ---- fused input-embedding weight (bf16 MXU operand) --------------------
    w_in = jnp.zeros((Wp, E), jnp.float32)
    w_in = w_in.at[:state_dim].set(params["state_w"])
    w_in = w_in.at[SDp:SDp + n_actions].set(params["act_emb"])
    w_in = w_in.at[SDp + NAp].set(params["ret_w"][0])
    w_in = w_in.astype(jnp.bfloat16)

    # Positional encoding with the per-token-type encoder biases folded in
    # (state_b for state rows, ret_b for return rows; embedding has no bias).
    pe = make_positional_encoding(S, E)
    pe_bias = pe.at[:T].add(params["ret_b"]).at[T:2 * T].add(params["state_b"])
    pe_bias = jnp.tile(pe_bias, (Bt, 1))                         # (Bt*S, E)

    head_w = jnp.pad(params["head_w"],
                     ((0, 0), (0, NP - n_actions))).astype(jnp.bfloat16)
    head_b = jnp.pad(params["head_b"], ((0, 0), (0, NP - n_actions)))

    wqkv = params["wqkv"].astype(jnp.bfloat16)
    wo = params["wo"].astype(jnp.bfloat16)
    w1 = params["w1"].astype(jnp.bfloat16)
    w2 = params["w2"].astype(jnp.bfloat16)

    # TODO(synk): the GRU/LSTM/attention memory branch in the reference updates
    # self.hidden_state but memory_out never feeds `sequence`, so it has no
    # effect on the returned action_preds; it is therefore omitted here.

    consts = (pe_bias, w_in,
              wqkv, params["bqkv"], wo, params["bo"],
              params["ln1_g"], params["ln1_b"], params["ln2_g"], params["ln2_b"],
              w1, params["b1"], w2, params["b2"],
              head_w, head_b)

    def cspec(a):
        # Grid-invariant full block: DMA'd once, VMEM-resident across steps.
        # TODO(synk): at large E/L use pipeline_mode=pl.Buffered(1) and a layer
        #             grid axis to stream weights (v7x: 64 MiB physical VMEM).
        return pl.BlockSpec(a.shape, lambda b, _n=a.ndim: (0,) * _n)

    kernel = functools.partial(_memory_dt_kernel,
                               n_layer=L, n_head=n_head,
                               seq_t=T, batch_tile=Bt)

    out = pl.pallas_call(
        kernel,
        out_shape=jax.ShapeDtypeStruct((Bp, T, NP), jnp.float32),
        grid=(nb,),
        in_specs=[pl.BlockSpec((Bt, S, Wp), lambda b: (b, 0, 0))]
                 + [cspec(a) for a in consts],
        out_specs=pl.BlockSpec((Bt, T, NP), lambda b: (b, 0, 0)),
        # Batch tiles are independent -> shard across TensorCores on v7x.
        compiler_params=pltpu.CompilerParams(
            dimension_semantics=("parallel",),
            vmem_limit_bytes=32 * 1024 * 1024),
    )(packed, *consts)

    return out[:B, :, :n_actions]


# ----------------------------------------------------------------------------
if __name__ == "__main__":
    B, T = 2, 8
    state_dim, n_actions = 4, 6
    n_embed, n_layer, n_head = 32, 2, 4

    key = jax.random.PRNGKey(0)
    kp, ks, ka, kr = jax.random.split(key, 4)

    params = init_params(kp, state_dim, n_actions, n_embed, n_layer, n_head)
    states = jax.random.normal(ks, (B, T, state_dim), jnp.float32)
    actions = jax.random.randint(ka, (B, T), 0, n_actions, jnp.int32)
    rtgs = jax.random.normal(kr, (B, T), jnp.float32)

    out = memory_dt_forward(params, states, actions, rtgs, n_head=n_head)
    out = jax.block_until_ready(out)
    assert out.shape == (B, T, n_actions), out.shape
    assert bool(jnp.all(jnp.isfinite(out)))
    print("KERNEL_OK")
</pallas_src>

<mosaic_0001>
module attributes {stable_mosaic.version = 11 : i64} {
  func.func @_memory_dt_kernel(%arg0: i32, %arg1: memref<2x24x128xf32, #tpu.memory_space<vmem>>, %arg2: memref<48x32xf32, #tpu.memory_space<vmem>>, %arg3: memref<128x32xbf16, #tpu.memory_space<vmem>>, %arg4: memref<2x32x96xbf16, #tpu.memory_space<vmem>>, %arg5: memref<2x1x96xf32, #tpu.memory_space<vmem>>, %arg6: memref<2x32x32xbf16, #tpu.memory_space<vmem>>, %arg7: memref<2x1x32xf32, #tpu.memory_space<vmem>>, %arg8: memref<2x1x32xf32, #tpu.memory_space<vmem>>, %arg9: memref<2x1x32xf32, #tpu.memory_space<vmem>>, %arg10: memref<2x1x32xf32, #tpu.memory_space<vmem>>, %arg11: memref<2x1x32xf32, #tpu.memory_space<vmem>>, %arg12: memref<2x32x128xbf16, #tpu.memory_space<vmem>>, %arg13: memref<2x1x128xf32, #tpu.memory_space<vmem>>, %arg14: memref<2x128x32xbf16, #tpu.memory_space<vmem>>, %arg15: memref<2x1x32xf32, #tpu.memory_space<vmem>>, %arg16: memref<32x128xbf16, #tpu.memory_space<vmem>>, %arg17: memref<1x128xf32, #tpu.memory_space<vmem>>, %arg18: memref<2x8x128xf32, #tpu.memory_space<vmem>>) attributes {dimension_semantics = [#tpu.dimension_semantics<parallel>], iteration_bounds = array<i64: 1>, scalar_prefetch = 0 : i64, scratch_operands = 0 : i64, tpu.core_type = #tpu.core_type<tc>, window_params = [{transform_indices = @transform_0, window_bounds = array<i64: 2, 24, 128>}, {pipeline_mode = #tpu.pipeline_mode<synchronous>, transform_indices = @transform_1, window_bounds = array<i64: 48, 32>}, {pipeline_mode = #tpu.pipeline_mode<synchronous>, transform_indices = @transform_2, window_bounds = array<i64: 128, 32>}, {pipeline_mode = #tpu.pipeline_mode<synchronous>, transform_indices = @transform_3, window_bounds = array<i64: 2, 32, 96>}, {pipeline_mode = #tpu.pipeline_mode<synchronous>, transform_indices = @transform_4, window_bounds = array<i64: 2, 1, 96>}, {pipeline_mode = #tpu.pipeline_mode<synchronous>, transform_indices = @transform_5, window_bounds = array<i64: 2, 32, 32>}, {pipeline_mode = #tpu.pipeline_mode<synchronous>, transform_indices = @transform_6, window_bounds = array<i64: 2, 1, 32>}, {pipeline_mode = #tpu.pipeline_mode<synchronous>, transform_indices = @transform_7, window_bounds = array<i64: 2, 1, 32>}, {pipeline_mode = #tpu.pipeline_mode<synchronous>, transform_indices = @transform_8, window_bounds = array<i64: 2, 1, 32>}, {pipeline_mode = #tpu.pipeline_mode<synchronous>, transform_indices = @transform_9, window_bounds = array<i64: 2, 1, 32>}, {pipeline_mode = #tpu.pipeline_mode<synchronous>, transform_indices = @transform_10, window_bounds = array<i64: 2, 1, 32>}, {pipeline_mode = #tpu.pipeline_mode<synchronous>, transform_indices = @transform_11, window_bounds = array<i64: 2, 32, 128>}, {pipeline_mode = #tpu.pipeline_mode<synchronous>, transform_indices = @transform_12, window_bounds = array<i64: 2, 1, 128>}, {pipeline_mode = #tpu.pipeline_mode<synchronous>, transform_indices = @transform_13, window_bounds = array<i64: 2, 128, 32>}, {pipeline_mode = #tpu.pipeline_mode<synchronous>, transform_indices = @transform_14, window_bounds = array<i64: 2, 1, 32>}, {pipeline_mode = #tpu.pipeline_mode<synchronous>, transform_indices = @transform_15, window_bounds = array<i64: 32, 128>}, {pipeline_mode = #tpu.pipeline_mode<synchronous>, transform_indices = @transform_16, window_bounds = array<i64: 1, 128>}, {transform_indices = @transform_17, window_bounds = array<i64: 2, 8, 128>}]} {
    %c0 = arith.constant 0 : index
    %c0_0 = arith.constant 0 : index
    %c0_1 = arith.constant 0 : index
    %0 = vector.load %arg1[%c0, %c0_0, %c0_1] : memref<2x24x128xf32, #tpu.memory_space<vmem>>, vector<2x24x128xf32>
    %1 = vector.shape_cast %0 : vector<2x24x128xf32> to vector<48x128xf32>
    %2 = arith.truncf %1 : vector<48x128xf32> to vector<48x128xbf16>
    %c0_2 = arith.constant 0 : index
    %c0_3 = arith.constant 0 : index
    %3 = vector.load %arg3[%c0_2, %c0_3] : memref<128x32xbf16, #tpu.memory_space<vmem>>, vector<128x32xbf16>
    %cst = arith.constant dense<0.000000e+00> : vector<48x32xf32>
    %4 = tpu.matmul %2, %3, %cst {dimension_numbers = #tpu.dot_dimension_numbers<[1], [0], [0], [1], [0, 0, 1, 1], [], []>} : vector<48x128xbf16>, vector<128x32xbf16>, vector<48x32xf32> -> vector<48x32xf32>
    %c0_4 = arith.constant 0 : index
    %c0_5 = arith.constant 0 : index
    %5 = vector.load %arg2[%c0_4, %c0_5] : memref<48x32xf32, #tpu.memory_space<vmem>>, vector<48x32xf32>
    %6 = arith.addf %4, %5 : vector<48x32xf32>
    %7 = tpu.iota {dimensions = array<i32: 0>} : vector<24x24xi32>
    %8 = tpu.iota {dimensions = array<i32: 1>} : vector<24x24xi32>
    %9 = arith.cmpi sle, %8, %7 : vector<24x24xi32>
    %cst_6 = arith.constant 0.000000e+00 : f32
    %cst_7 = arith.constant -1.000000e+30 : f32
    %10 = vector.broadcast %cst_6 : f32 to vector<24x24xf32>
    %11 = vector.broadcast %cst_7 : f32 to vector<24x24xf32>
    %12 = arith.select %9, %10, %11 : vector<24x24xi1>, vector<24x24xf32>
    %13 = arith.truncf %6 : vector<48x32xf32> to vector<48x32xbf16>
    %c0_8 = arith.constant 0 : index
    %c0_9 = arith.constant 0 : index
    %c0_10 = arith.constant 0 : index
    %14 = vector.load %arg4[%c0_8, %c0_9, %c0_10] : memref<2x32x96xbf16, #tpu.memory_space<vmem>>, vector<1x32x96xbf16>
    %15 = vector.shape_cast %14 : vector<1x32x96xbf16> to vector<32x96xbf16>
    %cst_11 = arith.constant dense<0.000000e+00> : vector<48x96xf32>
    %16 = tpu.matmul %13, %15, %cst_11 {dimension_numbers = #tpu.dot_dimension_numbers<[1], [0], [0], [1], [0, 0, 1, 1], [], []>} : vector<48x32xbf16>, vector<32x96xbf16>, vector<48x96xf32> -> vector<48x96xf32>
    %c0_12 = arith.constant 0 : index
    %c0_13 = arith.constant 0 : index
    %c0_14 = arith.constant 0 : index
    %17 = vector.load %arg5[%c0_12, %c0_13, %c0_14] : memref<2x1x96xf32, #tpu.memory_space<vmem>>, vector<1x1x96xf32>
    %18 = vector.shape_cast %17 : vector<1x1x96xf32> to vector<1x96xf32>
    %19 = vector.broadcast %18 : vector<1x96xf32> to vector<48x96xf32>
    %20 = arith.addf %16, %19 : vector<48x96xf32>
    %21 = vector.extract_strided_slice %20 {offsets = [0, 0], sizes = [24, 96], strides = [1, 1]} : vector<48x96xf32> to vector<24x96xf32>
    %22 = vector.extract_strided_slice %21 {offsets = [0, 0], sizes = [24, 8], strides = [1, 1]} : vector<24x96xf32> to vector<24x8xf32>
    %23 = vector.extract_strided_slice %21 {offsets = [0, 32], sizes = [24, 8], strides = [1, 1]} : vector<24x96xf32> to vector<24x8xf32>
    %24 = vector.extract_strided_slice %21 {offsets = [0, 64], sizes = [24, 8], strides = [1, 1]} : vector<24x96xf32> to vector<24x8xf32>
    %25 = arith.truncf %22 : vector<24x8xf32> to vector<24x8xbf16>
    %26 = arith.truncf %23 : vector<24x8xf32> to vector<24x8xbf16>
    %cst_15 = arith.constant dense<0.000000e+00> : vector<24x24xf32>
    %27 = tpu.matmul %25, %26, %cst_15 {dimension_numbers = #tpu.dot_dimension_numbers<[1], [1], [0], [0], [0, 0, 1, 0], [], []>} : vector<24x8xbf16>, vector<24x8xbf16>, vector<24x24xf32> -> vector<24x24xf32>
    %cst_16 = arith.constant 0.353553385 : f32
    %28 = vector.broadcast %cst_16 : f32 to vector<24x24xf32>
    %29 = arith.mulf %27, %28 : vector<24x24xf32>
    %30 = arith.addf %29, %12 : vector<24x24xf32>
    %cst_17 = arith.constant dense<0xFF800000> : vector<24xf32>
    %31 = vector.multi_reduction <maximumf>, %30, %cst_17 [1] : vector<24x24xf32> to vector<24xf32>
    %32 = vector.shape_cast %31 : vector<24xf32> to vector<24x1xf32>
    %33 = vector.broadcast %32 : vector<24x1xf32> to vector<24x24xf32>
    %34 = arith.subf %30, %33 : vector<24x24xf32>
    %35 = math.exp %34 : vector<24x24xf32>
    %cst_18 = arith.constant dense<0.000000e+00> : vector<24xf32>
    %36 = vector.multi_reduction <add>, %35, %cst_18 [1] : vector<24x24xf32> to vector<24xf32>
    %37 = vector.shape_cast %36 : vector<24xf32> to vector<24x1xf32>
    %38 = vector.broadcast %37 : vector<24x1xf32> to vector<24x24xf32>
    %39 = arith.divf %35, %38 : vector<24x24xf32>
    %40 = arith.truncf %39 : vector<24x24xf32> to vector<24x24xbf16>
    %41 = arith.truncf %24 : vector<24x8xf32> to vector<24x8xbf16>
    %cst_19 = arith.constant dense<0.000000e+00> : vector<24x8xf32>
    %42 = tpu.matmul %40, %41, %cst_19 {dimension_numbers = #tpu.dot_dimension_numbers<[1], [0], [0], [1], [0, 0, 1, 1], [], []>} : vector<24x24xbf16>, vector<24x8xbf16>, vector<24x8xf32> -> vector<24x8xf32>
    %43 = vector.extract_strided_slice %21 {offsets = [0, 8], sizes = [24, 8], strides = [1, 1]} : vector<24x96xf32> to vector<24x8xf32>
    %44 = vector.extract_strided_slice %21 {offsets = [0, 40], sizes = [24, 8], strides = [1, 1]} : vector<24x96xf32> to vector<24x8xf32>
    %45 = vector.extract_strided_slice %21 {offsets = [0, 72], sizes = [24, 8], strides = [1, 1]} : vector<24x96xf32> to vector<24x8xf32>
    %46 = arith.truncf %43 : vector<24x8xf32> to vector<24x8xbf16>
    %47 = arith.truncf %44 : vector<24x8xf32> to vector<24x8xbf16>
    %cst_20 = arith.constant dense<0.000000e+00> : vector<24x24xf32>
    %48 = tpu.matmul %46, %47, %cst_20 {dimension_numbers = #tpu.dot_dimension_numbers<[1], [1], [0], [0], [0, 0, 1, 0], [], []>} : vector<24x8xbf16>, vector<24x8xbf16>, vector<24x24xf32> -> vector<24x24xf32>
    %cst_21 = arith.constant 0.353553385 : f32
    %49 = vector.broadcast %cst_21 : f32 to vector<24x24xf32>
    %50 = arith.mulf %48, %49 : vector<24x24xf32>
    %51 = arith.addf %50, %12 : vector<24x24xf32>
    %cst_22 = arith.constant dense<0xFF800000> : vector<24xf32>
    %52 = vector.multi_reduction <maximumf>, %51, %cst_22 [1] : vector<24x24xf32> to vector<24xf32>
    %53 = vector.shape_cast %52 : vector<24xf32> to vector<24x1xf32>
    %54 = vector.broadcast %53 : vector<24x1xf32> to vector<24x24xf32>
    %55 = arith.subf %51, %54 : vector<24x24xf32>
    %56 = math.exp %55 : vector<24x24xf32>
    %cst_23 = arith.constant dense<0.000000e+00> : vector<24xf32>
    %57 = vector.multi_reduction <add>, %56, %cst_23 [1] : vector<24x24xf32> to vector<24xf32>
    %58 = vector.shape_cast %57 : vector<24xf32> to vector<24x1xf32>
    %59 = vector.broadcast %58 : vector<24x1xf32> to vector<24x24xf32>
    %60 = arith.divf %56, %59 : vector<24x24xf32>
    %61 = arith.truncf %60 : vector<24x24xf32> to vector<24x24xbf16>
    %62 = arith.truncf %45 : vector<24x8xf32> to vector<24x8xbf16>
    %cst_24 = arith.constant dense<0.000000e+00> : vector<24x8xf32>
    %63 = tpu.matmul %61, %62, %cst_24 {dimension_numbers = #tpu.dot_dimension_numbers<[1], [0], [0], [1], [0, 0, 1, 1], [], []>} : vector<24x24xbf16>, vector<24x8xbf16>, vector<24x8xf32> -> vector<24x8xf32>
    %64 = vector.extract_strided_slice %21 {offsets = [0, 16], sizes = [24, 8], strides = [1, 1]} : vector<24x96xf32> to vector<24x8xf32>
    %65 = vector.extract_strided_slice %21 {offsets = [0, 48], sizes = [24, 8], strides = [1, 1]} : vector<24x96xf32> to vector<24x8xf32>
    %66 = vector.extract_strided_slice %21 {offsets = [0, 80], sizes = [24, 8], strides = [1, 1]} : vector<24x96xf32> to vector<24x8xf32>
    %67 = arith.truncf %64 : vector<24x8xf32> to vector<24x8xbf16>
    %68 = arith.truncf %65 : vector<24x8xf32> to vector<24x8xbf16>
    %cst_25 = arith.constant dense<0.000000e+00> : vector<24x24xf32>
    %69 = tpu.matmul %67, %68, %cst_25 {dimension_numbers = #tpu.dot_dimension_numbers<[1], [1], [0], [0], [0, 0, 1, 0], [], []>} : vector<24x8xbf16>, vector<24x8xbf16>, vector<24x24xf32> -> vector<24x24xf32>
    %cst_26 = arith.constant 0.353553385 : f32
    %70 = vector.broadcast %cst_26 : f32 to vector<24x24xf32>
    %71 = arith.mulf %69, %70 : vector<24x24xf32>
    %72 = arith.addf %71, %12 : vector<24x24xf32>
    %cst_27 = arith.constant dense<0xFF800000> : vector<24xf32>
    %73 = vector.multi_reduction <maximumf>, %72, %cst_27 [1] : vector<24x24xf32> to vector<24xf32>
    %74 = vector.shape_cast %73 : vector<24xf32> to vector<24x1xf32>
    %75 = vector.broadcast %74 : vector<24x1xf32> to vector<24x24xf32>
    %76 = arith.subf %72, %75 : vector<24x24xf32>
    %77 = math.exp %76 : vector<24x24xf32>
    %cst_28 = arith.constant dense<0.000000e+00> : vector<24xf32>
    %78 = vector.multi_reduction <add>, %77, %cst_28 [1] : vector<24x24xf32> to vector<24xf32>
    %79 = vector.shape_cast %78 : vector<24xf32> to vector<24x1xf32>
    %80 = vector.broadcast %79 : vector<24x1xf32> to vector<24x24xf32>
    %81 = arith.divf %77, %80 : vector<24x24xf32>
    %82 = arith.truncf %81 : vector<24x24xf32> to vector<24x24xbf16>
    %83 = arith.truncf %66 : vector<24x8xf32> to vector<24x8xbf16>
    %cst_29 = arith.constant dense<0.000000e+00> : vector<24x8xf32>
    %84 = tpu.matmul %82, %83, %cst_29 {dimension_numbers = #tpu.dot_dimension_numbers<[1], [0], [0], [1], [0, 0, 1, 1], [], []>} : vector<24x24xbf16>, vector<24x8xbf16>, vector<24x8xf32> -> vector<24x8xf32>
    %85 = vector.extract_strided_slice %21 {offsets = [0, 24], sizes = [24, 8], strides = [1, 1]} : vector<24x96xf32> to vector<24x8xf32>
    %86 = vector.extract_strided_slice %21 {offsets = [0, 56], sizes = [24, 8], strides = [1, 1]} : vector<24x96xf32> to vector<24x8xf32>
    %87 = vector.extract_strided_slice %21 {offsets = [0, 88], sizes = [24, 8], strides = [1, 1]} : vector<24x96xf32> to vector<24x8xf32>
    %88 = arith.truncf %85 : vector<24x8xf32> to vector<24x8xbf16>
    %89 = arith.truncf %86 : vector<24x8xf32> to vector<24x8xbf16>
    %cst_30 = arith.constant dense<0.000000e+00> : vector<24x24xf32>
    %90 = tpu.matmul %88, %89, %cst_30 {dimension_numbers = #tpu.dot_dimension_numbers<[1], [1], [0], [0], [0, 0, 1, 0], [], []>} : vector<24x8xbf16>, vector<24x8xbf16>, vector<24x24xf32> -> vector<24x24xf32>
    %cst_31 = arith.constant 0.353553385 : f32
    %91 = vector.broadcast %cst_31 : f32 to vector<24x24xf32>
    %92 = arith.mulf %90, %91 : vector<24x24xf32>
    %93 = arith.addf %92, %12 : vector<24x24xf32>
    %cst_32 = arith.constant dense<0xFF800000> : vector<24xf32>
    %94 = vector.multi_reduction <maximumf>, %93, %cst_32 [1] : vector<24x24xf32> to vector<24xf32>
    %95 = vector.shape_cast %94 : vector<24xf32> to vector<24x1xf32>
    %96 = vector.broadcast %95 : vector<24x1xf32> to vector<24x24xf32>
    %97 = arith.subf %93, %96 : vector<24x24xf32>
    %98 = math.exp %97 : vector<24x24xf32>
    %cst_33 = arith.constant dense<0.000000e+00> : vector<24xf32>
    %99 = vector.multi_reduction <add>, %98, %cst_33 [1] : vector<24x24xf32> to vector<24xf32>
    %100 = vector.shape_cast %99 : vector<24xf32> to vector<24x1xf32>
    %101 = vector.broadcast %100 : vector<24x1xf32> to vector<24x24xf32>
    %102 = arith.divf %98, %101 : vector<24x24xf32>
    %103 = arith.truncf %102 : vector<24x24xf32> to vector<24x24xbf16>
    %104 = arith.truncf %87 : vector<24x8xf32> to vector<24x8xbf16>
    %cst_34 = arith.constant dense<0.000000e+00> : vector<24x8xf32>
    %105 = tpu.matmul %103, %104, %cst_34 {dimension_numbers = #tpu.dot_dimension_numbers<[1], [0], [0], [1], [0, 0, 1, 1], [], []>} : vector<24x24xbf16>, vector<24x8xbf16>, vector<24x8xf32> -> vector<24x8xf32>
    %106 = tpu.concatenate %42, %63, %84, %105 in 1 : vector<24x8xf32>, vector<24x8xf32>, vector<24x8xf32>, vector<24x8xf32> -> vector<24x32xf32>
    %107 = vector.extract_strided_slice %20 {offsets = [24, 0], sizes = [24, 96], strides = [1, 1]} : vector<48x96xf32> to vector<24x96xf32>
    %108 = vector.extract_strided_slice %107 {offsets = [0, 0], sizes = [24, 8], strides = [1, 1]} : vector<24x96xf32> to vector<24x8xf32>
    %109 = vector.extract_strided_slice %107 {offsets = [0, 32], sizes = [24, 8], strides = [1, 1]} : vector<24x96xf32> to vector<24x8xf32>
    %110 = vector.extract_strided_slice %107 {offsets = [0, 64], sizes = [24, 8], strides = [1, 1]} : vector<24x96xf32> to vector<24x8xf32>
    %111 = arith.truncf %108 : vector<24x8xf32> to vector<24x8xbf16>
    %112 = arith.truncf %109 : vector<24x8xf32> to vector<24x8xbf16>
    %cst_35 = arith.constant dense<0.000000e+00> : vector<24x24xf32>
    %113 = tpu.matmul %111, %112, %cst_35 {dimension_numbers = #tpu.dot_dimension_numbers<[1], [1], [0], [0], [0, 0, 1, 0], [], []>} : vector<24x8xbf16>, vector<24x8xbf16>, vector<24x24xf32> -> vector<24x24xf32>
    %cst_36 = arith.constant 0.353553385 : f32
    %114 = vector.broadcast %cst_36 : f32 to vector<24x24xf32>
    %115 = arith.mulf %113, %114 : vector<24x24xf32>
    %116 = arith.addf %115, %12 : vector<24x24xf32>
    %cst_37 = arith.constant dense<0xFF800000> : vector<24xf32>
    %117 = vector.multi_reduction <maximumf>, %116, %cst_37 [1] : vector<24x24xf32> to vector<24xf32>
    %118 = vector.shape_cast %117 : vector<24xf32> to vector<24x1xf32>
    %119 = vector.broadcast %118 : vector<24x1xf32> to vector<24x24xf32>
    %120 = arith.subf %116, %119 : vector<24x24xf32>
    %121 = math.exp %120 : vector<24x24xf32>
    %cst_38 = arith.constant dense<0.000000e+00> : vector<24xf32>
    %122 = vector.multi_reduction <add>, %121, %cst_38 [1] : vector<24x24xf32> to vector<24xf32>
    %123 = vector.shape_cast %122 : vector<24xf32> to vector<24x1xf32>
    %124 = vector.broadcast %123 : vector<24x1xf32> to vector<24x24xf32>
    %125 = arith.divf %121, %124 : vector<24x24xf32>
    %126 = arith.truncf %125 : vector<24x24xf32> to vector<24x24xbf16>
    %127 = arith.truncf %110 : vector<24x8xf32> to vector<24x8xbf16>
    %cst_39 = arith.constant dense<0.000000e+00> : vector<24x8xf32>
    %128 = tpu.matmul %126, %127, %cst_39 {dimension_numbers = #tpu.dot_dimension_numbers<[1], [0], [0], [1], [0, 0, 1, 1], [], []>} : vector<24x24xbf16>, vector<24x8xbf16>, vector<24x8xf32> -> vector<24x8xf32>
    %129 = vector.extract_strided_slice %107 {offsets = [0, 8], sizes = [24, 8], strides = [1, 1]} : vector<24x96xf32> to vector<24x8xf32>
    %130 = vector.extract_strided_slice %107 {offsets = [0, 40], sizes = [24, 8], strides = [1, 1]} : vector<24x96xf32> to vector<24x8xf32>
    %131 = vector.extract_strided_slice %107 {offsets = [0, 72], sizes = [24, 8], strides = [1, 1]} : vector<24x96xf32> to vector<24x8xf32>
    %132 = arith.truncf %129 : vector<24x8xf32> to vector<24x8xbf16>
    %133 = arith.truncf %130 : vector<24x8xf32> to vector<24x8xbf16>
    %cst_40 = arith.constant dense<0.000000e+00> : vector<24x24xf32>
    %134 = tpu.matmul %132, %133, %cst_40 {dimension_numbers = #tpu.dot_dimension_numbers<[1], [1], [0], [0], [0, 0, 1, 0], [], []>} : vector<24x8xbf16>, vector<24x8xbf16>, vector<24x24xf32> -> vector<24x24xf32>
    %cst_41 = arith.constant 0.353553385 : f32
    %135 = vector.broadcast %cst_41 : f32 to vector<24x24xf32>
    %136 = arith.mulf %134, %135 : vector<24x24xf32>
    %137 = arith.addf %136, %12 : vector<24x24xf32>
    %cst_42 = arith.constant dense<0xFF800000> : vector<24xf32>
    %138 = vector.multi_reduction <maximumf>, %137, %cst_42 [1] : vector<24x24xf32> to vector<24xf32>
    %139 = vector.shape_cast %138 : vector<24xf32> to vector<24x1xf32>
    %140 = vector.broadcast %139 : vector<24x1xf32> to vector<24x24xf32>
    %141 = arith.subf %137, %140 : vector<24x24xf32>
    %142 = math.exp %141 : vector<24x24xf32>
    %cst_43 = arith.constant dense<0.000000e+00> : vector<24xf32>
    %143 = vector.multi_reduction <add>, %142, %cst_43 [1] : vector<24x24xf32> to vector<24xf32>
    %144 = vector.shape_cast %143 : vector<24xf32> to vector<24x1xf32>
    %145 = vector.broadcast %144 : vector<24x1xf32> to vector<24x24xf32>
    %146 = arith.divf %142, %145 : vector<24x24xf32>
    %147 = arith.truncf %146 : vector<24x24xf32> to vector<24x24xbf16>
    %148 = arith.truncf %131 : vector<24x8xf32> to vector<24x8xbf16>
    %cst_44 = arith.constant dense<0.000000e+00> : vector<24x8xf32>
    %149 = tpu.matmul %147, %148, %cst_44 {dimension_numbers = #tpu.dot_dimension_numbers<[1], [0], [0], [1], [0, 0, 1, 1], [], []>} : vector<24x24xbf16>, vector<24x8xbf16>, vector<24x8xf32> -> vector<24x8xf32>
    %150 = vector.extract_strided_slice %107 {offsets = [0, 16], sizes = [24, 8], strides = [1, 1]} : vector<24x96xf32> to vector<24x8xf32>
    %151 = vector.extract_strided_slice %107 {offsets = [0, 48], sizes = [24, 8], strides = [1, 1]} : vector<24x96xf32> to vector<24x8xf32>
    %152 = vector.extract_strided_slice %107 {offsets = [0, 80], sizes = [24, 8], strides = [1, 1]} : vector<24x96xf32> to vector<24x8xf32>
    %153 = arith.truncf %150 : vector<24x8xf32> to vector<24x8xbf16>
    %154 = arith.truncf %151 : vector<24x8xf32> to vector<24x8xbf16>
    %cst_45 = arith.constant dense<0.000000e+00> : vector<24x24xf32>
    %155 = tpu.matmul %153, %154, %cst_45 {dimension_numbers = #tpu.dot_dimension_numbers<[1], [1], [0], [0], [0, 0, 1, 0], [], []>} : vector<24x8xbf16>, vector<24x8xbf16>, vector<24x24xf32> -> vector<24x24xf32>
    %cst_46 = arith.constant 0.353553385 : f32
    %156 = vector.broadcast %cst_46 : f32 to vector<24x24xf32>
    %157 = arith.mulf %155, %156 : vector<24x24xf32>
    %158 = arith.addf %157, %12 : vector<24x24xf32>
    %cst_47 = arith.constant dense<0xFF800000> : vector<24xf32>
    %159 = vector.multi_reduction <maximumf>, %158, %cst_47 [1] : vector<24x24xf32> to vector<24xf32>
    %160 = vector.shape_cast %159 : vector<24xf32> to vector<24x1xf32>
    %161 = vector.broadcast %160 : vector<24x1xf32> to vector<24x24xf32>
    %162 = arith.subf %158, %161 : vector<24x24xf32>
    %163 = math.exp %162 : vector<24x24xf32>
    %cst_48 = arith.constant dense<0.000000e+00> : vector<24xf32>
    %164 = vector.multi_reduction <add>, %163, %cst_48 [1] : vector<24x24xf32> to vector<24xf32>
    %165 = vector.shape_cast %164 : vector<24xf32> to vector<24x1xf32>
    %166 = vector.broadcast %165 : vector<24x1xf32> to vector<24x24xf32>
    %167 = arith.divf %163, %166 : vector<24x24xf32>
    %168 = arith.truncf %167 : vector<24x24xf32> to vector<24x24xbf16>
    %169 = arith.truncf %152 : vector<24x8xf32> to vector<24x8xbf16>
    %cst_49 = arith.constant dense<0.000000e+00> : vector<24x8xf32>
    %170 = tpu.matmul %168, %169, %cst_49 {dimension_numbers = #tpu.dot_dimension_numbers<[1], [0], [0], [1], [0, 0, 1, 1], [], []>} : vector<24x24xbf16>, vector<24x8xbf16>, vector<24x8xf32> -> vector<24x8xf32>
    %171 = vector.extract_strided_slice %107 {offsets = [0, 24], sizes = [24, 8], strides = [1, 1]} : vector<24x96xf32> to vector<24x8xf32>
    %172 = vector.extract_strided_slice %107 {offsets = [0, 56], sizes = [24, 8], strides = [1, 1]} : vector<24x96xf32> to vector<24x8xf32>
    %173 = vector.extract_strided_slice %107 {offsets = [0, 88], sizes = [24, 8], strides = [1, 1]} : vector<24x96xf32> to vector<24x8xf32>
    %174 = arith.truncf %171 : vector<24x8xf32> to vector<24x8xbf16>
    %175 = arith.truncf %172 : vector<24x8xf32> to vector<24x8xbf16>
    %cst_50 = arith.constant dense<0.000000e+00> : vector<24x24xf32>
    %176 = tpu.matmul %174, %175, %cst_50 {dimension_numbers = #tpu.dot_dimension_numbers<[1], [1], [0], [0], [0, 0, 1, 0], [], []>} : vector<24x8xbf16>, vector<24x8xbf16>, vector<24x24xf32> -> vector<24x24xf32>
    %cst_51 = arith.constant 0.353553385 : f32
    %177 = vector.broadcast %cst_51 : f32 to vector<24x24xf32>
    %178 = arith.mulf %176, %177 : vector<24x24xf32>
    %179 = arith.addf %178, %12 : vector<24x24xf32>
    %cst_52 = arith.constant dense<0xFF800000> : vector<24xf32>
    %180 = vector.multi_reduction <maximumf>, %179, %cst_52 [1] : vector<24x24xf32> to vector<24xf32>
    %181 = vector.shape_cast %180 : vector<24xf32> to vector<24x1xf32>
    %182 = vector.broadcast %181 : vector<24x1xf32> to vector<24x24xf32>
    %183 = arith.subf %179, %182 : vector<24x24xf32>
    %184 = math.exp %183 : vector<24x24xf32>
    %cst_53 = arith.constant dense<0.000000e+00> : vector<24xf32>
    %185 = vector.multi_reduction <add>, %184, %cst_53 [1] : vector<24x24xf32> to vector<24xf32>
    %186 = vector.shape_cast %185 : vector<24xf32> to vector<24x1xf32>
    %187 = vector.broadcast %186 : vector<24x1xf32> to vector<24x24xf32>
    %188 = arith.divf %184, %187 : vector<24x24xf32>
    %189 = arith.truncf %188 : vector<24x24xf32> to vector<24x24xbf16>
    %190 = arith.truncf %173 : vector<24x8xf32> to vector<24x8xbf16>
    %cst_54 = arith.constant dense<0.000000e+00> : vector<24x8xf32>
    %191 = tpu.matmul %189, %190, %cst_54 {dimension_numbers = #tpu.dot_dimension_numbers<[1], [0], [0], [1], [0, 0, 1, 1], [], []>} : vector<24x24xbf16>, vector<24x8xbf16>, vector<24x8xf32> -> vector<24x8xf32>
    %192 = tpu.concatenate %128, %149, %170, %191 in 1 : vector<24x8xf32>, vector<24x8xf32>, vector<24x8xf32>, vector<24x8xf32> -> vector<24x32xf32>
    %193 = tpu.concatenate %106, %192 in 0 : vector<24x32xf32>, vector<24x32xf32> -> vector<48x32xf32>
    %194 = arith.truncf %193 : vector<48x32xf32> to vector<48x32xbf16>
    %c0_55 = arith.constant 0 : index
    %c0_56 = arith.constant 0 : index
    %c0_57 = arith.constant 0 : index
    %195 = vector.load %arg6[%c0_55, %c0_56, %c0_57] : memref<2x32x32xbf16, #tpu.memory_space<vmem>>, vector<1x32x32xbf16>
    %196 = vector.shape_cast %195 : vector<1x32x32xbf16> to vector<32x32xbf16>
    %cst_58 = arith.constant dense<0.000000e+00> : vector<48x32xf32>
    %197 = tpu.matmul %194, %196, %cst_58 {dimension_numbers = #tpu.dot_dimension_numbers<[1], [0], [0], [1], [0, 0, 1, 1], [], []>} : vector<48x32xbf16>, vector<32x32xbf16>, vector<48x32xf32> -> vector<48x32xf32>
    %c0_59 = arith.constant 0 : index
    %c0_60 = arith.constant 0 : index
    %c0_61 = arith.constant 0 : index
    %198 = vector.load %arg7[%c0_59, %c0_60, %c0_61] : memref<2x1x32xf32, #tpu.memory_space<vmem>>, vector<1x1x32xf32>
    %199 = vector.shape_cast %198 : vector<1x1x32xf32> to vector<1x32xf32>
    %200 = vector.broadcast %199 : vector<1x32xf32> to vector<48x32xf32>
    %201 = arith.addf %197, %200 : vector<48x32xf32>
    %202 = arith.addf %6, %201 : vector<48x32xf32>
    %c0_62 = arith.constant 0 : index
    %c0_63 = arith.constant 0 : index
    %c0_64 = arith.constant 0 : index
    %203 = vector.load %arg8[%c0_62, %c0_63, %c0_64] : memref<2x1x32xf32, #tpu.memory_space<vmem>>, vector<1x1x32xf32>
    %204 = vector.shape_cast %203 : vector<1x1x32xf32> to vector<1x32xf32>
    %c0_65 = arith.constant 0 : index
    %c0_66 = arith.constant 0 : index
    %c0_67 = arith.constant 0 : index
    %205 = vector.load %arg9[%c0_65, %c0_66, %c0_67] : memref<2x1x32xf32, #tpu.memory_space<vmem>>, vector<1x1x32xf32>
    %206 = vector.shape_cast %205 : vector<1x1x32xf32> to vector<1x32xf32>
    %cst_68 = arith.constant dense<0.000000e+00> : vector<48xf32>
    %207 = vector.multi_reduction <add>, %202, %cst_68 [1] : vector<48x32xf32> to vector<48xf32>
    %208 = vector.shape_cast %207 : vector<48xf32> to vector<48x1xf32>
    %cst_69 = arith.constant 3.200000e+01 : f32
    %209 = vector.broadcast %cst_69 : f32 to vector<48x1xf32>
    %210 = arith.divf %208, %209 : vector<48x1xf32>
    %211 = vector.broadcast %210 : vector<48x1xf32> to vector<48x32xf32>
    %212 = arith.subf %202, %211 : vector<48x32xf32>
    %213 = arith.mulf %212, %212 : vector<48x32xf32>
    %cst_70 = arith.constant dense<0.000000e+00> : vector<48xf32>
    %214 = vector.multi_reduction <add>, %213, %cst_70 [1] : vector<48x32xf32> to vector<48xf32>
    %215 = vector.shape_cast %214 : vector<48xf32> to vector<48x1xf32>
    %cst_71 = arith.constant 3.200000e+01 : f32
    %216 = vector.broadcast %cst_71 : f32 to vector<48x1xf32>
    %217 = arith.divf %215, %216 : vector<48x1xf32>
    %218 = vector.broadcast %210 : vector<48x1xf32> to vector<48x32xf32>
    %219 = arith.subf %202, %218 : vector<48x32xf32>
    %cst_72 = arith.constant 9.99999974E-6 : f32
    %220 = vector.broadcast %cst_72 : f32 to vector<48x1xf32>
    %221 = arith.addf %217, %220 : vector<48x1xf32>
    %222 = math.rsqrt %221 : vector<48x1xf32>
    %223 = vector.broadcast %222 : vector<48x1xf32> to vector<48x32xf32>
    %224 = arith.mulf %219, %223 : vector<48x32xf32>
    %225 = vector.broadcast %204 : vector<1x32xf32> to vector<48x32xf32>
    %226 = arith.mulf %224, %225 : vector<48x32xf32>
    %227 = vector.broadcast %206 : vector<1x32xf32> to vector<48x32xf32>
    %228 = arith.addf %226, %227 : vector<48x32xf32>
    %229 = arith.truncf %228 : vector<48x32xf32> to vector<48x32xbf16>
    %c0_73 = arith.constant 0 : index
    %c0_74 = arith.constant 0 : index
    %c0_75 = arith.constant 0 : index
    %230 = vector.load %arg12[%c0_73, %c0_74, %c0_75] : memref<2x32x128xbf16, #tpu.memory_space<vmem>>, vector<1x32x128xbf16>
    %231 = vector.shape_cast %230 : vector<1x32x128xbf16> to vector<32x128xbf16>
    %cst_76 = arith.constant dense<0.000000e+00> : vector<48x128xf32>
    %232 = tpu.matmul %229, %231, %cst_76 {dimension_numbers = #tpu.dot_dimension_numbers<[1], [0], [0], [1], [0, 0, 1, 1], [], []>} : vector<48x32xbf16>, vector<32x128xbf16>, vector<48x128xf32> -> vector<48x128xf32>
    %c0_77 = arith.constant 0 : index
    %c0_78 = arith.constant 0 : index
    %c0_79 = arith.constant 0 : index
    %233 = vector.load %arg13[%c0_77, %c0_78, %c0_79] : memref<2x1x128xf32, #tpu.memory_space<vmem>>, vector<1x1x128xf32>
    %234 = vector.shape_cast %233 : vector<1x1x128xf32> to vector<1x128xf32>
    %235 = vector.broadcast %234 : vector<1x128xf32> to vector<48x128xf32>
    %236 = arith.addf %232, %235 : vector<48x128xf32>
    %cst_80 = arith.constant 0.000000e+00 : f32
    %237 = vector.broadcast %cst_80 : f32 to vector<48x128xf32>
    %238 = arith.maximumf %236, %237 : vector<48x128xf32>
    %239 = arith.truncf %238 : vector<48x128xf32> to vector<48x128xbf16>
    %c0_81 = arith.constant 0 : index
    %c0_82 = arith.constant 0 : index
    %c0_83 = arith.constant 0 : index
    %240 = vector.load %arg14[%c0_81, %c0_82, %c0_83] : memref<2x128x32xbf16, #tpu.memory_space<vmem>>, vector<1x128x32xbf16>
    %241 = vector.shape_cast %240 : vector<1x128x32xbf16> to vector<128x32xbf16>
    %cst_84 = arith.constant dense<0.000000e+00> : vector<48x32xf32>
    %242 = tpu.matmul %239, %241, %cst_84 {dimension_numbers = #tpu.dot_dimension_numbers<[1], [0], [0], [1], [0, 0, 1, 1], [], []>} : vector<48x128xbf16>, vector<128x32xbf16>, vector<48x32xf32> -> vector<48x32xf32>
    %c0_85 = arith.constant 0 : index
    %c0_86 = arith.constant 0 : index
    %c0_87 = arith.constant 0 : index
    %243 = vector.load %arg15[%c0_85, %c0_86, %c0_87] : memref<2x1x32xf32, #tpu.memory_space<vmem>>, vector<1x1x32xf32>
    %244 = vector.shape_cast %243 : vector<1x1x32xf32> to vector<1x32xf32>
    %245 = vector.broadcast %244 : vector<1x32xf32> to vector<48x32xf32>
    %246 = arith.addf %242, %245 : vector<48x32xf32>
    %247 = arith.addf %228, %246 : vector<48x32xf32>
    %c0_88 = arith.constant 0 : index
    %c0_89 = arith.constant 0 : index
    %c0_90 = arith.constant 0 : index
    %248 = vector.load %arg10[%c0_88, %c0_89, %c0_90] : memref<2x1x32xf32, #tpu.memory_space<vmem>>, vector<1x1x32xf32>
    %249 = vector.shape_cast %248 : vector<1x1x32xf32> to vector<1x32xf32>
    %c0_91 = arith.constant 0 : index
    %c0_92 = arith.constant 0 : index
    %c0_93 = arith.constant 0 : index
    %250 = vector.load %arg11[%c0_91, %c0_92, %c0_93] : memref<2x1x32xf32, #tpu.memory_space<vmem>>, vector<1x1x32xf32>
    %251 = vector.shape_cast %250 : vector<1x1x32xf32> to vector<1x32xf32>
    %cst_94 = arith.constant dense<0.000000e+00> : vector<48xf32>
    %252 = vector.multi_reduction <add>, %247, %cst_94 [1] : vector<48x32xf32> to vector<48xf32>
    %253 = vector.shape_cast %252 : vector<48xf32> to vector<48x1xf32>
    %cst_95 = arith.constant 3.200000e+01 : f32
    %254 = vector.broadcast %cst_95 : f32 to vector<48x1xf32>
    %255 = arith.divf %253, %254 : vector<48x1xf32>
    %256 = vector.broadcast %255 : vector<48x1xf32> to vector<48x32xf32>
    %257 = arith.subf %247, %256 : vector<48x32xf32>
    %258 = arith.mulf %257, %257 : vector<48x32xf32>
    %cst_96 = arith.constant dense<0.000000e+00> : vector<48xf32>
    %259 = vector.multi_reduction <add>, %258, %cst_96 [1] : vector<48x32xf32> to vector<48xf32>
    %260 = vector.shape_cast %259 : vector<48xf32> to vector<48x1xf32>
    %cst_97 = arith.constant 3.200000e+01 : f32
    %261 = vector.broadcast %cst_97 : f32 to vector<48x1xf32>
    %262 = arith.divf %260, %261 : vector<48x1xf32>
    %263 = vector.broadcast %255 : vector<48x1xf32> to vector<48x32xf32>
    %264 = arith.subf %247, %263 : vector<48x32xf32>
    %cst_98 = arith.constant 9.99999974E-6 : f32
    %265 = vector.broadcast %cst_98 : f32 to vector<48x1xf32>
    %266 = arith.addf %262, %265 : vector<48x1xf32>
    %267 = math.rsqrt %266 : vector<48x1xf32>
    %268 = vector.broadcast %267 : vector<48x1xf32> to vector<48x32xf32>
    %269 = arith.mulf %264, %268 : vector<48x32xf32>
    %270 = vector.broadcast %249 : vector<1x32xf32> to vector<48x32xf32>
    %271 = arith.mulf %269, %270 : vector<48x32xf32>
    %272 = vector.broadcast %251 : vector<1x32xf32> to vector<48x32xf32>
    %273 = arith.addf %271, %272 : vector<48x32xf32>
    %274 = arith.truncf %273 : vector<48x32xf32> to vector<48x32xbf16>
    %c1 = arith.constant 1 : index
    %c0_99 = arith.constant 0 : index
    %c0_100 = arith.constant 0 : index
    %275 = vector.load %arg4[%c1, %c0_99, %c0_100] : memref<2x32x96xbf16, #tpu.memory_space<vmem>>, vector<1x32x96xbf16>
    %276 = vector.shape_cast %275 : vector<1x32x96xbf16> to vector<32x96xbf16>
    %cst_101 = arith.constant dense<0.000000e+00> : vector<48x96xf32>
    %277 = tpu.matmul %274, %276, %cst_101 {dimension_numbers = #tpu.dot_dimension_numbers<[1], [0], [0], [1], [0, 0, 1, 1], [], []>} : vector<48x32xbf16>, vector<32x96xbf16>, vector<48x96xf32> -> vector<48x96xf32>
    %c1_102 = arith.constant 1 : index
    %c0_103 = arith.constant 0 : index
    %c0_104 = arith.constant 0 : index
    %278 = vector.load %arg5[%c1_102, %c0_103, %c0_104] : memref<2x1x96xf32, #tpu.memory_space<vmem>>, vector<1x1x96xf32>
    %279 = vector.shape_cast %278 : vector<1x1x96xf32> to vector<1x96xf32>
    %280 = vector.broadcast %279 : vector<1x96xf32> to vector<48x96xf32>
    %281 = arith.addf %277, %280 : vector<48x96xf32>
    %282 = vector.extract_strided_slice %281 {offsets = [0, 0], sizes = [24, 96], strides = [1, 1]} : vector<48x96xf32> to vector<24x96xf32>
    %283 = vector.extract_strided_slice %282 {offsets = [0, 0], sizes = [24, 8], strides = [1, 1]} : vector<24x96xf32> to vector<24x8xf32>
    %284 = vector.extract_strided_slice %282 {offsets = [0, 32], sizes = [24, 8], strides = [1, 1]} : vector<24x96xf32> to vector<24x8xf32>
    %285 = vector.extract_strided_slice %282 {offsets = [0, 64], sizes = [24, 8], strides = [1, 1]} : vector<24x96xf32> to vector<24x8xf32>
    %286 = arith.truncf %283 : vector<24x8xf32> to vector<24x8xbf16>
    %287 = arith.truncf %284 : vector<24x8xf32> to vector<24x8xbf16>
    %cst_105 = arith.constant dense<0.000000e+00> : vector<24x24xf32>
    %288 = tpu.matmul %286, %287, %cst_105 {dimension_numbers = #tpu.dot_dimension_numbers<[1], [1], [0], [0], [0, 0, 1, 0], [], []>} : vector<24x8xbf16>, vector<24x8xbf16>, vector<24x24xf32> -> vector<24x24xf32>
    %cst_106 = arith.constant 0.353553385 : f32
    %289 = vector.broadcast %cst_106 : f32 to vector<24x24xf32>
    %290 = arith.mulf %288, %289 : vector<24x24xf32>
    %291 = arith.addf %290, %12 : vector<24x24xf32>
    %cst_107 = arith.constant dense<0xFF800000> : vector<24xf32>
    %292 = vector.multi_reduction <maximumf>, %291, %cst_107 [1] : vector<24x24xf32> to vector<24xf32>
    %293 = vector.shape_cast %292 : vector<24xf32> to vector<24x1xf32>
    %294 = vector.broadcast %293 : vector<24x1xf32> to vector<24x24xf32>
    %295 = arith.subf %291, %294 : vector<24x24xf32>
    %296 = math.exp %295 : vector<24x24xf32>
    %cst_108 = arith.constant dense<0.000000e+00> : vector<24xf32>
    %297 = vector.multi_reduction <add>, %296, %cst_108 [1] : vector<24x24xf32> to vector<24xf32>
    %298 = vector.shape_cast %297 : vector<24xf32> to vector<24x1xf32>
    %299 = vector.broadcast %298 : vector<24x1xf32> to vector<24x24xf32>
    %300 = arith.divf %296, %299 : vector<24x24xf32>
    %301 = arith.truncf %300 : vector<24x24xf32> to vector<24x24xbf16>
    %302 = arith.truncf %285 : vector<24x8xf32> to vector<24x8xbf16>
    %cst_109 = arith.constant dense<0.000000e+00> : vector<24x8xf32>
    %303 = tpu.matmul %301, %302, %cst_109 {dimension_numbers = #tpu.dot_dimension_numbers<[1], [0], [0], [1], [0, 0, 1, 1], [], []>} : vector<24x24xbf16>, vector<24x8xbf16>, vector<24x8xf32> -> vector<24x8xf32>
    %304 = vector.extract_strided_slice %282 {offsets = [0, 8], sizes = [24, 8], strides = [1, 1]} : vector<24x96xf32> to vector<24x8xf32>
    %305 = vector.extract_strided_slice %282 {offsets = [0, 40], sizes = [24, 8], strides = [1, 1]} : vector<24x96xf32> to vector<24x8xf32>
    %306 = vector.extract_strided_slice %282 {offsets = [0, 72], sizes = [24, 8], strides = [1, 1]} : vector<24x96xf32> to vector<24x8xf32>
    %307 = arith.truncf %304 : vector<24x8xf32> to vector<24x8xbf16>
    %308 = arith.truncf %305 : vector<24x8xf32> to vector<24x8xbf16>
    %cst_110 = arith.constant dense<0.000000e+00> : vector<24x24xf32>
    %309 = tpu.matmul %307, %308, %cst_110 {dimension_numbers = #tpu.dot_dimension_numbers<[1], [1], [0], [0], [0, 0, 1, 0], [], []>} : vector<24x8xbf16>, vector<24x8xbf16>, vector<24x24xf32> -> vector<24x24xf32>
    %cst_111 = arith.constant 0.353553385 : f32
    %310 = vector.broadcast %cst_111 : f32 to vector<24x24xf32>
    %311 = arith.mulf %309, %310 : vector<24x24xf32>
    %312 = arith.addf %311, %12 : vector<24x24xf32>
    %cst_112 = arith.constant dense<0xFF800000> : vector<24xf32>
    %313 = vector.multi_reduction <maximumf>, %312, %cst_112 [1] : vector<24x24xf32> to vector<24xf32>
    %314 = vector.shape_cast %313 : vector<24xf32> to vector<24x1xf32>
    %315 = vector.broadcast %314 : vector<24x1xf32> to vector<24x24xf32>
    %316 = arith.subf %312, %315 : vector<24x24xf32>
    %317 = math.exp %316 : vector<24x24xf32>
    %cst_113 = arith.constant dense<0.000000e+00> : vector<24xf32>
    %318 = vector.multi_reduction <add>, %317, %cst_113 [1] : vector<24x24xf32> to vector<24xf32>
    %319 = vector.shape_cast %318 : vector<24xf32> to vector<24x1xf32>
    %320 = vector.broadcast %319 : vector<24x1xf32> to vector<24x24xf32>
    %321 = arith.divf %317, %320 : vector<24x24xf32>
    %322 = arith.truncf %321 : vector<24x24xf32> to vector<24x24xbf16>
    %323 = arith.truncf %306 : vector<24x8xf32> to vector<24x8xbf16>
    %cst_114 = arith.constant dense<0.000000e+00> : vector<24x8xf32>
    %324 = tpu.matmul %322, %323, %cst_114 {dimension_numbers = #tpu.dot_dimension_numbers<[1], [0], [0], [1], [0, 0, 1, 1], [], []>} : vector<24x24xbf16>, vector<24x8xbf16>, vector<24x8xf32> -> vector<24x8xf32>
    %325 = vector.extract_strided_slice %282 {offsets = [0, 16], sizes = [24, 8], strides = [1, 1]} : vector<24x96xf32> to vector<24x8xf32>
    %326 = vector.extract_strided_slice %282 {offsets = [0, 48], sizes = [24, 8], strides = [1, 1]} : vector<24x96xf32> to vector<24x8xf32>
    %327 = vector.extract_strided_slice %282 {offsets = [0, 80], sizes = [24, 8], strides = [1, 1]} : vector<24x96xf32> to vector<24x8xf32>
    %328 = arith.truncf %325 : vector<24x8xf32> to vector<24x8xbf16>
    %329 = arith.truncf %326 : vector<24x8xf32> to vector<24x8xbf16>
    %cst_115 = arith.constant dense<0.000000e+00> : vector<24x24xf32>
    %330 = tpu.matmul %328, %329, %cst_115 {dimension_numbers = #tpu.dot_dimension_numbers<[1], [1], [0], [0], [0, 0, 1, 0], [], []>} : vector<24x8xbf16>, vector<24x8xbf16>, vector<24x24xf32> -> vector<24x24xf32>
    %cst_116 = arith.constant 0.353553385 : f32
    %331 = vector.broadcast %cst_116 : f32 to vector<24x24xf32>
    %332 = arith.mulf %330, %331 : vector<24x24xf32>
    %333 = arith.addf %332, %12 : vector<24x24xf32>
    %cst_117 = arith.constant dense<0xFF800000> : vector<24xf32>
    %334 = vector.multi_reduction <maximumf>, %333, %cst_117 [1] : vector<24x24xf32> to vector<24xf32>
    %335 = vector.shape_cast %334 : vector<24xf32> to vector<24x1xf32>
    %336 = vector.broadcast %335 : vector<24x1xf32> to vector<24x24xf32>
    %337 = arith.subf %333, %336 : vector<24x24xf32>
    %338 = math.exp %337 : vector<24x24xf32>
    %cst_118 = arith.constant dense<0.000000e+00> : vector<24xf32>
    %339 = vector.multi_reduction <add>, %338, %cst_118 [1] : vector<24x24xf32> to vector<24xf32>
    %340 = vector.shape_cast %339 : vector<24xf32> to vector<24x1xf32>
    %341 = vector.broadcast %340 : vector<24x1xf32> to vector<24x24xf32>
    %342 = arith.divf %338, %341 : vector<24x24xf32>
    %343 = arith.truncf %342 : vector<24x24xf32> to vector<24x24xbf16>
    %344 = arith.truncf %327 : vector<24x8xf32> to vector<24x8xbf16>
    %cst_119 = arith.constant dense<0.000000e+00> : vector<24x8xf32>
    %345 = tpu.matmul %343, %344, %cst_119 {dimension_numbers = #tpu.dot_dimension_numbers<[1], [0], [0], [1], [0, 0, 1, 1], [], []>} : vector<24x24xbf16>, vector<24x8xbf16>, vector<24x8xf32> -> vector<24x8xf32>
    %346 = vector.extract_strided_slice %282 {offsets = [0, 24], sizes = [24, 8], strides = [1, 1]} : vector<24x96xf32> to vector<24x8xf32>
    %347 = vector.extract_strided_slice %282 {offsets = [0, 56], sizes = [24, 8], strides = [1, 1]} : vector<24x96xf32> to vector<24x8xf32>
    %348 = vector.extract_strided_slice %282 {offsets = [0, 88], sizes = [24, 8], strides = [1, 1]} : vector<24x96xf32> to vector<24x8xf32>
    %349 = arith.truncf %346 : vector<24x8xf32> to vector<24x8xbf16>
    %350 = arith.truncf %347 : vector<24x8xf32> to vector<24x8xbf16>
    %cst_120 = arith.constant dense<0.000000e+00> : vector<24x24xf32>
    %351 = tpu.matmul %349, %350, %cst_120 {dimension_numbers = #tpu.dot_dimension_numbers<[1], [1], [0], [0], [0, 0, 1, 0], [], []>} : vector<24x8xbf16>, vector<24x8xbf16>, vector<24x24xf32> -> vector<24x24xf32>
    %cst_121 = arith.constant 0.353553385 : f32
    %352 = vector.broadcast %cst_121 : f32 to vector<24x24xf32>
    %353 = arith.mulf %351, %352 : vector<24x24xf32>
    %354 = arith.addf %353, %12 : vector<24x24xf32>
    %cst_122 = arith.constant dense<0xFF800000> : vector<24xf32>
    %355 = vector.multi_reduction <maximumf>, %354, %cst_122 [1] : vector<24x24xf32> to vector<24xf32>
    %356 = vector.shape_cast %355 : vector<24xf32> to vector<24x1xf32>
    %357 = vector.broadcast %356 : vector<24x1xf32> to vector<24x24xf32>
    %358 = arith.subf %354, %357 : vector<24x24xf32>
    %359 = math.exp %358 : vector<24x24xf32>
    %cst_123 = arith.constant dense<0.000000e+00> : vector<24xf32>
    %360 = vector.multi_reduction <add>, %359, %cst_123 [1] : vector<24x24xf32> to vector<24xf32>
    %361 = vector.shape_cast %360 : vector<24xf32> to vector<24x1xf32>
    %362 = vector.broadcast %361 : vector<24x1xf32> to vector<24x24xf32>
    %363 = arith.divf %359, %362 : vector<24x24xf32>
    %364 = arith.truncf %363 : vector<24x24xf32> to vector<24x24xbf16>
    %365 = arith.truncf %348 : vector<24x8xf32> to vector<24x8xbf16>
    %cst_124 = arith.constant dense<0.000000e+00> : vector<24x8xf32>
    %366 = tpu.matmul %364, %365, %cst_124 {dimension_numbers = #tpu.dot_dimension_numbers<[1], [0], [0], [1], [0, 0, 1, 1], [], []>} : vector<24x24xbf16>, vector<24x8xbf16>, vector<24x8xf32> -> vector<24x8xf32>
    %367 = tpu.concatenate %303, %324, %345, %366 in 1 : vector<24x8xf32>, vector<24x8xf32>, vector<24x8xf32>, vector<24x8xf32> -> vector<24x32xf32>
    %368 = vector.extract_strided_slice %281 {offsets = [24, 0], sizes = [24, 96], strides = [1, 1]} : vector<48x96xf32> to vector<24x96xf32>
    %369 = vector.extract_strided_slice %368 {offsets = [0, 0], sizes = [24, 8], strides = [1, 1]} : vector<24x96xf32> to vector<24x8xf32>
    %370 = vector.extract_strided_slice %368 {offsets = [0, 32], sizes = [24, 8], strides = [1, 1]} : vector<24x96xf32> to vector<24x8xf32>
    %371 = vector.extract_strided_slice %368 {offsets = [0, 64], sizes = [24, 8], strides = [1, 1]} : vector<24x96xf32> to vector<24x8xf32>
    %372 = arith.truncf %369 : vector<24x8xf32> to vector<24x8xbf16>
    %373 = arith.truncf %370 : vector<24x8xf32> to vector<24x8xbf16>
    %cst_125 = arith.constant dense<0.000000e+00> : vector<24x24xf32>
    %374 = tpu.matmul %372, %373, %cst_125 {dimension_numbers = #tpu.dot_dimension_numbers<[1], [1], [0], [0], [0, 0, 1, 0], [], []>} : vector<24x8xbf16>, vector<24x8xbf16>, vector<24x24xf32> -> vector<24x24xf32>
    %cst_126 = arith.constant 0.353553385 : f32
    %375 = vector.broadcast %cst_126 : f32 to vector<24x24xf32>
    %376 = arith.mulf %374, %375 : vector<24x24xf32>
    %377 = arith.addf %376, %12 : vector<24x24xf32>
    %cst_127 = arith.constant dense<0xFF800000> : vector<24xf32>
    %378 = vector.multi_reduction <maximumf>, %377, %cst_127 [1] : vector<24x24xf32> to vector<24xf32>
    %379 = vector.shape_cast %378 : vector<24xf32> to vector<24x1xf32>
    %380 = vector.broadcast %379 : vector<24x1xf32> to vector<24x24xf32>
    %381 = arith.subf %377, %380 : vector<24x24xf32>
    %382 = math.exp %381 : vector<24x24xf32>
    %cst_128 = arith.constant dense<0.000000e+00> : vector<24xf32>
    %383 = vector.multi_reduction <add>, %382, %cst_128 [1] : vector<24x24xf32> to vector<24xf32>
    %384 = vector.shape_cast %383 : vector<24xf32> to vector<24x1xf32>
    %385 = vector.broadcast %384 : vector<24x1xf32> to vector<24x24xf32>
    %386 = arith.divf %382, %385 : vector<24x24xf32>
    %387 = arith.truncf %386 : vector<24x24xf32> to vector<24x24xbf16>
    %388 = arith.truncf %371 : vector<24x8xf32> to vector<24x8xbf16>
    %cst_129 = arith.constant dense<0.000000e+00> : vector<24x8xf32>
    %389 = tpu.matmul %387, %388, %cst_129 {dimension_numbers = #tpu.dot_dimension_numbers<[1], [0], [0], [1], [0, 0, 1, 1], [], []>} : vector<24x24xbf16>, vector<24x8xbf16>, vector<24x8xf32> -> vector<24x8xf32>
    %390 = vector.extract_strided_slice %368 {offsets = [0, 8], sizes = [24, 8], strides = [1, 1]} : vector<24x96xf32> to vector<24x8xf32>
    %391 = vector.extract_strided_slice %368 {offsets = [0, 40], sizes = [24, 8], strides = [1, 1]} : vector<24x96xf32> to vector<24x8xf32>
    %392 = vector.extract_strided_slice %368 {offsets = [0, 72], sizes = [24, 8], strides = [1, 1]} : vector<24x96xf32> to vector<24x8xf32>
    %393 = arith.truncf %390 : vector<24x8xf32> to vector<24x8xbf16>
    %394 = arith.truncf %391 : vector<24x8xf32> to vector<24x8xbf16>
    %cst_130 = arith.constant dense<0.000000e+00> : vector<24x24xf32>
    %395 = tpu.matmul %393, %394, %cst_130 {dimension_numbers = #tpu.dot_dimension_numbers<[1], [1], [0], [0], [0, 0, 1, 0], [], []>} : vector<24x8xbf16>, vector<24x8xbf16>, vector<24x24xf32> -> vector<24x24xf32>
    %cst_131 = arith.constant 0.353553385 : f32
    %396 = vector.broadcast %cst_131 : f32 to vector<24x24xf32>
    %397 = arith.mulf %395, %396 : vector<24x24xf32>
    %398 = arith.addf %397, %12 : vector<24x24xf32>
    %cst_132 = arith.constant dense<0xFF800000> : vector<24xf32>
    %399 = vector.multi_reduction <maximumf>, %398, %cst_132 [1] : vector<24x24xf32> to vector<24xf32>
    %400 = vector.shape_cast %399 : vector<24xf32> to vector<24x1xf32>
    %401 = vector.broadcast %400 : vector<24x1xf32> to vector<24x24xf32>
    %402 = arith.subf %398, %401 : vector<24x24xf32>
    %403 = math.exp %402 : vector<24x24xf32>
    %cst_133 = arith.constant dense<0.000000e+00> : vector<24xf32>
    %404 = vector.multi_reduction <add>, %403, %cst_133 [1] : vector<24x24xf32> to vector<24xf32>
    %405 = vector.shape_cast %404 : vector<24xf32> to vector<24x1xf32>
    %406 = vector.broadcast %405 : vector<24x1xf32> to vector<24x24xf32>
    %407 = arith.divf %403, %406 : vector<24x24xf32>
    %408 = arith.truncf %407 : vector<24x24xf32> to vector<24x24xbf16>
    %409 = arith.truncf %392 : vector<24x8xf32> to vector<24x8xbf16>
    %cst_134 = arith.constant dense<0.000000e+00> : vector<24x8xf32>
    %410 = tpu.matmul %408, %409, %cst_134 {dimension_numbers = #tpu.dot_dimension_numbers<[1], [0], [0], [1], [0, 0, 1, 1], [], []>} : vector<24x24xbf16>, vector<24x8xbf16>, vector<24x8xf32> -> vector<24x8xf32>
    %411 = vector.extract_strided_slice %368 {offsets = [0, 16], sizes = [24, 8], strides = [1, 1]} : vector<24x96xf32> to vector<24x8xf32>
    %412 = vector.extract_strided_slice %368 {offsets = [0, 48], sizes = [24, 8], strides = [1, 1]} : vector<24x96xf32> to vector<24x8xf32>
    %413 = vector.extract_strided_slice %368 {offsets = [0, 80], sizes = [24, 8], strides = [1, 1]} : vector<24x96xf32> to vector<24x8xf32>
    %414 = arith.truncf %411 : vector<24x8xf32> to vector<24x8xbf16>
    %415 = arith.truncf %412 : vector<24x8xf32> to vector<24x8xbf16>
    %cst_135 = arith.constant dense<0.000000e+00> : vector<24x24xf32>
    %416 = tpu.matmul %414, %415, %cst_135 {dimension_numbers = #tpu.dot_dimension_numbers<[1], [1], [0], [0], [0, 0, 1, 0], [], []>} : vector<24x8xbf16>, vector<24x8xbf16>, vector<24x24xf32> -> vector<24x24xf32>
    %cst_136 = arith.constant 0.353553385 : f32
    %417 = vector.broadcast %cst_136 : f32 to vector<24x24xf32>
    %418 = arith.mulf %416, %417 : vector<24x24xf32>
    %419 = arith.addf %418, %12 : vector<24x24xf32>
    %cst_137 = arith.constant dense<0xFF800000> : vector<24xf32>
    %420 = vector.multi_reduction <maximumf>, %419, %cst_137 [1] : vector<24x24xf32> to vector<24xf32>
    %421 = vector.shape_cast %420 : vector<24xf32> to vector<24x1xf32>
    %422 = vector.broadcast %421 : vector<24x1xf32> to vector<24x24xf32>
    %423 = arith.subf %419, %422 : vector<24x24xf32>
    %424 = math.exp %423 : vector<24x24xf32>
    %cst_138 = arith.constant dense<0.000000e+00> : vector<24xf32>
    %425 = vector.multi_reduction <add>, %424, %cst_138 [1] : vector<24x24xf32> to vector<24xf32>
    %426 = vector.shape_cast %425 : vector<24xf32> to vector<24x1xf32>
    %427 = vector.broadcast %426 : vector<24x1xf32> to vector<24x24xf32>
    %428 = arith.divf %424, %427 : vector<24x24xf32>
    %429 = arith.truncf %428 : vector<24x24xf32> to vector<24x24xbf16>
    %430 = arith.truncf %413 : vector<24x8xf32> to vector<24x8xbf16>
    %cst_139 = arith.constant dense<0.000000e+00> : vector<24x8xf32>
    %431 = tpu.matmul %429, %430, %cst_139 {dimension_numbers = #tpu.dot_dimension_numbers<[1], [0], [0], [1], [0, 0, 1, 1], [], []>} : vector<24x24xbf16>, vector<24x8xbf16>, vector<24x8xf32> -> vector<24x8xf32>
    %432 = vector.extract_strided_slice %368 {offsets = [0, 24], sizes = [24, 8], strides = [1, 1]} : vector<24x96xf32> to vector<24x8xf32>
    %433 = vector.extract_strided_slice %368 {offsets = [0, 56], sizes = [24, 8], strides = [1, 1]} : vector<24x96xf32> to vector<24x8xf32>
    %434 = vector.extract_strided_slice %368 {offsets = [0, 88], sizes = [24, 8], strides = [1, 1]} : vector<24x96xf32> to vector<24x8xf32>
    %435 = arith.truncf %432 : vector<24x8xf32> to vector<24x8xbf16>
    %436 = arith.truncf %433 : vector<24x8xf32> to vector<24x8xbf16>
    %cst_140 = arith.constant dense<0.000000e+00> : vector<24x24xf32>
    %437 = tpu.matmul %435, %436, %cst_140 {dimension_numbers = #tpu.dot_dimension_numbers<[1], [1], [0], [0], [0, 0, 1, 0], [], []>} : vector<24x8xbf16>, vector<24x8xbf16>, vector<24x24xf32> -> vector<24x24xf32>
    %cst_141 = arith.constant 0.353553385 : f32
    %438 = vector.broadcast %cst_141 : f32 to vector<24x24xf32>
    %439 = arith.mulf %437, %438 : vector<24x24xf32>
    %440 = arith.addf %439, %12 : vector<24x24xf32>
    %cst_142 = arith.constant dense<0xFF800000> : vector<24xf32>
    %441 = vector.multi_reduction <maximumf>, %440, %cst_142 [1] : vector<24x24xf32> to vector<24xf32>
    %442 = vector.shape_cast %441 : vector<24xf32> to vector<24x1xf32>
    %443 = vector.broadcast %442 : vector<24x1xf32> to vector<24x24xf32>
    %444 = arith.subf %440, %443 : vector<24x24xf32>
    %445 = math.exp %444 : vector<24x24xf32>
    %cst_143 = arith.constant dense<0.000000e+00> : vector<24xf32>
    %446 = vector.multi_reduction <add>, %445, %cst_143 [1] : vector<24x24xf32> to vector<24xf32>
    %447 = vector.shape_cast %446 : vector<24xf32> to vector<24x1xf32>
    %448 = vector.broadcast %447 : vector<24x1xf32> to vector<24x24xf32>
    %449 = arith.divf %445, %448 : vector<24x24xf32>
    %450 = arith.truncf %449 : vector<24x24xf32> to vector<24x24xbf16>
    %451 = arith.truncf %434 : vector<24x8xf32> to vector<24x8xbf16>
    %cst_144 = arith.constant dense<0.000000e+00> : vector<24x8xf32>
    %452 = tpu.matmul %450, %451, %cst_144 {dimension_numbers = #tpu.dot_dimension_numbers<[1], [0], [0], [1], [0, 0, 1, 1], [], []>} : vector<24x24xbf16>, vector<24x8xbf16>, vector<24x8xf32> -> vector<24x8xf32>
    %453 = tpu.concatenate %389, %410, %431, %452 in 1 : vector<24x8xf32>, vector<24x8xf32>, vector<24x8xf32>, vector<24x8xf32> -> vector<24x32xf32>
    %454 = tpu.concatenate %367, %453 in 0 : vector<24x32xf32>, vector<24x32xf32> -> vector<48x32xf32>
    %455 = arith.truncf %454 : vector<48x32xf32> to vector<48x32xbf16>
    %c1_145 = arith.constant 1 : index
    %c0_146 = arith.constant 0 : index
    %c0_147 = arith.constant 0 : index
    %456 = vector.load %arg6[%c1_145, %c0_146, %c0_147] : memref<2x32x32xbf16, #tpu.memory_space<vmem>>, vector<1x32x32xbf16>
    %457 = vector.shape_cast %456 : vector<1x32x32xbf16> to vector<32x32xbf16>
    %cst_148 = arith.constant dense<0.000000e+00> : vector<48x32xf32>
    %458 = tpu.matmul %455, %457, %cst_148 {dimension_numbers = #tpu.dot_dimension_numbers<[1], [0], [0], [1], [0, 0, 1, 1], [], []>} : vector<48x32xbf16>, vector<32x32xbf16>, vector<48x32xf32> -> vector<48x32xf32>
    %c1_149 = arith.constant 1 : index
    %c0_150 = arith.constant 0 : index
    %c0_151 = arith.constant 0 : index
    %459 = vector.load %arg7[%c1_149, %c0_150, %c0_151] : memref<2x1x32xf32, #tpu.memory_space<vmem>>, vector<1x1x32xf32>
    %460 = vector.shape_cast %459 : vector<1x1x32xf32> to vector<1x32xf32>
    %461 = vector.broadcast %460 : vector<1x32xf32> to vector<48x32xf32>
    %462 = arith.addf %458, %461 : vector<48x32xf32>
    %463 = arith.addf %273, %462 : vector<48x32xf32>
    %c1_152 = arith.constant 1 : index
    %c0_153 = arith.constant 0 : index
    %c0_154 = arith.constant 0 : index
    %464 = vector.load %arg8[%c1_152, %c0_153, %c0_154] : memref<2x1x32xf32, #tpu.memory_space<vmem>>, vector<1x1x32xf32>
    %465 = vector.shape_cast %464 : vector<1x1x32xf32> to vector<1x32xf32>
    %c1_155 = arith.constant 1 : index
    %c0_156 = arith.constant 0 : index
    %c0_157 = arith.constant 0 : index
    %466 = vector.load %arg9[%c1_155, %c0_156, %c0_157] : memref<2x1x32xf32, #tpu.memory_space<vmem>>, vector<1x1x32xf32>
    %467 = vector.shape_cast %466 : vector<1x1x32xf32> to vector<1x32xf32>
    %cst_158 = arith.constant dense<0.000000e+00> : vector<48xf32>
    %468 = vector.multi_reduction <add>, %463, %cst_158 [1] : vector<48x32xf32> to vector<48xf32>
    %469 = vector.shape_cast %468 : vector<48xf32> to vector<48x1xf32>
    %cst_159 = arith.constant 3.200000e+01 : f32
    %470 = vector.broadcast %cst_159 : f32 to vector<48x1xf32>
    %471 = arith.divf %469, %470 : vector<48x1xf32>
    %472 = vector.broadcast %471 : vector<48x1xf32> to vector<48x32xf32>
    %473 = arith.subf %463, %472 : vector<48x32xf32>
    %474 = arith.mulf %473, %473 : vector<48x32xf32>
    %cst_160 = arith.constant dense<0.000000e+00> : vector<48xf32>
    %475 = vector.multi_reduction <add>, %474, %cst_160 [1] : vector<48x32xf32> to vector<48xf32>
    %476 = vector.shape_cast %475 : vector<48xf32> to vector<48x1xf32>
    %cst_161 = arith.constant 3.200000e+01 : f32
    %477 = vector.broadcast %cst_161 : f32 to vector<48x1xf32>
    %478 = arith.divf %476, %477 : vector<48x1xf32>
    %479 = vector.broadcast %471 : vector<48x1xf32> to vector<48x32xf32>
    %480 = arith.subf %463, %479 : vector<48x32xf32>
    %cst_162 = arith.constant 9.99999974E-6 : f32
    %481 = vector.broadcast %cst_162 : f32 to vector<48x1xf32>
    %482 = arith.addf %478, %481 : vector<48x1xf32>
    %483 = math.rsqrt %482 : vector<48x1xf32>
    %484 = vector.broadcast %483 : vector<48x1xf32> to vector<48x32xf32>
    %485 = arith.mulf %480, %484 : vector<48x32xf32>
    %486 = vector.broadcast %465 : vector<1x32xf32> to vector<48x32xf32>
    %487 = arith.mulf %485, %486 : vector<48x32xf32>
    %488 = vector.broadcast %467 : vector<1x32xf32> to vector<48x32xf32>
    %489 = arith.addf %487, %488 : vector<48x32xf32>
    %490 = arith.truncf %489 : vector<48x32xf32> to vector<48x32xbf16>
    %c1_163 = arith.constant 1 : index
    %c0_164 = arith.constant 0 : index
    %c0_165 = arith.constant 0 : index
    %491 = vector.load %arg12[%c1_163, %c0_164, %c0_165] : memref<2x32x128xbf16, #tpu.memory_space<vmem>>, vector<1x32x128xbf16>
    %492 = vector.shape_cast %491 : vector<1x32x128xbf16> to vector<32x128xbf16>
    %cst_166 = arith.constant dense<0.000000e+00> : vector<48x128xf32>
    %493 = tpu.matmul %490, %492, %cst_166 {dimension_numbers = #tpu.dot_dimension_numbers<[1], [0], [0], [1], [0, 0, 1, 1], [], []>} : vector<48x32xbf16>, vector<32x128xbf16>, vector<48x128xf32> -> vector<48x128xf32>
    %c1_167 = arith.constant 1 : index
    %c0_168 = arith.constant 0 : index
    %c0_169 = arith.constant 0 : index
    %494 = vector.load %arg13[%c1_167, %c0_168, %c0_169] : memref<2x1x128xf32, #tpu.memory_space<vmem>>, vector<1x1x128xf32>
    %495 = vector.shape_cast %494 : vector<1x1x128xf32> to vector<1x128xf32>
    %496 = vector.broadcast %495 : vector<1x128xf32> to vector<48x128xf32>
    %497 = arith.addf %493, %496 : vector<48x128xf32>
    %cst_170 = arith.constant 0.000000e+00 : f32
    %498 = vector.broadcast %cst_170 : f32 to vector<48x128xf32>
    %499 = arith.maximumf %497, %498 : vector<48x128xf32>
    %500 = arith.truncf %499 : vector<48x128xf32> to vector<48x128xbf16>
    %c1_171 = arith.constant 1 : index
    %c0_172 = arith.constant 0 : index
    %c0_173 = arith.constant 0 : index
    %501 = vector.load %arg14[%c1_171, %c0_172, %c0_173] : memref<2x128x32xbf16, #tpu.memory_space<vmem>>, vector<1x128x32xbf16>
    %502 = vector.shape_cast %501 : vector<1x128x32xbf16> to vector<128x32xbf16>
    %cst_174 = arith.constant dense<0.000000e+00> : vector<48x32xf32>
    %503 = tpu.matmul %500, %502, %cst_174 {dimension_numbers = #tpu.dot_dimension_numbers<[1], [0], [0], [1], [0, 0, 1, 1], [], []>} : vector<48x128xbf16>, vector<128x32xbf16>, vector<48x32xf32> -> vector<48x32xf32>
    %c1_175 = arith.constant 1 : index
    %c0_176 = arith.constant 0 : index
    %c0_177 = arith.constant 0 : index
    %504 = vector.load %arg15[%c1_175, %c0_176, %c0_177] : memref<2x1x32xf32, #tpu.memory_space<vmem>>, vector<1x1x32xf32>
    %505 = vector.shape_cast %504 : vector<1x1x32xf32> to vector<1x32xf32>
    %506 = vector.broadcast %505 : vector<1x32xf32> to vector<48x32xf32>
    %507 = arith.addf %503, %506 : vector<48x32xf32>
    %508 = arith.addf %489, %507 : vector<48x32xf32>
    %c1_178 = arith.constant 1 : index
    %c0_179 = arith.constant 0 : index
    %c0_180 = arith.constant 0 : index
    %509 = vector.load %arg10[%c1_178, %c0_179, %c0_180] : memref<2x1x32xf32, #tpu.memory_space<vmem>>, vector<1x1x32xf32>
    %510 = vector.shape_cast %509 : vector<1x1x32xf32> to vector<1x32xf32>
    %c1_181 = arith.constant 1 : index
    %c0_182 = arith.constant 0 : index
    %c0_183 = arith.constant 0 : index
    %511 = vector.load %arg11[%c1_181, %c0_182, %c0_183] : memref<2x1x32xf32, #tpu.memory_space<vmem>>, vector<1x1x32xf32>
    %512 = vector.shape_cast %511 : vector<1x1x32xf32> to vector<1x32xf32>
    %cst_184 = arith.constant dense<0.000000e+00> : vector<48xf32>
    %513 = vector.multi_reduction <add>, %508, %cst_184 [1] : vector<48x32xf32> to vector<48xf32>
    %514 = vector.shape_cast %513 : vector<48xf32> to vector<48x1xf32>
    %cst_185 = arith.constant 3.200000e+01 : f32
    %515 = vector.broadcast %cst_185 : f32 to vector<48x1xf32>
    %516 = arith.divf %514, %515 : vector<48x1xf32>
    %517 = vector.broadcast %516 : vector<48x1xf32> to vector<48x32xf32>
    %518 = arith.subf %508, %517 : vector<48x32xf32>
    %519 = arith.mulf %518, %518 : vector<48x32xf32>
    %cst_186 = arith.constant dense<0.000000e+00> : vector<48xf32>
    %520 = vector.multi_reduction <add>, %519, %cst_186 [1] : vector<48x32xf32> to vector<48xf32>
    %521 = vector.shape_cast %520 : vector<48xf32> to vector<48x1xf32>
    %cst_187 = arith.constant 3.200000e+01 : f32
    %522 = vector.broadcast %cst_187 : f32 to vector<48x1xf32>
    %523 = arith.divf %521, %522 : vector<48x1xf32>
    %524 = vector.broadcast %516 : vector<48x1xf32> to vector<48x32xf32>
    %525 = arith.subf %508, %524 : vector<48x32xf32>
    %cst_188 = arith.constant 9.99999974E-6 : f32
    %526 = vector.broadcast %cst_188 : f32 to vector<48x1xf32>
    %527 = arith.addf %523, %526 : vector<48x1xf32>
    %528 = math.rsqrt %527 : vector<48x1xf32>
    %529 = vector.broadcast %528 : vector<48x1xf32> to vector<48x32xf32>
    %530 = arith.mulf %525, %529 : vector<48x32xf32>
    %531 = vector.broadcast %510 : vector<1x32xf32> to vector<48x32xf32>
    %532 = arith.mulf %530, %531 : vector<48x32xf32>
    %533 = vector.broadcast %512 : vector<1x32xf32> to vector<48x32xf32>
    %534 = arith.addf %532, %533 : vector<48x32xf32>
    %535 = vector.shape_cast %534 : vector<48x32xf32> to vector<2x24x32xf32>
    %536 = vector.extract_strided_slice %535 {offsets = [0, 8, 0], sizes = [2, 8, 32], strides = [1, 1, 1]} : vector<2x24x32xf32> to vector<2x8x32xf32>
    %537 = vector.shape_cast %536 : vector<2x8x32xf32> to vector<16x32xf32>
    %538 = arith.truncf %537 : vector<16x32xf32> to vector<16x32xbf16>
    %c0_189 = arith.constant 0 : index
    %c0_190 = arith.constant 0 : index
    %539 = vector.load %arg16[%c0_189, %c0_190] : memref<32x128xbf16, #tpu.memory_space<vmem>>, vector<32x128xbf16>
    %cst_191 = arith.constant dense<0.000000e+00> : vector<16x128xf32>
    %540 = tpu.matmul %538, %539, %cst_191 {dimension_numbers = #tpu.dot_dimension_numbers<[1], [0], [0], [1], [0, 0, 1, 1], [], []>} : vector<16x32xbf16>, vector<32x128xbf16>, vector<16x128xf32> -> vector<16x128xf32>
    %c0_192 = arith.constant 0 : index
    %c0_193 = arith.constant 0 : index
    %541 = vector.load %arg17[%c0_192, %c0_193] : memref<1x128xf32, #tpu.memory_space<vmem>>, vector<1x128xf32>
    %542 = vector.broadcast %541 : vector<1x128xf32> to vector<16x128xf32>
    %543 = arith.addf %540, %542 : vector<16x128xf32>
    %544 = vector.shape_cast %543 : vector<16x128xf32> to vector<2x8x128xf32>
    %c0_194 = arith.constant 0 : index
    %c0_195 = arith.constant 0 : index
    %c0_196 = arith.constant 0 : index
    %545 = vector.load %arg18[%c0_194, %c0_195, %c0_196] : memref<2x8x128xf32, #tpu.memory_space<vmem>>, vector<2x8x128xf32>
    tpu.vector_store %arg18[%c0_194, %c0_195, %c0_196], %544 {strides = array<i32>} : memref<2x8x128xf32, #tpu.memory_space<vmem>>, vector<2x8x128xf32>,
    return
  }
  func.func @transform_0(%arg0: i32) -> (i32, i32, i32) {
    %c0_i32 = arith.constant 0 : i32
    %c0_i32_0 = arith.constant 0 : i32
    %c0_i32_1 = arith.constant 0 : i32
    return %arg0, %c0_i32, %c0_i32_0 : i32, i32, i32
  }
  func.func @transform_1(%arg0: i32) -> (i32, i32) {
    %c0_i32 = arith.constant 0 : i32
    %c0_i32_0 = arith.constant 0 : i32
    %c0_i32_1 = arith.constant 0 : i32
    return %c0_i32, %c0_i32_0 : i32, i32
  }
  func.func @transform_2(%arg0: i32) -> (i32, i32) {
    %c0_i32 = arith.constant 0 : i32
    %c0_i32_0 = arith.constant 0 : i32
    %c0_i32_1 = arith.constant 0 : i32
    return %c0_i32, %c0_i32_0 : i32, i32
  }
  func.func @transform_3(%arg0: i32) -> (i32, i32, i32) {
    %c0_i32 = arith.constant 0 : i32
    %c0_i32_0 = arith.constant 0 : i32
    %c0_i32_1 = arith.constant 0 : i32
    %c0_i32_2 = arith.constant 0 : i32
    return %c0_i32, %c0_i32_0, %c0_i32_1 : i32, i32, i32
  }
  func.func @transform_4(%arg0: i32) -> (i32, i32, i32) {
    %c0_i32 = arith.constant 0 : i32
    %c0_i32_0 = arith.constant 0 : i32
    %c0_i32_1 = arith.constant 0 : i32
    %c0_i32_2 = arith.constant 0 : i32
    return %c0_i32, %c0_i32_0, %c0_i32_1 : i32, i32, i32
  }
  func.func @transform_5(%arg0: i32) -> (i32, i32, i32) {
    %c0_i32 = arith.constant 0 : i32
    %c0_i32_0 = arith.constant 0 : i32
    %c0_i32_1 = arith.constant 0 : i32
    %c0_i32_2 = arith.constant 0 : i32
    return %c0_i32, %c0_i32_0, %c0_i32_1 : i32, i32, i32
  }
  func.func @transform_6(%arg0: i32) -> (i32, i32, i32) {
    %c0_i32 = arith.constant 0 : i32
    %c0_i32_0 = arith.constant 0 : i32
    %c0_i32_1 = arith.constant 0 : i32
    %c0_i32_2 = arith.constant 0 : i32
    return %c0_i32, %c0_i32_0, %c0_i32_1 : i32, i32, i32
  }
  func.func @transform_7(%arg0: i32) -> (i32, i32, i32) {
    %c0_i32 = arith.constant 0 : i32
    %c0_i32_0 = arith.constant 0 : i32
    %c0_i32_1 = arith.constant 0 : i32
    %c0_i32_2 = arith.constant 0 : i32
    return %c0_i32, %c0_i32_0, %c0_i32_1 : i32, i32, i32
  }
  func.func @transform_8(%arg0: i32) -> (i32, i32, i32) {
    %c0_i32 = arith.constant 0 : i32
    %c0_i32_0 = arith.constant 0 : i32
    %c0_i32_1 = arith.constant 0 : i32
    %c0_i32_2 = arith.constant 0 : i32
    return %c0_i32, %c0_i32_0, %c0_i32_1 : i32, i32, i32
  }
  func.func @transform_9(%arg0: i32) -> (i32, i32, i32) {
    %c0_i32 = arith.constant 0 : i32
    %c0_i32_0 = arith.constant 0 : i32
    %c0_i32_1 = arith.constant 0 : i32
    %c0_i32_2 = arith.constant 0 : i32
    return %c0_i32, %c0_i32_0, %c0_i32_1 : i32, i32, i32
  }
  func.func @transform_10(%arg0: i32) -> (i32, i32, i32) {
    %c0_i32 = arith.constant 0 : i32
    %c0_i32_0 = arith.constant 0 : i32
    %c0_i32_1 = arith.constant 0 : i32
    %c0_i32_2 = arith.constant 0 : i32
    return %c0_i32, %c0_i32_0, %c0_i32_1 : i32, i32, i32
  }
  func.func @transform_11(%arg0: i32) -> (i32, i32, i32) {
    %c0_i32 = arith.constant 0 : i32
    %c0_i32_0 = arith.constant 0 : i32
    %c0_i32_1 = arith.constant 0 : i32
    %c0_i32_2 = arith.constant 0 : i32
    return %c0_i32, %c0_i32_0, %c0_i32_1 : i32, i32, i32
  }
  func.func @transform_12(%arg0: i32) -> (i32, i32, i32) {
    %c0_i32 = arith.constant 0 : i32
    %c0_i32_0 = arith.constant 0 : i32
    %c0_i32_1 = arith.constant 0 : i32
    %c0_i32_2 = arith.constant 0 : i32
    return %c0_i32, %c0_i32_0, %c0_i32_1 : i32, i32, i32
  }
  func.func @transform_13(%arg0: i32) -> (i32, i32, i32) {
    %c0_i32 = arith.constant 0 : i32
    %c0_i32_0 = arith.constant 0 : i32
    %c0_i32_1 = arith.constant 0 : i32
    %c0_i32_2 = arith.constant 0 : i32
    return %c0_i32, %c0_i32_0, %c0_i32_1 : i32, i32, i32
  }
  func.func @transform_14(%arg0: i32) -> (i32, i32, i32) {
    %c0_i32 = arith.constant 0 : i32
    %c0_i32_0 = arith.constant 0 : i32
    %c0_i32_1 = arith.constant 0 : i32
    %c0_i32_2 = arith.constant 0 : i32
    return %c0_i32, %c0_i32_0, %c0_i32_1 : i32, i32, i32
  }
  func.func @transform_15(%arg0: i32) -> (i32, i32) {
    %c0_i32 = arith.constant 0 : i32
    %c0_i32_0 = arith.constant 0 : i32
    %c0_i32_1 = arith.constant 0 : i32
    return %c0_i32, %c0_i32_0 : i32, i32
  }
  func.func @transform_16(%arg0: i32) -> (i32, i32) {
    %c0_i32 = arith.constant 0 : i32
    %c0_i32_0 = arith.constant 0 : i32
    %c0_i32_1 = arith.constant 0 : i32
    return %c0_i32, %c0_i32_0 : i32, i32
  }
  func.func @transform_17(%arg0: i32) -> (i32, i32, i32) {
    %c0_i32 = arith.constant 0 : i32
    %c0_i32_0 = arith.constant 0 : i32
    %c0_i32_1 = arith.constant 0 : i32
    return %arg0, %c0_i32, %c0_i32_0 : i32, i32, i32
  }
}

</mosaic_0001>

<bundles_post_ra>
// kernel: memory_dt_forward.1
= control target key start
LH: loop header
LB: loop body
LE: loop exit
PB: predicated region body
PF: predicated region fallthrough
CT: control target
= control target key end

     0   :  { %v5648_v0 = vmov 0.0   ;;  %vm5649_vm0 = vmmov 0   ;;  %vm231_vm1 = vcmask 261120   ;;  %vm306_vm2 = vcmask 64512   ;;  %s5652_s28 = smov 64   ;;  %s5654_s30 = smov 88   ;;  %s7038_s2 = inlined_call_operand.vmem [shape: bf16[128,32], index: 2, kind: input, shape index: {}]   ;;  %s7039_s0 = inlined_call_operand.vmem [shape: f32[2,24,128], index: 0, kind: input, shape index: {}]   ;;  %s7040_s3 = inlined_call_operand.vmem [shape: bf16[2,32,96], index: 3, kind: input, shape index: {}]   ;;  %s7041_s1 = inlined_call_operand.vmem [shape: f32[48,32], index: 1, kind: input, shape index: {}]   ;;  %s7042_s4 = inlined_call_operand.vmem [shape: f32[2,1,96], index: 4, kind: input, shape index: {}]   ;;  %s7043_s5 = inlined_call_operand.vmem [shape: bf16[2,32,32], index: 5, kind: input, shape index: {}]   ;;  %s7044_s6 = inlined_call_operand.vmem [shape: f32[2,1,32], index: 6, kind: input, shape index: {}]   ;;  %s7045_s11 = inlined_call_operand.vmem [shape: bf16[2,32,128], index: 11, kind: input, shape index: {}]   ;;  %s7046_s7 = inlined_call_operand.vmem [shape: f32[2,1,32], index: 7, kind: input, shape index: {}]   ;;  %s7047_s8 = inlined_call_operand.vmem [shape: f32[2,1,32], index: 8, kind: input, shape index: {}]   ;;  %s7048_s13 = inlined_call_operand.vmem [shape: bf16[2,128,32], index: 13, kind: input, shape index: {}]   ;;  %s7049_s12 = inlined_call_operand.vmem [shape: f32[2,1,128], index: 12, kind: input, shape index: {}]   ;;  %s7050_s14 = inlined_call_operand.vmem [shape: f32[2,1,32], index: 14, kind: input, shape index: {}]   ;;  %s7051_s9 = inlined_call_operand.vmem [shape: f32[2,1,32], index: 9, kind: input, shape index: {}]   ;;  %s7052_s10 = inlined_call_operand.vmem [shape: f32[2,1,32], index: 10, kind: input, shape index: {}]   ;;  %s7053_s15 = inlined_call_operand.vmem [shape: bf16[32,128], index: 15, kind: input, shape index: {}]   ;;  %s7054_s16 = inlined_call_operand.vmem [shape: f32[1,128], index: 16, kind: input, shape index: {}]   ;;  %s7055_s17 = inlined_call_operand.vmem [shape: f32[2,8,128], index: 17, kind: output, shape index: {}]  }
   0x1   :  { %7070 = sst [smem:[#allocation2_spill]] %s7038_s2  ;;  %4779 = vmatprep.subr.bf16.mxu0 %v5648_v0  ;;  %4795 = vmatprep.mubr.msk.bf16.mxu0 %vm5649_vm0, %v5648_v0  ;;  %v5386_v18 = vld [vmem:[%s7040_s3 + $0x8] sm:$0xff]   ;;  %v5387_v19 = vld [vmem:[%s7040_s3] sm:$0xff]   ;;  %v84_v30 = vld [vmem:[%s7041_s1 + $0x10] sm:$0xff]  ;;  %vm373_vm5 = vcmask 195584   ;;  %s5653_s2 = smov 112  }
   0x2   :  { %7071 = sst [smem:[#allocation3_spill]] %s7039_s0  ;;  %4807 = vmatprep.subr.bf16.mxu1 %v5648_v0  ;;  %4811 = vmatprep.mubr.msk.bf16.mxu1 %vm5649_vm0, %v5648_v0  ;;  %v82_v21 = vld [vmem:[%s7041_s1] sm:$0xff]  ;;  %v83_v23 = vld [vmem:[%s7041_s1 + $0x8] sm:$0xff]  ;;  %v85_v32 = vld [vmem:[%s7041_s1 + $0x18] sm:$0xff]  ;;  %s5656_s18 = smov 120   ;;  %vm420_vm7 = vcmask 1043456  }
   0x3   :  { %s7072_s26 = sld [smem:[#allocation2_spill]]  ;;  %4808 = vmatpush3.bf16.msra.mxu1 %v5386_v18  ;;  %v86_v38 = vld [vmem:[%s7041_s1 + $0x20] sm:$0xff]  ;;  %v87_v41 = vld [vmem:[%s7041_s1 + $0x28] sm:$0xff]  ;;  %s5650_s1 = smov 96   ;;  %vm1024_vm8 = vcmask 130048  }
   0x4   :  { %s7073_s29 = sld [smem:[#allocation3_spill]]  ;;  %4809 = vmatprep.subr.bf16.mxu1 %v5648_v0  ;;  %v4419_v48 = vld [vmem:[%s7042_s4] ss:$0 sm:$0xff]  ;;  %s5657_s19 = smov 56  }
   0x5   :  { %s7068_s0 = smov 72   ;;  %s7066_s20 = smov 104  }
   0x6   :  { %s7064_s21 = smov 40   ;;  %s7060_s22 = smov 8  }
   0x7   :  { %4810 = vmatpush3.bf16.msra.mxu1 %v5387_v19  ;;  %s7058_s23 = smov 16   ;;  %s7062_s24 = smov 24  }
   0x8   :  { %s7076_s25 = smov 40  }
   0x9   :  { %v5378_v1 = vld [vmem:[%s7072_s26 + $0x38] sm:$0xff]   ;;  %v5379_v2 = vld [vmem:[%s7072_s26 + $0x30] sm:$0xff]   ;;  %v5380_v3 = vld [vmem:[%s7072_s26 + $0x28] sm:$0xff]  }
   0xa   :  { %4780 = vmatpush3.bf16.msra.mxu0 %v5378_v1  ;;  %v5381_v4 = vld [vmem:[%s7072_s26 + $0x20] sm:$0xff]   ;;  %v5382_v5 = vld [vmem:[%s7072_s26 + $0x18] sm:$0xff]   ;;  %v5383_v6 = vld [vmem:[%s7072_s26 + $0x10] sm:$0xff]  }
   0xb   :  { %4781 = vmatprep.subr.bf16.mxu0 %v5648_v0  ;;  %v5384_v7 = vld [vmem:[%s7072_s26 + $0x8] sm:$0xff]   ;;  %v5385_v8 = vld [vmem:[%s7072_s26] sm:$0xff]   ;;  %v59_v12 = vld [vmem:[%s7073_s29 + $0x10] sm:$0xff]  ;;  %s5658_s26 = smov 48  }
   0xc   :  { %v57_v9 = vld [vmem:[%s7073_s29] sm:$0xff]  ;;  %v58_v10 = vld [vmem:[%s7073_s29 + $0x8] sm:$0xff]  ;;  %v60_v13 = vld [vmem:[%s7073_s29 + $0x18] sm:$0xff] }
   0xd   :  { %v63_v11 = vpack.c.bf16 %v58_v10, %v57_v9  ;;  %v64_v14 = vpack.c.bf16 %v60_v13, %v59_v12  ;;  %v61_v15 = vld [vmem:[%s7073_s29 + $0x20] sm:$0xff]  ;;  %v62_v16 = vld [vmem:[%s7073_s29 + $0x28] sm:$0xff]  ;;  %v193_v10 = vlaneseq  ;;  %s5655_s29 = smov 80  }
   0xe   :  { %4782 = vmatpush3.bf16.msra.mxu0 %v5379_v2  ;;  %v65_v17 = vpack.c.bf16 %v62_v16, %v61_v15  ;;  %v5651_v16 = vmov -1e+30  }
   0xf   :  { %4783 = vmatprep.subr.bf16.mxu0 %v5648_v0  ;;  %v198_v13 = vand.u32 127, %v193_v10 }
  0x12   :  { %4784 = vmatpush3.bf16.msra.mxu0 %v5380_v3 }
  0x13   :  { %4785 = vmatprep.subr.bf16.mxu0 %v5648_v0 }
  0x16   :  { %4786 = vmatpush3.bf16.msra.mxu0 %v5381_v4 }
  0x17   :  { %4787 = vmatprep.subr.bf16.mxu0 %v5648_v0 }
  0x1a   :  { %4788 = vmatpush3.bf16.msra.mxu0 %v5382_v5 }
  0x1b   :  { %4789 = vmatprep.subr.bf16.mxu0 %v5648_v0 }
  0x1e   :  { %4790 = vmatpush3.bf16.msra.mxu0 %v5383_v6 }
  0x1f   :  { %4791 = vmatprep.subr.bf16.mxu0 %v5648_v0 }
  0x22   :  { %4792 = vmatpush3.bf16.msra.mxu0 %v5384_v7 }
  0x23   :  { %4793 = vmatprep.subr.bf16.mxu0 %v5648_v0 }
  0x26   :  { %4794 = vmatpush3.bf16.msra.mxu0 %v5385_v8 }
  0x29   :  { %4796 = vmatmul.mubr.bf16.vlgmr.msra.gmra.mxu0 %v63_v11  ;;  %v194_v11 = vshrl.u32 %v193_v10, 7 }
  0x2a   :  { %4799 = vmatprep.mubr.msk.bf16.mxu0 %vm5649_vm0, %v5648_v0 }
  0x2b   :  { %v196_v12 = vadd.s32 16, %v194_v11  ;;  %vm199_vm4 = vcmp.le.s32.totalorder %v198_v13, %v194_v11 }
  0x2d   :  { %vm201_vm3 = vcmp.le.s32.totalorder %v198_v13, %v196_v12 }
  0x31   :  { %4800 = vmatmul.mubr.bf16.gmra.mxu0 %v64_v14  ;;  %v195_v14 = vadd.s32 8, %v194_v11 }
  0x32   :  { %4803 = vmatprep.mubr.msk.bf16.mxu0 %vm5649_vm0, %v5648_v0 }
  0x33   :  { %vm200_vm6 = vcmp.le.s32.totalorder %v198_v13, %v195_v14 }
  0x39   :  { %4804 = vmatmul.mubr.bf16.gmra.mxu0 %v65_v17  ;;  %v5887_v17 = vsel %vm201_vm3, 0.0, %v5651_v16 }
  0xe9   :  { %v170_v20 = vpop.f32.mrf.mxu0 }
  0xea   :  { %v5827_v25 = vadd.f32 %v170_v20, %v82_v21  ;;  %v5889_v20 = vsel %vm199_vm4, 0.0, %v5651_v16 }
  0xeb   :  { %v4797_v22 = vpop.f32.mrf.mxu0 }
  0xed   :  { %v173_v24 = vpop.f32.mrf.mxu0 }
  0xee   :  { %v5829_v26 = vadd.f32 %v173_v24, %v83_v23 }
  0xef   :  { %v4798_v27 = vpop.f32.mrf.mxu0 }
  0xf0   :  { %v205_v28 = vpack.c.bf16 %v5829_v26, %v5827_v25 }
  0xf1   :  { %v178_v29 = vpop.f32.mrf.mxu0 }
  0xf2   :  { %4812 = vmatmul.mubr.msk.bf16.vlgmr.msra.gmra.mxu1 %vm231_vm1, %v205_v28  ;;  %v5842_v34 = vadd.f32 %v178_v29, %v84_v30  ;;  %v5894_v29 = vsel %vm200_vm6, 0.0, %v5651_v16 }
  0xf3   :  { %v4801_v31 = vpop.f32.mrf.mxu0  ;;  %4815 = vmatprep.mubr.msk.bf16.mxu1 %vm5649_vm0, %v5648_v0 }
  0xf5   :  { %v181_v33 = vpop.f32.mrf.mxu0 }
  0xf6   :  { %v5844_v35 = vadd.f32 %v181_v33, %v85_v32 }
  0xf7   :  { %v4802_v36 = vpop.f32.mrf.mxu0 }
  0xf8   :  { %v206_v37 = vpack.c.bf16 %v5844_v35, %v5842_v34 }
  0xf9   :  { %v186_v39 = vpop.f32.mrf.mxu0 }
  0xfa   :  { %4816 = vmatmul.mubr.msk.bf16.gmra.mxu1 %vm231_vm1, %v206_v37  ;;  %v5857_v42 = vadd.f32 %v186_v39, %v86_v38 }
  0xfb   :  { %v4805_v40 = vpop.f32.mrf.mxu0  ;;  %4819 = vmatprep.mubr.msk.bf16.mxu1 %vm5649_vm0, %v5648_v0 }
  0xfd   :  { %v189_v43 = vpop.f32.mrf.mxu0 }
  0xfe   :  { %v5859_v44 = vadd.f32 %v189_v43, %v87_v41 }
  0xff   :  { %v4806_v45 = vpop.f32.mrf.mxu0 }
 0x100   :  { %v207_v46 = vpack.c.bf16 %v5859_v44, %v5857_v42 }
 0x102   :  { %4820 = vmatmul.mubr.msk.bf16.gmra.mxu1 %vm231_vm1, %v207_v46 }
 0x1b2   :  { %v275_v47 = vpop.f32.mrf.mxu1 }
 0x1b3   :  { %v276_v51 = vadd.f32 %v4419_v48, %v275_v47 }
 0x1b4   :  { %v4813_v49 = vpop.f32.mrf.mxu1 }
 0x1b6   :  { %v278_v50 = vpop.f32.mrf.mxu1 }
 0x1b7   :  { %v279_v52 = vadd.f32 %v4419_v48, %v278_v50 }
 0x1b8   :  { %v4814_v53 = vpop.f32.mrf.mxu1 }
 0x1b9   :  { %v5867_v54 = vpack.c.bf16 %v279_v52, %v276_v51 }
 0x1ba   :  { %v283_v55 = vpop.f32.mrf.mxu1 }
 0x1bb   :  { %v284_v56 = vadd.f32 %v4419_v48, %v283_v55  ;;  %4827 = vmatprep.mubr.msk.bf16.mxu1 %vm306_vm2, %v5867_v54 }
 0x1bc   :  { %v4817_v57 = vpop.f32.mrf.mxu1 }
 0x1bd   :  { %v5871_v58 = vpack.c.bf16 %v284_v56, %v284_v56 }
 0x1be   :  { %v286_v59 = vpop.f32.mrf.mxu1 }
 0x1bf   :  { %v287_v60 = vadd.f32 %v4419_v48, %v286_v59  ;;  %304 = vrot.lane.b32.xlu0 %v5871_v58, %s5650_s1 }
 0x1c0   :  { %v4818_v61 = vpop.f32.mrf.mxu1 }
 0x1c2   :  { %v291_v62 = vpop.f32.mrf.mxu1 }
 0x1c3   :  { %v292_v63 = vadd.f32 %v4419_v48, %v291_v62  ;;  %302 = vrot.lane.b32.xlu0 %v5867_v54, %s5650_s1 }
 0x1c4   :  { %v4821_v1 = vpop.f32.mrf.mxu1 }
 0x1c5   :  { %v5877_v2 = vpack.c.bf16 %v292_v63, %v287_v60 }
 0x1c6   :  { %v294_v3 = vpop.f32.mrf.mxu1 }
 0x1c7   :  { %v5879_v4 = vadd.f32 %v4419_v48, %v294_v3 }
 0x1c8   :  { %v4822_v5 = vpop.f32.mrf.mxu1 }
 0x231   :  { %v305_v6 = vpop.permute.xlu0 %304 }
 0x232   :  { %5223 = vmatprep.subr.msk.bf16.mxu1 %vm306_vm2, %v305_v6  ;;  %v317_v7 = vsel %vm306_vm2, %v305_v6, 0 }
 0x233   :  { %4824 = vmatpush3.bf16.xpose.msra.mxu1 %v317_v7 }
 0x235   :  { %v303_v8 = vpop.permute.xlu0 %302 }
 0x236   :  { %5224 = vmatprep.subr.msk.bf16.mxu1 %vm306_vm2, %v303_v8  ;;  %v314_v9 = vsel %vm306_vm2, %v303_v8, 0 }
 0x23b   :  { %4826 = vmatpush3.bf16.xpose.msra.mxu1 %v314_v9 }
 0x242   :  { %4828 = vmatmul.mubr.msk.bf16.vlgmr.msra.gmra.mxu1 %vm306_vm2, %v5871_v58 }
 0x302   :  { %v4829_v15 = vpop.f32.mrf.mxu1 }
 0x303   :  { %v369_v18 = vmul.f32 0.35355338, %v4829_v15 }
 0x304   :  { %v353_v19 = vpop.f32.mrf.mxu1 }
 0x305   :  { %v367_v21 = vmul.f32 0.35355338, %v353_v19  ;;  %v372_v22 = vadd.f32 %v369_v18, %v5887_v17 }
 0x306   :  { %v4830_v23 = vpop.f32.mrf.mxu1 }
 0x307   :  { %v380_v24 = vsel %vm373_vm5, %v372_v22, -inf  ;;  %v370_v27 = vadd.f32 %v367_v21, %v5889_v20 }
 0x308   :  { %381 = vmax.xlane.f32.xlu0 %v380_v24  ;;  %v356_v28 = vpop.f32.mrf.mxu1 }
 0x309   :  { %v368_v30 = vmul.f32 0.35355338, %v356_v28  ;;  %v374_v31 = vsel %vm373_vm5, %v370_v27, -inf }
 0x30a   :  { %375 = vmax.xlane.f32.xlu1 %v374_v31 }
 0x30b   :  { %v371_v32 = vadd.f32 %v368_v30, %v5894_v29 }
 0x30d   :  { %v377_v33 = vsel %vm373_vm5, %v371_v32, -inf }
 0x30e   :  { %378 = vmax.xlane.f32.xlu1 %v377_v33 }
 0x31e   :  { %409 = vrot.lane.b32.xlu0 %v5867_v54, %s5652_s28 }
 0x31f   :  { %411 = vrot.lane.b32.xlu1 %v5871_v58, %s5652_s28 }
 0x322   :  { %643 = vrot.lane.b32.xlu0 %v5867_v54, %s5653_s2 }
 0x323   :  { %478 = vrot.lane.b32.xlu1 %v5871_v58, %s5654_s30 }
 0x327   :  { %476 = vrot.lane.b32.xlu1 %v5867_v54, %s5654_s30 }
 0x32b   :  { %649 = vrot.lane.b32.xlu1 %v5871_v58, %s5655_s29 }
 0x32f   :  { %472 = vrot.lane.b32.xlu1 %v5867_v54, %s5656_s18 }
 0x391   :  { %v382_v36 = vpop.xlane.xlu0 %381 }
 0x392   :  { %v385_v37 = vsub.f32 %v372_v22, %v382_v36 }
 0x393   :  { %v376_v38 = vpop.xlane.xlu1 %375 }
 0x394   :  { %v390_v39 = vmul.f32 1.442695, %v385_v37  ;;  %v383_v40 = vsub.f32 %v370_v27, %v376_v38 }
 0x395   :  { %v410_v49 = vpop.permute.xlu0 %409 }
 0x396   :  { %5416 = vpow2.f32 %v390_v39  ;;  %v386_v41 = vmul.f32 1.442695, %v383_v40 }
 0x397   :  { %v379_v43 = vpop.xlane.xlu1 %378 }
 0x398   :  { %5418 = vpow2.f32 %v386_v41  ;;  %v384_v45 = vsub.f32 %v371_v32, %v379_v43 }
 0x399   :  { %v644_v15 = vpop.permute.xlu0 %643 }
 0x39a   :  { %v388_v46 = vmul.f32 1.442695, %v384_v45 }
 0x39b   :  { %v412_v47 = vpop.permute.xlu1 %411 }
 0x39c   :  { %5420 = vpow2.f32 %v388_v46  ;;  %5225 = vmatprep.subr.msk.bf16.mxu1 %vm420_vm7, %v412_v47  ;;  %v422_v48 = vsel %vm420_vm7, %v412_v47, 0 }
 0x39d   :  { %4832 = vmatpush3.bf16.msra.mxu1 %v422_v48 }
 0x39e   :  { %4833 = vmatprep.subr.bf16.mxu1 %v410_v49 }
 0x39f   :  { %v479_v50 = vpop.permute.xlu1 %478 }
 0x3a0   :  { %5226 = vmatprep.subr.msk.bf16.mxu0 %vm306_vm2, %v479_v50  ;;  %v490_v51 = vsel %vm306_vm2, %v479_v50, 0 }
 0x3a1   :  { %4834 = vmatpush3.bf16.msra.mxu1 %v410_v49  ;;  %4840 = vmatpush3.bf16.xpose.msra.mxu0 %v490_v51 }
 0x3a3   :  { %v5417_v52 = vpop.eup %5416  ;;  %v477_v53 = vpop.permute.xlu1 %476 }
 0x3a4   :  { %5227 = vmatprep.subr.msk.bf16.mxu0 %vm306_vm2, %v477_v53  ;;  %v398_v55 = vsel %vm373_vm5, %v5417_v52, 0.0  ;;  %v487_v60 = vsel %vm306_vm2, %v477_v53, 0 }
 0x3a5   :  { %v5419_v56 = vpop.eup %5418  ;;  %399 = vadd.xlane.f32.xlu1 %v398_v55 }
 0x3a6   :  { %v392_v59 = vsel %vm373_vm5, %v5419_v56, 0.0 }
 0x3a7   :  { %v650_v57 = vpop.permute.xlu1 %649 }
 0x3a8   :  { %5229 = vmatprep.subr.msk.bf16.mxu1 %vm306_vm2, %v650_v57  ;;  %v661_v16 = vsel %vm306_vm2, %v650_v57, 0 }
 0x3a9   :  { %v5421_v61 = vpop.eup %5420  ;;  %393 = vadd.xlane.f32.xlu1 %v392_v59  ;;  %4842 = vmatpush3.bf16.xpose.msra.mxu0 %v487_v60 }
 0x3aa   :  { %v395_v63 = vsel %vm373_vm5, %v5421_v61, 0.0 }
 0x3ab   :  { %v473_v62 = vpop.permute.xlu1 %472 }
 0x3ac   :  { %4843 = vmatprep.mubr.msk.bf16.mxu0 %vm306_vm2, %v473_v62 }
 0x3ad   :  { %396 = vadd.xlane.f32.xlu1 %v395_v63 }
 0x3be   :  { %474 = vrot.lane.b32.xlu1 %v5871_v58, %s5656_s18 }
 0x3c2   :  { %647 = vrot.lane.b32.xlu1 %v5867_v54, %s5655_s29 }
 0x3c6   :  { %645 = vrot.lane.b32.xlu1 %v5871_v58, %s5653_s2 }
 0x42e   :  { %v400_v1 = vpop.xlane.xlu1 %399 }
 0x42f   :  { %5422 = vrcp.f32 %v400_v1 }
 0x432   :  { %v394_v3 = vpop.xlane.xlu1 %393 }
 0x433   :  { %5424 = vrcp.f32 %v394_v3 }
 0x436   :  { %v397_v5 = vpop.xlane.xlu1 %396 }
 0x437   :  { %5426 = vrcp.f32 %v397_v5 }
 0x43a   :  { %v475_v6 = vpop.permute.xlu1 %474 }
 0x43b   :  { %4844 = vmatmul.mubr.msk.bf16.vlgmr.msra.gmra.mxu0 %vm306_vm2, %v475_v6 }
 0x43c   :  { %v5423_v7 = vpop.eup %5422 }
 0x43d   :  { %v406_v10 = vmul.f32 %v5423_v7, %v5417_v52 }
 0x43e   :  { %v648_v18 = vpop.permute.xlu1 %647 }
 0x43f   :  { %v408_v14 = vpack.c.bf16 %v406_v10, %v406_v10  ;;  %v658_v19 = vsel %vm306_vm2, %v648_v18, 0 }
 0x440   :  { %v5425_v8 = vpop.eup %5424 }
 0x441   :  { %v402_v11 = vmul.f32 %v5425_v8, %v5419_v56 }
 0x442   :  { %v646_v21 = vpop.permute.xlu1 %645 }
 0x444   :  { %v5427_v9 = vpop.eup %5426 }
 0x445   :  { %v404_v12 = vmul.f32 %v5427_v9, %v5421_v61 }
 0x447   :  { %v407_v13 = vpack.c.bf16 %v404_v12, %v402_v11 }
 0x449   :  { %4835 = vmatprep.mubr.msk.bf16.mxu1 %vm373_vm5, %v407_v13 }
 0x44a   :  { %4836 = vmatmul.mubr.msk.bf16.vlgmr.msra.gmra.mxu1 %vm373_vm5, %v408_v14 }
 0x44b   :  { %4856 = vmatpush3.bf16.xpose.msra.mxu1 %v661_v16  ;;  %4859 = vmatprep.mubr.msk.bf16.mxu1 %vm306_vm2, %v644_v15 }
 0x44c   :  { %5230 = vmatprep.subr.msk.bf16.mxu1 %vm306_vm2, %v648_v18 }
 0x453   :  { %4858 = vmatpush3.bf16.xpose.msra.mxu1 %v658_v19 }
 0x45a   :  { %4860 = vmatmul.mubr.msk.bf16.vlgmr.msra.gmra.mxu1 %vm306_vm2, %v646_v21 }
 0x4fb   :  { %v4845_v22 = vpop.f32.mrf.mxu0 }
 0x4fc   :  { %v542_v24 = vmul.f32 0.35355338, %v4845_v22 }
 0x4fd   :  { %v526_v23 = vpop.f32.mrf.mxu0 }
 0x4fe   :  { %v540_v27 = vmul.f32 0.35355338, %v526_v23  ;;  %v545_v36 = vadd.f32 %v542_v24, %v5887_v17 }
 0x4ff   :  { %v4846_v28 = vpop.f32.mrf.mxu0 }
 0x500   :  { %v543_v30 = vadd.f32 %v540_v27, %v5889_v20  ;;  %v552_v38 = vsel %vm373_vm5, %v545_v36, -inf }
 0x501   :  { %v529_v31 = vpop.f32.mrf.mxu0 }
 0x502   :  { %v541_v32 = vmul.f32 0.35355338, %v529_v31  ;;  %v546_v33 = vsel %vm373_vm5, %v543_v30, -inf }
 0x503   :  { %547 = vmax.xlane.f32.xlu0 %v546_v33 }
 0x504   :  { %v544_v37 = vadd.f32 %v541_v32, %v5894_v29 }
 0x506   :  { %v549_v39 = vsel %vm373_vm5, %v544_v37, -inf }
 0x507   :  { %553 = vmax.xlane.f32.xlu0 %v552_v38  ;;  %550 = vmax.xlane.f32.xlu1 %v549_v39 }
 0x50a   :  { %v5944_v40 = vpop.f32.mrf.mxu1 }
 0x50c   :  { %v5946_v41 = vpop.f32.mrf.mxu1 }
 0x50e   :  { %v4838_v43 = vpop.f32.mrf.mxu1 }
 0x510   :  { %v5948_v45 = vpop.f32.mrf.mxu1 }
 0x51a   :  { %v4861_v46 = vpop.f32.mrf.mxu1 }
 0x51b   :  { %v713_v48 = vmul.f32 0.35355338, %v4861_v46 }
 0x51c   :  { %v697_v47 = vpop.f32.mrf.mxu1 }
 0x51d   :  { %v711_v49 = vmul.f32 0.35355338, %v697_v47  ;;  %v716_v56 = vadd.f32 %v713_v48, %v5887_v17 }
 0x51e   :  { %v4862_v50 = vpop.f32.mrf.mxu1 }
 0x51f   :  { %v714_v51 = vadd.f32 %v711_v49, %v5889_v20  ;;  %v723_v59 = vsel %vm373_vm5, %v716_v56, -inf }
 0x520   :  { %v700_v52 = vpop.f32.mrf.mxu1 }
 0x521   :  { %v712_v53 = vmul.f32 0.35355338, %v700_v52  ;;  %v717_v55 = vsel %vm373_vm5, %v714_v51, -inf }
 0x522   :  { %718 = vmax.xlane.f32.xlu0 %v717_v55 }
 0x523   :  { %v715_v57 = vadd.f32 %v712_v53, %v5894_v29 }
 0x525   :  { %v720_v60 = vsel %vm373_vm5, %v715_v57, -inf }
 0x526   :  { %724 = vmax.xlane.f32.xlu0 %v723_v59  ;;  %721 = vmax.xlane.f32.xlu1 %v720_v60 }
 0x58c   :  { %v548_v61 = vpop.xlane.xlu0 %547 }
 0x58d   :  { %v555_v62 = vsub.f32 %v543_v30, %v548_v61 }
 0x58f   :  { %v558_v63 = vmul.f32 1.442695, %v555_v62 }
 0x590   :  { %v554_v1 = vpop.xlane.xlu0 %553  ;;  %v551_v3 = vpop.xlane.xlu1 %550 }
 0x591   :  { %5428 = vpow2.f32 %v558_v63  ;;  %v557_v5 = vsub.f32 %v545_v36, %v554_v1  ;;  %v556_v6 = vsub.f32 %v544_v37, %v551_v3 }
 0x593   :  { %v562_v7 = vmul.f32 1.442695, %v557_v5  ;;  %v560_v8 = vmul.f32 1.442695, %v556_v6 }
 0x595   :  { %5430 = vpow2.f32 %v562_v7 }
 0x596   :  { %5432 = vpow2.f32 %v560_v8 }
 0x59e   :  { %v5429_v9 = vpop.eup %5428 }
 0x59f   :  { %v564_v10 = vsel %vm373_vm5, %v5429_v9, 0.0 }
 0x5a0   :  { %565 = vadd.xlane.f32.xlu1 %v564_v10 }
 0x5a2   :  { %v5431_v11 = vpop.eup %5430 }
 0x5a3   :  { %v5433_v12 = vpop.eup %5432  ;;  %v570_v13 = vsel %vm373_vm5, %v5431_v11, 0.0 }
 0x5a4   :  { %571 = vadd.xlane.f32.xlu1 %v570_v13  ;;  %v567_v14 = vsel %vm373_vm5, %v5433_v12, 0.0 }
 0x5a5   :  { %568 = vadd.xlane.f32.xlu0 %v567_v14 }
 0x5ab   :  { %v719_v15 = vpop.xlane.xlu0 %718 }
 0x5ac   :  { %v726_v22 = vsub.f32 %v714_v51, %v719_v15 }
 0x5ae   :  { %v729_v27 = vmul.f32 1.442695, %v726_v22 }
 0x5af   :  { %v725_v16 = vpop.xlane.xlu0 %724  ;;  %v722_v19 = vpop.xlane.xlu1 %721 }
 0x5b0   :  { %v728_v18 = vsub.f32 %v716_v56, %v725_v16  ;;  %v727_v21 = vsub.f32 %v715_v57, %v722_v19 }
 0x5b2   :  { %v733_v23 = vmul.f32 1.442695, %v728_v18  ;;  %v731_v24 = vmul.f32 1.442695, %v727_v21 }
 0x5b4   :  { %5434 = vpow2.f32 %v733_v23 }
 0x5b5   :  { %583 = vrot.lane.b32.xlu1 %v5871_v58, %s5657_s19  ;;  %5436 = vpow2.f32 %v731_v24 }
 0x5b6   :  { %5438 = vpow2.f32 %v729_v27 }
 0x5b9   :  { %754 = vrot.lane.b32.xlu1 %v5871_v58, %s5658_s26 }
 0x5bb   :  { %581 = vrot.lane.b32.xlu0 %v5867_v54, %s5657_s19 }
 0x5c1   :  { %v5435_v28 = vpop.eup %5434 }
 0x5c2   :  { %v5437_v30 = vpop.eup %5436  ;;  %v741_v31 = vsel %vm373_vm5, %v5435_v28, 0.0 }
 0x5c3   :  { %v5439_v32 = vpop.eup %5438  ;;  %v738_v33 = vsel %vm373_vm5, %v5437_v30, 0.0 }
 0x5c4   :  { %v735_v36 = vsel %vm373_vm5, %v5439_v32, 0.0 }
 0x5da   :  { %742 = vadd.xlane.f32.xlu0 %v741_v31 }
 0x5dd   :  { %739 = vadd.xlane.f32.xlu1 %v738_v33 }
 0x5de   :  { %736 = vadd.xlane.f32.xlu0 %v735_v36 }
 0x5ee   :  { %752 = vrot.lane.b32.xlu1 %v5867_v54, %s5658_s26 }
 0x5f2   :  { %818 = vrot.lane.b32.xlu1 %v5867_v54, %s7068_s0 }
 0x5f4   :  { %820 = vrot.lane.b32.xlu0 %v5871_v58, %s7068_s0 }
 0x5f6   :  { %816 = vrot.lane.b32.xlu1 %v5871_v58, %s7066_s20 }
 0x5f8   :  { %814 = vrot.lane.b32.xlu0 %v5867_v54, %s7066_s20 }
 0x629   :  { %v566_v37 = vpop.xlane.xlu1 %565 }
 0x62a   :  { %5440 = vrcp.f32 %v566_v37 }
 0x62d   :  { %v572_v38 = vpop.xlane.xlu1 %571 }
 0x62e   :  { %v569_v39 = vpop.xlane.xlu0 %568  ;;  %5442 = vrcp.f32 %v572_v38 }
 0x62f   :  { %5444 = vrcp.f32 %v569_v39 }
 0x631   :  { %v584_v43 = vpop.permute.xlu1 %583 }
 0x632   :  { %5228 = vmatprep.subr.msk.bf16.mxu0 %vm420_vm7, %v584_v43  ;;  %v593_v46 = vsel %vm420_vm7, %v584_v43, 0  ;;  %v582_v47 = vpop.permute.xlu0 %581 }
 0x633   :  { %4848 = vmatpush3.bf16.msra.mxu0 %v593_v46 }
 0x634   :  { %4849 = vmatprep.subr.bf16.mxu0 %v582_v47 }
 0x635   :  { %v755_v48 = vpop.permute.xlu1 %754 }
 0x636   :  { %v764_v59 = vsel %vm420_vm7, %v755_v48, 0 }
 0x637   :  { %4850 = vmatpush3.bf16.msra.mxu0 %v582_v47  ;;  %v5441_v49 = vpop.eup %5440 }
 0x638   :  { %5231 = vmatprep.subr.msk.bf16.mxu0 %vm420_vm7, %v755_v48  ;;  %v574_v53 = vmul.f32 %v5441_v49, %v5429_v9 }
 0x63b   :  { %v5443_v50 = vpop.eup %5442 }
 0x63c   :  { %v5445_v51 = vpop.eup %5444  ;;  %v578_v52 = vmul.f32 %v5443_v50, %v5431_v11 }
 0x63d   :  { %v576_v55 = vmul.f32 %v5445_v51, %v5433_v12 }
 0x63e   :  { %v580_v56 = vpack.c.bf16 %v578_v52, %v578_v52 }
 0x63f   :  { %v579_v57 = vpack.c.bf16 %v576_v55, %v574_v53 }
 0x641   :  { %4851 = vmatprep.mubr.msk.bf16.mxu0 %vm373_vm5, %v579_v57 }
 0x642   :  { %4852 = vmatmul.mubr.msk.bf16.vlgmr.msra.gmra.mxu0 %vm373_vm5, %v580_v56 }
 0x643   :  { %4864 = vmatpush3.bf16.msra.mxu0 %v764_v59 }
 0x663   :  { %v743_v60 = vpop.xlane.xlu0 %742 }
 0x664   :  { %5446 = vrcp.f32 %v743_v60 }
 0x666   :  { %v740_v61 = vpop.xlane.xlu1 %739 }
 0x667   :  { %v737_v62 = vpop.xlane.xlu0 %736  ;;  %5448 = vrcp.f32 %v740_v61 }
 0x668   :  { %5450 = vrcp.f32 %v737_v62 }
 0x66a   :  { %v753_v63 = vpop.permute.xlu1 %752 }
 0x66b   :  { %4865 = vmatprep.subr.bf16.mxu0 %v753_v63  ;;  %v821_v1 = vpop.permute.xlu0 %820 }
 0x66c   :  { %4866 = vmatpush3.bf16.msra.mxu0 %v753_v63  ;;  %v832_v13 = vsel %vm306_vm2, %v821_v1, 0 }
 0x66d   :  { %5232 = vmatprep.subr.msk.bf16.mxu0 %vm306_vm2, %v821_v1 }
 0x66e   :  { %v819_v14 = vpop.permute.xlu1 %818 }
 0x66f   :  { %v815_v12 = vpop.permute.xlu0 %814  ;;  %v829_v15 = vsel %vm306_vm2, %v819_v14, 0 }
 0x671   :  { %v5447_v3 = vpop.eup %5446 }
 0x672   :  { %v749_v8 = vmul.f32 %v5447_v3, %v5435_v28  ;;  %v817_v16 = vpop.permute.xlu1 %816 }
 0x674   :  { %v5449_v5 = vpop.eup %5448  ;;  %v751_v11 = vpack.c.bf16 %v749_v8, %v749_v8 }
 0x675   :  { %v5451_v6 = vpop.eup %5450  ;;  %v747_v7 = vmul.f32 %v5449_v5, %v5437_v30 }
 0x676   :  { %v745_v9 = vmul.f32 %v5451_v6, %v5439_v32 }
 0x678   :  { %v750_v10 = vpack.c.bf16 %v747_v7, %v745_v9  ;;  %v6023_v9 = vpack.c.bf16 %v5879_v4, %v5879_v4 }
 0x67a   :  { %4867 = vmatprep.mubr.msk.bf16.mxu0 %vm373_vm5, %v750_v10 }
 0x67b   :  { %4868 = vmatmul.mubr.msk.bf16.vlgmr.msra.gmra.mxu0 %vm373_vm5, %v751_v11 }
 0x67c   :  { %4872 = vmatpush3.bf16.xpose.msra.mxu0 %v832_v13  ;;  %4875 = vmatprep.mubr.msk.bf16.mxu0 %vm306_vm2, %v815_v12 }
 0x67d   :  { %5233 = vmatprep.subr.msk.bf16.mxu0 %vm306_vm2, %v819_v14 }
 0x684   :  { %4874 = vmatpush3.bf16.xpose.msra.mxu0 %v829_v15 }
 0x68b   :  { %4876 = vmatmul.mubr.msk.bf16.vlgmr.msra.gmra.mxu0 %vm306_vm2, %v817_v16 }
 0x702   :  { %v5992_v18 = vpop.f32.mrf.mxu0 }
 0x704   :  { %v5994_v19 = vpop.f32.mrf.mxu0 }
 0x706   :  { %v4854_v21 = vpop.f32.mrf.mxu0 }
 0x708   :  { %v5996_v22 = vpop.f32.mrf.mxu0 }
 0x709   :  { %v5288_v23 = vpack.i.bf16 %v5996_v22, %v5994_v19 }
 0x73b   :  { %v6000_v24 = vpop.f32.mrf.mxu0 }
 0x73d   :  { %v6002_v27 = vpop.f32.mrf.mxu0 }
 0x73f   :  { %v4870_v28 = vpop.f32.mrf.mxu0 }
 0x741   :  { %v6004_v30 = vpop.f32.mrf.mxu0 }
 0x742   :  { %v5293_v31 = vpack.i.bf16 %v6004_v30, %v6002_v27 }
 0x74b   :  { %v4877_v32 = vpop.f32.mrf.mxu0 }
 0x74c   :  { %v884_v36 = vmul.f32 0.35355338, %v4877_v32 }
 0x74d   :  { %v868_v33 = vpop.f32.mrf.mxu0 }
 0x74e   :  { %v882_v37 = vmul.f32 0.35355338, %v868_v33  ;;  %v887_v48 = vadd.f32 %v884_v36, %v5887_v17 }
 0x74f   :  { %v4878_v38 = vpop.f32.mrf.mxu0 }
 0x750   :  { %v885_v39 = vadd.f32 %v882_v37, %v5889_v20  ;;  %v894_v50 = vsel %vm373_vm5, %v887_v48, -inf }
 0x751   :  { %v871_v43 = vpop.f32.mrf.mxu0 }
 0x752   :  { %v883_v46 = vmul.f32 0.35355338, %v871_v43  ;;  %v888_v47 = vsel %vm373_vm5, %v885_v39, -inf }
 0x753   :  { %889 = vmax.xlane.f32.xlu0 %v888_v47 }
 0x754   :  { %v886_v49 = vadd.f32 %v883_v46, %v5894_v29 }
 0x756   :  { %v891_v51 = vsel %vm373_vm5, %v886_v49, -inf }
 0x757   :  { %895 = vmax.xlane.f32.xlu0 %v894_v50  ;;  %892 = vmax.xlane.f32.xlu1 %v891_v51 }
 0x768   :  { %925 = vrot.lane.b32.xlu1 %v5871_v58, %s7064_s21 }
 0x7dc   :  { %v890_v52 = vpop.xlane.xlu0 %889 }
 0x7dd   :  { %v897_v53 = vsub.f32 %v885_v39, %v890_v52 }
 0x7df   :  { %v900_v60 = vmul.f32 1.442695, %v897_v53 }
 0x7e0   :  { %v896_v55 = vpop.xlane.xlu0 %895  ;;  %v893_v56 = vpop.xlane.xlu1 %892 }
 0x7e1   :  { %v899_v57 = vsub.f32 %v887_v48, %v896_v55  ;;  %v898_v59 = vsub.f32 %v886_v49, %v893_v56 }
 0x7e3   :  { %v904_v61 = vmul.f32 1.442695, %v899_v57  ;;  %v902_v62 = vmul.f32 1.442695, %v898_v59 }
 0x7e4   :  { %v926_v63 = vpop.permute.xlu1 %925 }
 0x7e5   :  { %5452 = vpow2.f32 %v904_v61  ;;  %5234 = vmatprep.subr.msk.bf16.mxu1 %vm420_vm7, %v926_v63  ;;  %v935_v1 = vsel %vm420_vm7, %v926_v63, 0 }
 0x7e6   :  { %5454 = vpow2.f32 %v902_v62  ;;  %4880 = vmatpush3.bf16.msra.mxu1 %v935_v1 }
 0x7e7   :  { %5456 = vpow2.f32 %v900_v60 }
 0x7f2   :  { %v5453_v3 = vpop.eup %5452 }
 0x7f3   :  { %v5455_v58 = vpop.eup %5454  ;;  %v912_v5 = vsel %vm373_vm5, %v5453_v3, 0.0 }
 0x7f4   :  { %v5457_v6 = vpop.eup %5456  ;;  %913 = vadd.xlane.f32.xlu0 %v912_v5  ;;  %v909_v7 = vsel %vm373_vm5, %v5455_v58, 0.0 }
 0x7f5   :  { %910 = vadd.xlane.f32.xlu1 %v909_v7  ;;  %v906_v8 = vsel %vm373_vm5, %v5457_v6, 0.0 }
 0x7f8   :  { %907 = vadd.xlane.f32.xlu0 %v906_v8 }
 0x806   :  { %1037 = vrot.lane.b32.xlu1 %v6023_v9, %s5650_s1 }
 0x80a   :  { %1035 = vrot.lane.b32.xlu1 %v5877_v2, %s5650_s1 }
 0x80e   :  { %923 = vrot.lane.b32.xlu0 %v5867_v54, %s7064_s21 }
 0x87d   :  { %v914_v10 = vpop.xlane.xlu0 %913 }
 0x87e   :  { %v911_v11 = vpop.xlane.xlu1 %910  ;;  %5458 = vrcp.f32 %v914_v10 }
 0x87f   :  { %5460 = vrcp.f32 %v911_v11 }
 0x881   :  { %v908_v12 = vpop.xlane.xlu0 %907 }
 0x882   :  { %5462 = vrcp.f32 %v908_v12  ;;  %v1038_v14 = vpop.permute.xlu1 %1037 }
 0x883   :  { %v1049_v36 = vsel %vm306_vm2, %v1038_v14, 0 }
 0x885   :  { %v924_v13 = vpop.permute.xlu0 %923 }
 0x886   :  { %4881 = vmatprep.subr.bf16.mxu1 %v924_v13  ;;  %v1036_v37 = vpop.permute.xlu1 %1035 }
 0x887   :  { %4882 = vmatpush3.bf16.msra.mxu1 %v924_v13  ;;  %v1046_v38 = vsel %vm306_vm2, %v1036_v37, 0 }
 0x888   :  { %5235 = vmatprep.subr.msk.bf16.mxu1 %vm306_vm2, %v1038_v14 }
 0x88b   :  { %v5459_v4 = vpop.eup %5458 }
 0x88c   :  { %v5461_v15 = vpop.eup %5460  ;;  %v920_v21 = vmul.f32 %v5459_v4, %v5453_v3 }
 0x88d   :  { %v918_v32 = vmul.f32 %v5461_v15, %v5455_v58 }
 0x88e   :  { %v922_v54 = vpack.c.bf16 %v920_v21, %v920_v21 }
 0x88f   :  { %v5463_v16 = vpop.eup %5462 }
 0x890   :  { %v916_v28 = vmul.f32 %v5463_v16, %v5457_v6 }
 0x892   :  { %v921_v33 = vpack.c.bf16 %v918_v32, %v916_v28 }
 0x894   :  { %4883 = vmatprep.mubr.msk.bf16.mxu1 %vm373_vm5, %v921_v33 }
 0x895   :  { %4884 = vmatmul.mubr.msk.bf16.vlgmr.msra.gmra.mxu1 %vm373_vm5, %v922_v54 }
 0x896   :  { %4888 = vmatpush3.bf16.xpose.msra.mxu1 %v1049_v36  ;;  %4891 = vmatprep.mubr.msk.bf16.mxu1 %vm306_vm2, %v5877_v2 }
 0x897   :  { %5236 = vmatprep.subr.msk.bf16.mxu1 %vm306_vm2, %v1036_v37 }
 0x89e   :  { %4890 = vmatpush3.bf16.xpose.msra.mxu1 %v1046_v38 }
 0x8a5   :  { %4892 = vmatmul.mubr.msk.bf16.vlgmr.msra.gmra.mxu1 %vm306_vm2, %v6023_v9 }
 0x955   :  { %v6041_v39 = vpop.f32.mrf.mxu1 }
 0x957   :  { %v6043_v43 = vpop.f32.mrf.mxu1 }
 0x959   :  { %v4886_v46 = vpop.f32.mrf.mxu1 }
 0x95b   :  { %v6045_v47 = vpop.f32.mrf.mxu1 }
 0x95c   :  { %v5298_v48 = vpack.i.bf16 %v6045_v47, %v6043_v43 }
 0x965   :  { %v4893_v49 = vpop.f32.mrf.mxu1 }
 0x966   :  { %v1101_v51 = vmul.f32 0.35355338, %v4893_v49 }
 0x967   :  { %v1085_v50 = vpop.f32.mrf.mxu1 }
 0x968   :  { %v1099_v52 = vmul.f32 0.35355338, %v1085_v50  ;;  %v1104_v60 = vadd.f32 %v1101_v51, %v5887_v17 }
 0x969   :  { %v4894_v53 = vpop.f32.mrf.mxu1 }
 0x96a   :  { %v1102_v55 = vadd.f32 %v1099_v52, %v5889_v20  ;;  %v1111_v62 = vsel %vm373_vm5, %v1104_v60, -inf }
 0x96b   :  { %v1088_v56 = vpop.f32.mrf.mxu1 }
 0x96c   :  { %v1100_v57 = vmul.f32 0.35355338, %v1088_v56  ;;  %v1105_v59 = vsel %vm373_vm5, %v1102_v55, -inf }
 0x96d   :  { %1106 = vmax.xlane.f32.xlu0 %v1105_v59 }
 0x96e   :  { %v1103_v61 = vadd.f32 %v1100_v57, %v5894_v29 }
 0x970   :  { %v1108_v63 = vsel %vm373_vm5, %v1103_v61, -inf }
 0x971   :  { %1112 = vmax.xlane.f32.xlu0 %v1111_v62  ;;  %1109 = vmax.xlane.f32.xlu1 %v1108_v63 }
 0x982   :  { %1142 = vrot.lane.b32.xlu1 %v6023_v9, %s5652_s28 }
 0x9f6   :  { %v1107_v1 = vpop.xlane.xlu0 %1106 }
 0x9f7   :  { %v1114_v3 = vsub.f32 %v1102_v55, %v1107_v1 }
 0x9f9   :  { %v1117_v8 = vmul.f32 1.442695, %v1114_v3 }
 0x9fa   :  { %v1113_v58 = vpop.xlane.xlu0 %1112  ;;  %v1110_v5 = vpop.xlane.xlu1 %1109 }
 0x9fb   :  { %v1116_v6 = vsub.f32 %v1104_v60, %v1113_v58  ;;  %v1115_v7 = vsub.f32 %v1103_v61, %v1110_v5 }
 0x9fd   :  { %v1121_v10 = vmul.f32 1.442695, %v1116_v6  ;;  %v1119_v11 = vmul.f32 1.442695, %v1115_v7 }
 0x9fe   :  { %v1143_v12 = vpop.permute.xlu1 %1142 }
 0x9ff   :  { %5464 = vpow2.f32 %v1121_v10  ;;  %5237 = vmatprep.subr.msk.bf16.mxu0 %vm420_vm7, %v1143_v12  ;;  %v1152_v13 = vsel %vm420_vm7, %v1143_v12, 0 }
 0xa00   :  { %5466 = vpow2.f32 %v1119_v11  ;;  %4896 = vmatpush3.bf16.msra.mxu0 %v1152_v13 }
 0xa01   :  { %5468 = vpow2.f32 %v1117_v8 }
 0xa0c   :  { %v5465_v14 = vpop.eup %5464 }
 0xa0d   :  { %v5467_v4 = vpop.eup %5466  ;;  %v1129_v15 = vsel %vm373_vm5, %v5465_v14, 0.0 }
 0xa0e   :  { %v5469_v16 = vpop.eup %5468  ;;  %1130 = vadd.xlane.f32.xlu0 %v1129_v15  ;;  %v1126_v21 = vsel %vm373_vm5, %v5467_v4, 0.0 }
 0xa0f   :  { %1127 = vadd.xlane.f32.xlu1 %v1126_v21  ;;  %v1123_v28 = vsel %vm373_vm5, %v5469_v16, 0.0 }
 0xa12   :  { %1124 = vadd.xlane.f32.xlu0 %v1123_v28 }
 0xa20   :  { %1208 = vrot.lane.b32.xlu1 %v6023_v9, %s5654_s30 }
 0xa24   :  { %1206 = vrot.lane.b32.xlu1 %v5877_v2, %s5654_s30 }
 0xa28   :  { %1204 = vrot.lane.b32.xlu1 %v6023_v9, %s5656_s18  ;;  %1140 = vrot.lane.b32.xlu0 %v5877_v2, %s5652_s28 }
 0xa2c   :  { %1202 = vrot.lane.b32.xlu0 %v5877_v2, %s5656_s18 }
 0xa97   :  { %v1131_v32 = vpop.xlane.xlu0 %1130 }
 0xa98   :  { %v1128_v33 = vpop.xlane.xlu1 %1127  ;;  %5470 = vrcp.f32 %v1131_v32 }
 0xa99   :  { %5472 = vrcp.f32 %v1128_v33 }
 0xa9b   :  { %v1125_v54 = vpop.xlane.xlu0 %1124 }
 0xa9c   :  { %5474 = vrcp.f32 %v1125_v54  ;;  %v1209_v37 = vpop.permute.xlu1 %1208 }
 0xa9d   :  { %v1220_v57 = vsel %vm306_vm2, %v1209_v37, 0 }
 0xa9f   :  { %v1141_v36 = vpop.permute.xlu0 %1140 }
 0xaa0   :  { %4897 = vmatprep.subr.bf16.mxu0 %v1141_v36  ;;  %v1207_v59 = vpop.permute.xlu1 %1206 }
 0xaa1   :  { %4898 = vmatpush3.bf16.msra.mxu0 %v1141_v36  ;;  %v1217_v60 = vsel %vm306_vm2, %v1207_v59, 0 }
 0xaa2   :  { %5238 = vmatprep.subr.msk.bf16.mxu0 %vm306_vm2, %v1209_v37 }
 0xaa3   :  { %v1203_v56 = vpop.permute.xlu0 %1202 }
 0xaa4   :  { %v1205_v61 = vpop.permute.xlu1 %1204 }
 0xaa5   :  { %v5471_v38 = vpop.eup %5470 }
 0xaa6   :  { %v5473_v46 = vpop.eup %5472  ;;  %v1137_v50 = vmul.f32 %v5471_v38, %v5465_v14 }
 0xaa7   :  { %v1135_v52 = vmul.f32 %v5473_v46, %v5467_v4 }
 0xaa8   :  { %v1139_v55 = vpack.c.bf16 %v1137_v50, %v1137_v50 }
 0xaa9   :  { %v5475_v49 = vpop.eup %5474 }
 0xaaa   :  { %v1133_v51 = vmul.f32 %v5475_v49, %v5469_v16 }
 0xaac   :  { %v1138_v53 = vpack.c.bf16 %v1135_v52, %v1133_v51 }
 0xaae   :  { %4899 = vmatprep.mubr.msk.bf16.mxu0 %vm373_vm5, %v1138_v53 }
 0xaaf   :  { %4900 = vmatmul.mubr.msk.bf16.vlgmr.msra.gmra.mxu0 %vm373_vm5, %v1139_v55 }
 0xab0   :  { %4904 = vmatpush3.bf16.xpose.msra.mxu0 %v1220_v57  ;;  %4907 = vmatprep.mubr.msk.bf16.mxu0 %vm306_vm2, %v1203_v56 }
 0xab1   :  { %5239 = vmatprep.subr.msk.bf16.mxu0 %vm306_vm2, %v1207_v59 }
 0xab8   :  { %4906 = vmatpush3.bf16.xpose.msra.mxu0 %v1217_v60 }
 0xabf   :  { %4908 = vmatmul.mubr.msk.bf16.vlgmr.msra.gmra.mxu0 %vm306_vm2, %v1205_v61 }
 0xb6f   :  { %v6080_v62 = vpop.f32.mrf.mxu0 }
 0xb71   :  { %v6082_v63 = vpop.f32.mrf.mxu0 }
 0xb73   :  { %v4902_v1 = vpop.f32.mrf.mxu0 }
 0xb75   :  { %v6084_v3 = vpop.f32.mrf.mxu0 }
 0xb7f   :  { %v4909_v58 = vpop.f32.mrf.mxu0 }
 0xb80   :  { %v1272_v6 = vmul.f32 0.35355338, %v4909_v58 }
 0xb81   :  { %v1256_v5 = vpop.f32.mrf.mxu0 }
 0xb82   :  { %v1270_v7 = vmul.f32 0.35355338, %v1256_v5  ;;  %v1275_v14 = vadd.f32 %v1272_v6, %v5887_v17 }
 0xb83   :  { %v4910_v8 = vpop.f32.mrf.mxu0 }
 0xb84   :  { %v1273_v10 = vadd.f32 %v1270_v7, %v5889_v20  ;;  %v1282_v15 = vsel %vm373_vm5, %v1275_v14, -inf }
 0xb85   :  { %v1259_v11 = vpop.f32.mrf.mxu0 }
 0xb86   :  { %v1271_v12 = vmul.f32 0.35355338, %v1259_v11  ;;  %v1276_v13 = vsel %vm373_vm5, %v1273_v10, -inf }
 0xb87   :  { %1277 = vmax.xlane.f32.xlu0 %v1276_v13 }
 0xb88   :  { %v1274_v4 = vadd.f32 %v1271_v12, %v5894_v29 }
 0xb8a   :  { %v1279_v16 = vsel %vm373_vm5, %v1274_v4, -inf }
 0xb8b   :  { %1283 = vmax.xlane.f32.xlu0 %v1282_v15  ;;  %1280 = vmax.xlane.f32.xlu1 %v1279_v16 }
 0xb9c   :  { %1313 = vrot.lane.b32.xlu1 %v6023_v9, %s5657_s19 }
 0xc10   :  { %v1278_v21 = vpop.xlane.xlu0 %1277 }
 0xc11   :  { %v1285_v28 = vsub.f32 %v1273_v10, %v1278_v21 }
 0xc13   :  { %v1288_v37 = vmul.f32 1.442695, %v1285_v28 }
 0xc14   :  { %v1284_v32 = vpop.xlane.xlu0 %1283  ;;  %v1281_v33 = vpop.xlane.xlu1 %1280 }
 0xc15   :  { %v1287_v54 = vsub.f32 %v1275_v14, %v1284_v32  ;;  %v1286_v36 = vsub.f32 %v1274_v4, %v1281_v33 }
 0xc17   :  { %v1292_v38 = vmul.f32 1.442695, %v1287_v54  ;;  %v1290_v46 = vmul.f32 1.442695, %v1286_v36 }
 0xc18   :  { %v1314_v49 = vpop.permute.xlu1 %1313 }
 0xc19   :  { %5476 = vpow2.f32 %v1292_v38  ;;  %5240 = vmatprep.subr.msk.bf16.mxu1 %vm420_vm7, %v1314_v49  ;;  %v1323_v50 = vsel %vm420_vm7, %v1314_v49, 0 }
 0xc1a   :  { %5478 = vpow2.f32 %v1290_v46  ;;  %4912 = vmatpush3.bf16.msra.mxu1 %v1323_v50 }
 0xc1b   :  { %5480 = vpow2.f32 %v1288_v37 }
 0xc26   :  { %v5477_v51 = vpop.eup %5476 }
 0xc27   :  { %v5479_v52 = vpop.eup %5478  ;;  %v1300_v53 = vsel %vm373_vm5, %v5477_v51, 0.0 }
 0xc28   :  { %v5481_v55 = vpop.eup %5480  ;;  %1301 = vadd.xlane.f32.xlu0 %v1300_v53  ;;  %v1297_v56 = vsel %vm373_vm5, %v5479_v52, 0.0 }
 0xc29   :  { %1298 = vadd.xlane.f32.xlu1 %v1297_v56  ;;  %v1294_v57 = vsel %vm373_vm5, %v5481_v55, 0.0 }
 0xc2c   :  { %1295 = vadd.xlane.f32.xlu0 %v1294_v57 }
 0xc3a   :  { %1379 = vrot.lane.b32.xlu1 %v6023_v9, %s5655_s29 }
 0xc3e   :  { %1377 = vrot.lane.b32.xlu1 %v5877_v2, %s5655_s29 }
 0xc42   :  { %1375 = vrot.lane.b32.xlu1 %v6023_v9, %s5653_s2  ;;  %1311 = vrot.lane.b32.xlu0 %v5877_v2, %s5657_s19 }
 0xc46   :  { %1373 = vrot.lane.b32.xlu0 %v5877_v2, %s5653_s2 }
 0xcb1   :  { %v1302_v59 = vpop.xlane.xlu0 %1301 }
 0xcb2   :  { %v1299_v60 = vpop.xlane.xlu1 %1298  ;;  %5482 = vrcp.f32 %v1302_v59 }
 0xcb3   :  { %5484 = vrcp.f32 %v1299_v60 }
 0xcb5   :  { %v1296_v61 = vpop.xlane.xlu0 %1295 }
 0xcb6   :  { %5486 = vrcp.f32 %v1296_v61  ;;  %v1380_v58 = vpop.permute.xlu1 %1379 }
 0xcb7   :  { %v1391_v4 = vsel %vm306_vm2, %v1380_v58, 0 }
 0xcb9   :  { %v1312_v1 = vpop.permute.xlu0 %1311 }
 0xcba   :  { %4913 = vmatprep.subr.bf16.mxu1 %v1312_v1  ;;  %v1378_v15 = vpop.permute.xlu1 %1377 }
 0xcbb   :  { %4914 = vmatpush3.bf16.msra.mxu1 %v1312_v1  ;;  %v1388_v16 = vsel %vm306_vm2, %v1378_v15, 0 }
 0xcbc   :  { %5241 = vmatprep.subr.msk.bf16.mxu1 %vm306_vm2, %v1380_v58 }
 0xcbd   :  { %v1374_v14 = vpop.permute.xlu0 %1373 }
 0xcbe   :  { %v1376_v21 = vpop.permute.xlu1 %1375 }
 0xcbf   :  { %v5483_v5 = vpop.eup %5482 }
 0xcc0   :  { %v5485_v6 = vpop.eup %5484  ;;  %v1308_v8 = vmul.f32 %v5483_v5, %v5477_v51 }
 0xcc1   :  { %v1306_v11 = vmul.f32 %v5485_v6, %v5479_v52 }
 0xcc2   :  { %v1310_v13 = vpack.c.bf16 %v1308_v8, %v1308_v8 }
 0xcc3   :  { %v5487_v7 = vpop.eup %5486 }
 0xcc4   :  { %v1304_v10 = vmul.f32 %v5487_v7, %v5481_v55 }
 0xcc6   :  { %v1309_v12 = vpack.c.bf16 %v1306_v11, %v1304_v10 }
 0xcc8   :  { %4915 = vmatprep.mubr.msk.bf16.mxu1 %vm373_vm5, %v1309_v12 }
 0xcc9   :  { %4916 = vmatmul.mubr.msk.bf16.vlgmr.msra.gmra.mxu1 %vm373_vm5, %v1310_v13 }
 0xcca   :  { %4920 = vmatpush3.bf16.xpose.msra.mxu1 %v1391_v4  ;;  %4923 = vmatprep.mubr.msk.bf16.mxu1 %vm306_vm2, %v1374_v14 }
 0xccb   :  { %5242 = vmatprep.subr.msk.bf16.mxu1 %vm306_vm2, %v1378_v15 }
 0xcd2   :  { %4922 = vmatpush3.bf16.xpose.msra.mxu1 %v1388_v16 }
 0xcd9   :  { %4924 = vmatmul.mubr.msk.bf16.vlgmr.msra.gmra.mxu1 %vm306_vm2, %v1376_v21 }
 0xd89   :  { %v6117_v28 = vpop.f32.mrf.mxu1 }
 0xd8b   :  { %v6119_v32 = vpop.f32.mrf.mxu1 }
 0xd8d   :  { %v4918_v33 = vpop.f32.mrf.mxu1 }
 0xd8f   :  { %v6121_v54 = vpop.f32.mrf.mxu1 }
 0xd90   :  { %v5318_v36 = vpack.i.bf16 %v6117_v28, %v6121_v54 }
 0xd99   :  { %v4925_v37 = vpop.f32.mrf.mxu1 }
 0xd9a   :  { %v1443_v46 = vmul.f32 0.35355338, %v4925_v37 }
 0xd9b   :  { %v1427_v38 = vpop.f32.mrf.mxu1 }
 0xd9c   :  { %v1441_v49 = vmul.f32 0.35355338, %v1427_v38  ;;  %v1446_v56 = vadd.f32 %v1443_v46, %v5887_v17 }
 0xd9d   :  { %v4926_v50 = vpop.f32.mrf.mxu1 }
 0xd9e   :  { %v1444_v51 = vadd.f32 %v1441_v49, %v5889_v20  ;;  %v1453_v59 = vsel %vm373_vm5, %v1446_v56, -inf }
 0xd9f   :  { %v1430_v52 = vpop.f32.mrf.mxu1 }
 0xda0   :  { %v1442_v53 = vmul.f32 0.35355338, %v1430_v52  ;;  %v1447_v55 = vsel %vm373_vm5, %v1444_v51, -inf }
 0xda1   :  { %1448 = vmax.xlane.f32.xlu0 %v1447_v55 }
 0xda2   :  { %v1445_v57 = vadd.f32 %v1442_v53, %v5894_v29 }
 0xda4   :  { %v1450_v60 = vsel %vm373_vm5, %v1445_v57, -inf }
 0xda5   :  { %1454 = vmax.xlane.f32.xlu0 %v1453_v59  ;;  %1451 = vmax.xlane.f32.xlu1 %v1450_v60 }
 0xdb6   :  { %1484 = vrot.lane.b32.xlu1 %v6023_v9, %s5658_s26 }
 0xe2a   :  { %v1449_v61 = vpop.xlane.xlu0 %1448 }
 0xe2b   :  { %v1456_v1 = vsub.f32 %v1444_v51, %v1449_v61 }
 0xe2d   :  { %v1459_v8 = vmul.f32 1.442695, %v1456_v1 }
 0xe2e   :  { %v1455_v58 = vpop.xlane.xlu0 %1454  ;;  %v1452_v5 = vpop.xlane.xlu1 %1451 }
 0xe2f   :  { %v1458_v6 = vsub.f32 %v1446_v56, %v1455_v58  ;;  %v1457_v7 = vsub.f32 %v1445_v57, %v1452_v5 }
 0xe31   :  { %v1463_v10 = vmul.f32 1.442695, %v1458_v6  ;;  %v1461_v11 = vmul.f32 1.442695, %v1457_v7 }
 0xe32   :  { %v1485_v12 = vpop.permute.xlu1 %1484 }
 0xe33   :  { %5488 = vpow2.f32 %v1463_v10  ;;  %5243 = vmatprep.subr.msk.bf16.mxu0 %vm420_vm7, %v1485_v12  ;;  %v1494_v13 = vsel %vm420_vm7, %v1485_v12, 0 }
 0xe34   :  { %5490 = vpow2.f32 %v1461_v11  ;;  %4928 = vmatpush3.bf16.msra.mxu0 %v1494_v13 }
 0xe35   :  { %5492 = vpow2.f32 %v1459_v8 }
 0xe40   :  { %v5489_v14 = vpop.eup %5488 }
 0xe41   :  { %v5491_v4 = vpop.eup %5490  ;;  %v1471_v15 = vsel %vm373_vm5, %v5489_v14, 0.0 }
 0xe42   :  { %v5493_v16 = vpop.eup %5492  ;;  %1472 = vadd.xlane.f32.xlu0 %v1471_v15  ;;  %v1468_v21 = vsel %vm373_vm5, %v5491_v4, 0.0 }
 0xe43   :  { %1469 = vadd.xlane.f32.xlu1 %v1468_v21  ;;  %v1465_v33 = vsel %vm373_vm5, %v5493_v16, 0.0 }
 0xe46   :  { %1466 = vadd.xlane.f32.xlu0 %v1465_v33 }
 0xe54   :  { %1550 = vrot.lane.b32.xlu1 %v6023_v9, %s7068_s0 }
 0xe58   :  { %1548 = vrot.lane.b32.xlu1 %v5877_v2, %s7068_s0 }
 0xe5c   :  { %1546 = vrot.lane.b32.xlu1 %v6023_v9, %s7066_s20  ;;  %1482 = vrot.lane.b32.xlu0 %v5877_v2, %s5658_s26 }
 0xe60   :  { %1544 = vrot.lane.b32.xlu0 %v5877_v2, %s7066_s20  ;;  %s7075_s20 = smov 104  }
 0xecb   :  { %v1473_v37 = vpop.xlane.xlu0 %1472 }
 0xecc   :  { %v1470_v38 = vpop.xlane.xlu1 %1469  ;;  %5494 = vrcp.f32 %v1473_v37 }
 0xecd   :  { %5496 = vrcp.f32 %v1470_v38 }
 0xecf   :  { %v1467_v46 = vpop.xlane.xlu0 %1466 }
 0xed0   :  { %5498 = vrcp.f32 %v1467_v46  ;;  %v1551_v50 = vpop.permute.xlu1 %1550 }
 0xed1   :  { %v1562_v1 = vsel %vm306_vm2, %v1551_v50, 0 }
 0xed3   :  { %v1483_v49 = vpop.permute.xlu0 %1482 }
 0xed4   :  { %4929 = vmatprep.subr.bf16.mxu0 %v1483_v49  ;;  %v1549_v58 = vpop.permute.xlu1 %1548 }
 0xed5   :  { %4930 = vmatpush3.bf16.msra.mxu0 %v1483_v49  ;;  %v1559_v5 = vsel %vm306_vm2, %v1549_v58, 0 }
 0xed6   :  { %5244 = vmatprep.subr.msk.bf16.mxu0 %vm306_vm2, %v1551_v50 }
 0xed7   :  { %v1545_v61 = vpop.permute.xlu0 %1544 }
 0xed8   :  { %v1547_v6 = vpop.permute.xlu1 %1546 }
 0xed9   :  { %v5495_v51 = vpop.eup %5494 }
 0xeda   :  { %v5497_v52 = vpop.eup %5496  ;;  %v1479_v55 = vmul.f32 %v5495_v51, %v5489_v14 }
 0xedb   :  { %v1477_v57 = vmul.f32 %v5497_v52, %v5491_v4 }
 0xedc   :  { %v1481_v60 = vpack.c.bf16 %v1479_v55, %v1479_v55 }
 0xedd   :  { %v5499_v53 = vpop.eup %5498 }
 0xede   :  { %v1475_v56 = vmul.f32 %v5499_v53, %v5493_v16 }
 0xee0   :  { %v1480_v59 = vpack.c.bf16 %v1477_v57, %v1475_v56 }
 0xee2   :  { %4931 = vmatprep.mubr.msk.bf16.mxu0 %vm373_vm5, %v1480_v59 }
 0xee3   :  { %4932 = vmatmul.mubr.msk.bf16.vlgmr.msra.gmra.mxu0 %vm373_vm5, %v1481_v60 }
 0xee4   :  { %4936 = vmatpush3.bf16.xpose.msra.mxu0 %v1562_v1  ;;  %4939 = vmatprep.mubr.msk.bf16.mxu0 %vm306_vm2, %v1545_v61 }
 0xee5   :  { %5245 = vmatprep.subr.msk.bf16.mxu0 %vm306_vm2, %v1549_v58 }
 0xeec   :  { %4938 = vmatpush3.bf16.xpose.msra.mxu0 %v1559_v5 }
 0xeed   :  { %4967 = vmatprep.subr.bf16.mxu0 %v5648_v0 }
 0xef3   :  { %4940 = vmatmul.mubr.msk.bf16.vlgmr.msra.gmra.mxu0 %vm306_vm2, %v1547_v6 }
 0xef4   :  { %4971 = vmatprep.mubr.msk.bf16.mxu0 %vm5649_vm0, %v5648_v0 }
 0xfa3   :  { %v6159_v7 = vpop.f32.mrf.mxu0 }
 0xfa5   :  { %v1530_v8 = vpop.f32.mrf.mxu0 }
 0xfa6   :  { %v5308_v19 = vpack.i.bf16 %v1530_v8, %v6000_v24 }
 0xfa7   :  { %v4934_v10 = vpop.f32.mrf.mxu0 }
 0xfa9   :  { %v6161_v11 = vpop.f32.mrf.mxu0 }
 0xfaa   :  { %v5323_v12 = vpack.i.bf16 %v6159_v7, %v6161_v11 }
 0xfb3   :  { %v4941_v13 = vpop.f32.mrf.mxu0 }
 0xfb4   :  { %v1614_v4 = vmul.f32 0.35355338, %v4941_v13 }
 0xfb5   :  { %v1598_v14 = vpop.f32.mrf.mxu0 }
 0xfb6   :  { %v1612_v15 = vmul.f32 0.35355338, %v1598_v14  ;;  %v1617_v46 = vadd.f32 %v1614_v4, %v5887_v17  ;;  %v5303_v4 = vpack.i.bf16 %v6119_v32, %v5992_v18 }
 0xfb7   :  { %v4942_v16 = vpop.f32.mrf.mxu0 }
 0xfb8   :  { %v1615_v21 = vadd.f32 %v1612_v15, %v5889_v20  ;;  %v1624_v50 = vsel %vm373_vm5, %v1617_v46, -inf }
 0xfb9   :  { %v1601_v33 = vpop.f32.mrf.mxu0 }
 0xfba   :  { %v1613_v37 = vmul.f32 0.35355338, %v1601_v33  ;;  %v1618_v38 = vsel %vm373_vm5, %v1615_v21, -inf  ;;  %v5388_v33 = vld [vmem:[%s7043_s5 + $0x8] sm:$0xff]  }
 0xfbb   :  { %1619 = vmax.xlane.f32.xlu0 %v1618_v38 }
 0xfbc   :  { %v1616_v49 = vadd.f32 %v1613_v37, %v5894_v29 }
 0xfbe   :  { %v1621_v51 = vsel %vm373_vm5, %v1616_v49, -inf }
 0xfbf   :  { %1625 = vmax.xlane.f32.xlu0 %v1624_v50  ;;  %1622 = vmax.xlane.f32.xlu1 %v1621_v51 }
0x1044   :  { %v1620_v52 = vpop.xlane.xlu0 %1619 }
0x1045   :  { %v1627_v53 = vsub.f32 %v1615_v21, %v1620_v52 }
0x1047   :  { %v1630_v60 = vmul.f32 1.442695, %v1627_v53  ;;  %v5389_v53 = vld [vmem:[%s7043_s5] sm:$0xff]  }
0x1048   :  { %v1626_v55 = vpop.xlane.xlu0 %1625  ;;  %v1623_v56 = vpop.xlane.xlu1 %1622 }
0x1049   :  { %v1629_v57 = vsub.f32 %v1617_v46, %v1626_v55  ;;  %v1628_v59 = vsub.f32 %v1616_v49, %v1623_v56 }
0x104b   :  { %v1634_v61 = vmul.f32 1.442695, %v1629_v57  ;;  %v1632_v1 = vmul.f32 1.442695, %v1628_v59 }
0x104d   :  { %5500 = vpow2.f32 %v1634_v61 }
0x104e   :  { %5502 = vpow2.f32 %v1632_v1  ;;  %v6232_v1 = vld [vmem:[%s7044_s6] ss:$0 sm:$0xff] }
0x104f   :  { %5504 = vpow2.f32 %v1630_v60 }
0x105a   :  { %v5501_v58 = vpop.eup %5500 }
0x105b   :  { %v5503_v5 = vpop.eup %5502  ;;  %v1642_v6 = vsel %vm373_vm5, %v5501_v58, 0.0 }
0x105c   :  { %v5505_v10 = vpop.eup %5504  ;;  %1643 = vadd.xlane.f32.xlu0 %v1642_v6  ;;  %v1639_v13 = vsel %vm373_vm5, %v5503_v5, 0.0 }
0x105d   :  { %1640 = vadd.xlane.f32.xlu1 %v1639_v13  ;;  %v1636_v14 = vsel %vm373_vm5, %v5505_v10, 0.0 }
0x1060   :  { %1637 = vadd.xlane.f32.xlu0 %v1636_v14 }
0x106e   :  { %1655 = vrot.lane.b32.xlu1 %v6023_v9, %s7064_s21 }
0x1072   :  { %5289 = vrot.lane.b32.xlu1 %v5288_v23, %s7060_s22 }
0x1076   :  { %5294 = vrot.lane.b32.xlu1 %v5293_v31, %s7058_s23  ;;  %1653 = vrot.lane.b32.xlu0 %v5877_v2, %s7064_s21 }
0x107a   :  { %5304 = vrot.lane.b32.xlu1 %v5303_v4, %s7060_s22  ;;  %5299 = vrot.lane.b32.xlu0 %v5298_v48, %s7062_s24 }
0x107e   :  { %5309 = vrot.lane.b32.xlu0 %v5308_v19, %s7058_s23 }
0x1082   :  { %5319 = vrot.lane.b32.xlu0 %v5318_v36, %s7060_s22 }
0x10e5   :  { %v1644_v2 = vpop.xlane.xlu0 %1643 }
0x10e6   :  { %v1641_v22 = vpop.xlane.xlu1 %1640  ;;  %5506 = vrcp.f32 %v1644_v2 }
0x10e7   :  { %5508 = vrcp.f32 %v1641_v22 }
0x10e9   :  { %v1638_v18 = vpop.xlane.xlu0 %1637 }
0x10ea   :  { %5510 = vrcp.f32 %v1638_v18  ;;  %v1656_v23 = vpop.permute.xlu1 %1655 }
0x10eb   :  { %5246 = vmatprep.subr.msk.bf16.mxu1 %vm420_vm7, %v1656_v23  ;;  %v1665_v27 = vsel %vm420_vm7, %v1656_v23, 0 }
0x10ec   :  { %4944 = vmatpush3.bf16.msra.mxu1 %v1665_v27 }
0x10ed   :  { %v1654_v24 = vpop.permute.xlu0 %1653 }
0x10ee   :  { %4945 = vmatprep.subr.bf16.mxu1 %v1654_v24  ;;  %v5290_v30 = vpop.permute.xlu1 %5289 }
0x10ef   :  { %v5292_v28 = vunpack.i.h.bf16 %v5290_v30  ;;  %v5291_v32 = vunpack.i.l.bf16 %v5290_v30 }
0x10f0   :  { %4946 = vmatpush3.bf16.msra.mxu1 %v1654_v24 }
0x10f1   :  { %4951 = vmatprep.subr.bf16.mxu1 %v5648_v0  ;;  %v5300_v8 = vpop.permute.xlu0 %5299  ;;  %v1022_v38 = vsel %vm306_vm2, %v5948_v45, %v5292_v28  ;;  %v1021_v46 = vsel %vm306_vm2, %v5946_v41, %v5291_v32 }
0x10f2   :  { %v5295_v43 = vpop.permute.xlu1 %5294  ;;  %v5302_v49 = vunpack.i.h.bf16 %v5300_v8  ;;  %v5301_v50 = vunpack.i.l.bf16 %v5300_v8 }
0x10f3   :  { %v5507_v31 = vpop.eup %5506  ;;  %v5297_v15 = vunpack.i.h.bf16 %v5295_v43  ;;  %v5296_v16 = vunpack.i.l.bf16 %v5295_v43 }
0x10f4   :  { %v5509_v9 = vpop.eup %5508  ;;  %v1650_v48 = vmul.f32 %v5507_v31, %v5501_v58 }
0x10f5   :  { %v1648_v36 = vmul.f32 %v5509_v9, %v5503_v5  ;;  %v1025_v51 = vsel %vm1024_vm8, %v1021_v46, %v5296_v16  ;;  %v1026_v52 = vsel %vm1024_vm8, %v1022_v38, %v5297_v15  ;;  %v5310_v23 = vpop.permute.xlu0 %5309 }
0x10f6   :  { %v1652_v37 = vpack.c.bf16 %v1650_v48, %v1650_v48  ;;  %v1028_v41 = vsel %vm373_vm5, %v1025_v51, %v5301_v50  ;;  %v1029_v45 = vsel %vm373_vm5, %v1026_v52, %v5302_v49  ;;  %v5305_v18 = vpop.permute.xlu1 %5304  ;;  %v5312_v24 = vunpack.i.h.bf16 %v5310_v23 }
0x10f7   :  { %v5511_v47 = vpop.eup %5510  ;;  %v1760_v55 = vpack.c.bf16 %v1029_v45, %v1028_v41  ;;  %v5306_v27 = vunpack.i.l.bf16 %v5305_v18  ;;  %v5311_v30 = vunpack.i.l.bf16 %v5310_v23 }
0x10f8   :  { %v1646_v54 = vmul.f32 %v5511_v47, %v5505_v10 }
0x10fa   :  { %v1651_v21 = vpack.c.bf16 %v1648_v36, %v1646_v54 }
0x10fc   :  { %4947 = vmatprep.mubr.msk.bf16.mxu1 %vm373_vm5, %v1651_v21 }
0x10fd   :  { %4948 = vmatmul.mubr.msk.bf16.vlgmr.msra.gmra.mxu1 %vm373_vm5, %v1652_v37 }
0x10fe   :  { %4952 = vmatpush3.bf16.msra.mxu1 %v5388_v33  ;;  %4955 = vmatprep.mubr.msk.bf16.mxu1 %vm5649_vm0, %v5648_v0 }
0x10ff   :  { %4953 = vmatprep.subr.bf16.mxu1 %v5648_v0 }
0x1102   :  { %4954 = vmatpush3.bf16.msra.mxu1 %v5389_v53 }
0x1103   :  { %4983 = vmatprep.subr.bf16.mxu1 %v5648_v0 }
0x1105   :  { %4956 = vmatmul.mubr.msk.bf16.vlgmr.msra.gmra.mxu1 %vm231_vm1, %v1760_v55  ;;  %v5391_v55 = vld [vmem:[%s7045_s11] sm:$0xff]  }
0x1106   :  { %4959 = vmatprep.mubr.msk.bf16.mxu1 %vm5649_vm0, %v5648_v0 }
0x11bd   :  { %v6225_v56 = vpop.f32.mrf.mxu1 }
0x11bf   :  { %v1701_v57 = vpop.f32.mrf.mxu1 }
0x11c0   :  { %v5313_v59 = vpack.i.bf16 %v1701_v57, %v6041_v39 }
0x11c1   :  { %v4950_v60 = vpop.f32.mrf.mxu1 }
0x11c2   :  { %5314 = vrot.lane.b32.xlu1 %v5313_v59, %s7062_s24 }
0x11c3   :  { %v1704_v61 = vpop.f32.mrf.mxu1 }
0x11c4   :  { %v5328_v58 = vpack.i.bf16 %v6225_v56, %v1704_v61 }
0x11c5   :  { %v1829_v5 = vpop.f32.mrf.mxu1 }
0x11c6   :  { %v1830_v6 = vadd.f32 %v6232_v1, %v1829_v5 }
0x11c7   :  { %v4957_v10 = vpop.f32.mrf.mxu1 }
0x11c8   :  { %v1852_v13 = vadd.f32 %v1830_v6, %v5827_v25  ;;  %v5307_v25 = vunpack.i.h.bf16 %v5305_v18 }
0x11c9   :  { %v1832_v14 = vpop.f32.mrf.mxu1 }
0x11ca   :  { %v1860_v39 = vsel %vm231_vm1, %v1852_v13, 0.0  ;;  %v1833_v19 = vadd.f32 %v6232_v1, %v1832_v14  ;;  %v1751_v31 = vsel %vm306_vm2, %v6082_v63, %v5307_v25  ;;  %v5320_v63 = vpop.permute.xlu0 %5319 }
0x11cb   :  { %1861 = vadd.xlane.f32.xlu0 %v1860_v39  ;;  %v4958_v4 = vpop.f32.mrf.mxu1  ;;  %v1754_v7 = vsel %vm1024_vm8, %v1751_v31, %v5312_v24  ;;  %v5322_v57 = vunpack.i.h.bf16 %v5320_v63  ;;  %v5321_v59 = vunpack.i.l.bf16 %v5320_v63 }
0x11cc   :  { %v1853_v2 = vadd.f32 %v1833_v19, %v5829_v26  ;;  %v1023_v26 = vsel %vm306_vm2, %v5944_v40, %v5306_v27 }
0x11cd   :  { %v1027_v48 = vsel %vm1024_vm8, %v1023_v26, %v5311_v30  ;;  %v1753_v10 = vsel %vm306_vm2, %v6080_v62, %v5322_v57 }
0x11ce   :  { %v1863_v22 = vsel %vm231_vm1, %v1853_v2, 0.0 }
0x11e6   :  { %1864 = vadd.xlane.f32.xlu1 %v1863_v22 }
0x11f7   :  { %5324 = vrot.lane.b32.xlu1 %v5323_v12, %s7058_s23 }
0x1234   :  { %v5315_v9 = vpop.permute.xlu1 %5314 }
0x1235   :  { %v5317_v43 = vunpack.i.h.bf16 %v5315_v9  ;;  %v5316_v47 = vunpack.i.l.bf16 %v5315_v9 }
0x1237   :  { %v1030_v11 = vsel %vm373_vm5, %v1027_v48, %v5316_v47  ;;  %v1757_v12 = vsel %vm373_vm5, %v1754_v7, %v5317_v43 }
0x1238   :  { %v1761_v28 = vpack.c.bf16 %v1757_v12, %v1030_v11 }
0x123a   :  { %4960 = vmatmul.mubr.msk.bf16.gmra.mxu1 %vm231_vm1, %v1761_v28  ;;  %v6302_v28 = vld [vmem:[%s7046_s7] ss:$0 sm:$0xff] }
0x123b   :  { %4963 = vmatprep.mubr.msk.bf16.mxu1 %vm5649_vm0, %v5648_v0 }
0x1254   :  { %v1862_v32 = vpop.xlane.xlu0 %1861 }
0x1255   :  { %v1879_v54 = vmul.f32 0.03125, %v1862_v32 }
0x1257   :  { %v6258_v33 = vsub.f32 %v1852_v13, %v1879_v54  ;;  %v1752_v13 = vsel %vm306_vm2, %v6084_v3, %v5321_v59  ;;  %v6308_v54 = vld [vmem:[%s7047_s8] ss:$0 sm:$0xff] }
0x1259   :  { %v1891_v53 = vmul.f32 %v6258_v33, %v6258_v33 }
0x126f   :  { %v1865_v8 = vpop.xlane.xlu1 %1864 }
0x1270   :  { %v1880_v37 = vmul.f32 0.03125, %v1865_v8 }
0x1272   :  { %v1886_v51 = vsub.f32 %v1853_v2, %v1880_v37  ;;  %v5394_v37 = vld [vmem:[%s7048_s13 + $0x28] sm:$0xff]  }
0x1273   :  { %v5325_v56 = vpop.permute.xlu1 %5324 }
0x1274   :  { %v1892_v41 = vmul.f32 %v1886_v51, %v1886_v51  ;;  %v5326_v5 = vunpack.i.l.bf16 %v5325_v56 }
0x1276   :  { %v1900_v45 = vsel %vm231_vm1, %v1892_v41, 0.0  ;;  %v1755_v23 = vsel %vm1024_vm8, %v1752_v13, %v5326_v5 }
0x12fa   :  { %v1837_v40 = vpop.f32.mrf.mxu1 }
0x12fb   :  { %v1838_v36 = vadd.f32 %v6232_v1, %v1837_v40 }
0x12fc   :  { %v4961_v15 = vpop.f32.mrf.mxu1 }
0x12fd   :  { %v1854_v16 = vadd.f32 %v1838_v36, %v5842_v34  ;;  %v1897_v34 = vsel %vm231_vm1, %v1891_v53, 0.0 }
0x12fe   :  { %v1840_v21 = vpop.f32.mrf.mxu1 }
0x12ff   :  { %v1841_v38 = vadd.f32 %v6232_v1, %v1840_v21  ;;  %v1866_v46 = vsel %vm231_vm1, %v1854_v16, 0.0  ;;  %v5392_v21 = vld [vmem:[%s7048_s13 + $0x38] sm:$0xff]  }
0x1300   :  { %1867 = vadd.xlane.f32.xlu0 %v1866_v46  ;;  %v4962_v49 = vpop.f32.mrf.mxu1  ;;  %4984 = vmatpush3.bf16.msra.mxu1 %v5392_v21  ;;  %v5396_v46 = vld [vmem:[%s7048_s13 + $0x18] sm:$0xff]  }
0x1301   :  { %v1855_v50 = vadd.f32 %v1841_v38, %v5844_v35  ;;  %v5390_v35 = vld [vmem:[%s7045_s11 + $0x8] sm:$0xff]   ;;  %4985 = vmatprep.subr.bf16.mxu1 %v5648_v0  ;;  %v5395_v38 = vld [vmem:[%s7048_s13 + $0x20] sm:$0xff]   ;;  %v5397_v49 = vld [vmem:[%s7048_s13 + $0x10] sm:$0xff]  }
0x1302   :  { %4968 = vmatpush3.bf16.msra.mxu0 %v5390_v35 }
0x1303   :  { %v1869_v52 = vsel %vm231_vm1, %v1855_v50, 0.0  ;;  %4969 = vmatprep.subr.bf16.mxu0 %v5648_v0 }
0x1304   :  { %1870 = vadd.xlane.f32.xlu1 %v1869_v52 }
0x1306   :  { %4970 = vmatpush3.bf16.msra.mxu0 %v5391_v55 }
0x1307   :  { %5011 = vmatprep.subr.bf16.mxu0 %v5648_v0 }
0x1308   :  { %1898 = vadd.xlane.f32.xlu1 %v1897_v34 }
0x130c   :  { %1901 = vadd.xlane.f32.xlu1 %v1900_v45 }
0x1316   :  { %5329 = vrot.lane.b32.xlu0 %v5328_v58, %s7062_s24  ;;  %v5327_v58 = vunpack.i.h.bf16 %v5325_v56 }
0x1318   :  { %v1756_v18 = vsel %vm1024_vm8, %v1753_v10, %v5327_v58 }
0x1389   :  { %v1868_v60 = vpop.xlane.xlu0 %1867 }
0x138a   :  { %v1881_v61 = vmul.f32 0.03125, %v1868_v60 }
0x138c   :  { %v6277_v6 = vsub.f32 %v1854_v16, %v1881_v61 }
0x138d   :  { %v5330_v14 = vpop.permute.xlu0 %5329  ;;  %v1871_v39 = vpop.xlane.xlu1 %1870 }
0x138e   :  { %v5332_v4 = vunpack.i.h.bf16 %v5330_v14  ;;  %v5331_v19 = vunpack.i.l.bf16 %v5330_v14  ;;  %v1882_v2 = vmul.f32 0.03125, %v1871_v39  ;;  %v1893_v22 = vmul.f32 %v6277_v6, %v6277_v6 }
0x1390   :  { %v1759_v25 = vsel %vm373_vm5, %v1756_v18, %v5332_v4  ;;  %v1758_v27 = vsel %vm373_vm5, %v1755_v23, %v5331_v19  ;;  %v6289_v62 = vsub.f32 %v1855_v50, %v1882_v2  ;;  %v1903_v3 = vsel %vm231_vm1, %v1893_v22, 0.0  ;;  %v5398_v50 = vld [vmem:[%s7048_s13 + $0x8] sm:$0xff]  }
0x1391   :  { %1904 = vadd.xlane.f32.xlu1 %v1903_v3  ;;  %v1899_v24 = vpop.xlane.xlu1 %1898  ;;  %v1762_v30 = vpack.c.bf16 %v1759_v25, %v1758_v27  ;;  %v6377_v25 = vld [vmem:[%s7049_s12] ss:$0 sm:$0xff] }
0x1392   :  { %v1915_v31 = vmul.f32 0.03125, %v1899_v24  ;;  %v1894_v26 = vmul.f32 %v6289_v62, %v6289_v62 }
0x1393   :  { %4964 = vmatmul.mubr.msk.bf16.gmra.mxu1 %vm231_vm1, %v1762_v30 }
0x1394   :  { %v1921_v9 = vadd.f32 1e-05, %v1915_v31  ;;  %v1906_v43 = vsel %vm231_vm1, %v1894_v26, 0.0  ;;  %4999 = vmatprep.mubr.msk.bf16.mxu1 %vm5649_vm0, %v5648_v0 }
0x1395   :  { %1907 = vadd.xlane.f32.xlu1 %v1906_v43  ;;  %v1902_v47 = vpop.xlane.xlu1 %1901 }
0x1396   :  { %5512 = vrsqrt.f32 %v1921_v9  ;;  %v1916_v48 = vmul.f32 0.03125, %v1902_v47 }
0x1398   :  { %v1922_v7 = vadd.f32 1e-05, %v1916_v48 }
0x139a   :  { %5514 = vrsqrt.f32 %v1922_v7 }
0x13a3   :  { %v5513_v11 = vpop.eup %5512 }
0x13a4   :  { %v1933_v12 = vmul.f32 %v5513_v11, %v6258_v33  ;;  %v5393_v33 = vld [vmem:[%s7048_s13 + $0x30] sm:$0xff]  }
0x13a5   :  { %4986 = vmatpush3.bf16.msra.mxu1 %v5393_v33 }
0x13a6   :  { %v1945_v40 = vmul.f32 %v6302_v28, %v1933_v12  ;;  %4987 = vmatprep.subr.bf16.mxu1 %v5648_v0 }
0x13a7   :  { %v5515_v63 = vpop.eup %5514 }
0x13a8   :  { %v1934_v32 = vmul.f32 %v5515_v63, %v1886_v51  ;;  %v6312_v8 = vadd.f32 %v6308_v54, %v1945_v40  ;;  %v5399_v51 = vld [vmem:[%s7048_s13] sm:$0xff]  }
0x13a9   :  { %4988 = vmatpush3.bf16.msra.mxu1 %v5394_v37 }
0x13aa   :  { %v1946_v36 = vmul.f32 %v6302_v28, %v1934_v32  ;;  %4989 = vmatprep.subr.bf16.mxu1 %v5648_v0 }
0x13ac   :  { %v6315_v15 = vadd.f32 %v6308_v54, %v1946_v36 }
0x13ad   :  { %4990 = vmatpush3.bf16.msra.mxu1 %v5395_v38 }
0x13ae   :  { %v1963_v16 = vpack.c.bf16 %v6315_v15, %v6312_v8  ;;  %4991 = vmatprep.subr.bf16.mxu1 %v5648_v0 }
0x13b0   :  { %4972 = vmatmul.mubr.msk.bf16.vlgmr.msra.gmra.mxu0 %vm231_vm1, %v1963_v16 }
0x13b1   :  { %4975 = vmatprep.mubr.msk.bf16.mxu0 %vm5649_vm0, %v5648_v0  ;;  %4992 = vmatpush3.bf16.msra.mxu1 %v5396_v46 }
0x13b2   :  { %4993 = vmatprep.subr.bf16.mxu1 %v5648_v0 }
0x13b5   :  { %4994 = vmatpush3.bf16.msra.mxu1 %v5397_v49 }
0x13b6   :  { %4995 = vmatprep.subr.bf16.mxu1 %v5648_v0 }
0x13b9   :  { %4996 = vmatpush3.bf16.msra.mxu1 %v5398_v50  ;;  %v6392_v50 = vld [vmem:[%s7050_s14] ss:$0 sm:$0xff] }
0x13ba   :  { %4997 = vmatprep.subr.bf16.mxu1 %v5648_v0 }
0x13bd   :  { %4998 = vmatpush3.bf16.msra.mxu1 %v5399_v51 }
0x141a   :  { %v1905_v52 = vpop.xlane.xlu1 %1904 }
0x141b   :  { %v1917_v53 = vmul.f32 0.03125, %v1905_v52 }
0x141d   :  { %v1923_v34 = vadd.f32 1e-05, %v1917_v53 }
0x141e   :  { %v1908_v41 = vpop.xlane.xlu1 %1907 }
0x141f   :  { %5516 = vrsqrt.f32 %v1923_v34  ;;  %v1918_v45 = vmul.f32 0.03125, %v1908_v41 }
0x1421   :  { %v1924_v35 = vadd.f32 1e-05, %v1918_v45 }
0x1423   :  { %5518 = vrsqrt.f32 %v1924_v35 }
0x142c   :  { %v5517_v55 = vpop.eup %5516 }
0x142d   :  { %v1935_v56 = vmul.f32 %v5517_v55, %v6277_v6 }
0x142f   :  { %v1947_v60 = vmul.f32 %v6302_v28, %v1935_v56 }
0x1430   :  { %v5519_v57 = vpop.eup %5518 }
0x1431   :  { %v1936_v59 = vmul.f32 %v5519_v57, %v6289_v62  ;;  %v6358_v58 = vadd.f32 %v6308_v54, %v1947_v60 }
0x1433   :  { %v1948_v61 = vmul.f32 %v6302_v28, %v1936_v59 }
0x1435   :  { %v6361_v5 = vadd.f32 %v6308_v54, %v1948_v61 }
0x1437   :  { %v1964_v10 = vpack.c.bf16 %v6361_v5, %v6358_v58 }
0x1439   :  { %4976 = vmatmul.mubr.msk.bf16.gmra.mxu0 %vm231_vm1, %v1964_v10 }
0x143a   :  { %4979 = vmatprep.mubr.msk.bf16.mxu0 %vm5649_vm0, %v5648_v0 }
0x1453   :  { %v1845_v6 = vpop.f32.mrf.mxu1 }
0x1454   :  { %v1846_v13 = vadd.f32 %v6232_v1, %v1845_v6 }
0x1455   :  { %v4965_v14 = vpop.f32.mrf.mxu1 }
0x1456   :  { %v1856_v39 = vadd.f32 %v1846_v13, %v5857_v42 }
0x1457   :  { %v1848_v4 = vpop.f32.mrf.mxu1 }
0x1458   :  { %v1849_v19 = vadd.f32 %v6232_v1, %v1848_v4  ;;  %v1872_v2 = vsel %vm231_vm1, %v1856_v39, 0.0 }
0x1459   :  { %1873 = vadd.xlane.f32.xlu1 %v1872_v2  ;;  %v4966_v22 = vpop.f32.mrf.mxu1 }
0x145a   :  { %v1857_v18 = vadd.f32 %v1849_v19, %v5859_v44 }
0x145c   :  { %v1875_v23 = vsel %vm231_vm1, %v1857_v18, 0.0 }
0x145d   :  { %1876 = vadd.xlane.f32.xlu0 %v1875_v23 }
0x1470   :  { %v2032_v27 = vpop.f32.mrf.mxu0 }
0x1471   :  { %v2033_v42 = vadd.f32 %v6377_v25, %v2032_v27 }
0x1472   :  { %v4973_v62 = vpop.f32.mrf.mxu0 }
0x1473   :  { %v2055_v30 = vmax.f32 %v2033_v42, 0.0 }
0x1474   :  { %v2035_v3 = vpop.f32.mrf.mxu0 }
0x1475   :  { %v2036_v1 = vadd.f32 %v6377_v25, %v2035_v3 }
0x1476   :  { %v4974_v24 = vpop.f32.mrf.mxu0 }
0x1477   :  { %v2056_v31 = vmax.f32 %v2036_v1, 0.0 }
0x1479   :  { %v2061_v26 = vpack.c.bf16 %v2056_v31, %v2055_v30 }
0x147b   :  { %5000 = vmatmul.mubr.bf16.vlgmr.msra.gmra.mxu1 %v2061_v26 }
0x147c   :  { %5003 = vmatprep.mubr.msk.bf16.mxu1 %vm5649_vm0, %v5648_v0 }
0x14e2   :  { %v1874_v44 = vpop.xlane.xlu1 %1873 }
0x14e3   :  { %v1883_v9 = vmul.f32 0.03125, %v1874_v44 }
0x14e5   :  { %v1889_v43 = vsub.f32 %v1856_v39, %v1883_v9 }
0x14e6   :  { %v1877_v47 = vpop.xlane.xlu0 %1876 }
0x14e7   :  { %v1884_v48 = vmul.f32 0.03125, %v1877_v47  ;;  %v1895_v7 = vmul.f32 %v1889_v43, %v1889_v43 }
0x14e9   :  { %v1890_v11 = vsub.f32 %v1857_v18, %v1884_v48  ;;  %v1909_v12 = vsel %vm231_vm1, %v1895_v7, 0.0 }
0x14ea   :  { %1910 = vadd.xlane.f32.xlu1 %v1909_v12  ;;  %v5401_v12 = vld [vmem:[%s7040_s3 + $0x10] sm:$0xff]  }
0x14eb   :  { %v1896_v63 = vmul.f32 %v1890_v11, %v1890_v11 }
0x14ed   :  { %v1912_v32 = vsel %vm231_vm1, %v1896_v63, 0.0 }
0x14ee   :  { %1913 = vadd.xlane.f32.xlu1 %v1912_v32 }
0x14f9   :  { %v2040_v40 = vpop.f32.mrf.mxu0 }
0x14fa   :  { %v2041_v16 = vadd.f32 %v6377_v25, %v2040_v40 }
0x14fb   :  { %v4977_v36 = vpop.f32.mrf.mxu0 }
0x14fc   :  { %v2057_v38 = vmax.f32 %v2041_v16, 0.0 }
0x14fd   :  { %v2043_v21 = vpop.f32.mrf.mxu0 }
0x14fe   :  { %v2044_v33 = vadd.f32 %v6377_v25, %v2043_v21 }
0x14ff   :  { %v4978_v37 = vpop.f32.mrf.mxu0 }
0x1500   :  { %v2058_v46 = vmax.f32 %v2044_v33, 0.0 }
0x1502   :  { %v2062_v49 = vpack.c.bf16 %v2058_v46, %v2057_v38 }
0x1504   :  { %5004 = vmatmul.mubr.bf16.gmra.mxu1 %v2062_v49 }
0x1505   :  { %5007 = vmatprep.mubr.msk.bf16.mxu1 %vm5649_vm0, %v5648_v0 }
0x153b   :  { %v2169_v51 = vpop.f32.mrf.mxu1 }
0x153c   :  { %v2170_v52 = vadd.f32 %v6392_v50, %v2169_v51 }
0x153d   :  { %v5001_v53 = vpop.f32.mrf.mxu1 }
0x153e   :  { %v2192_v34 = vadd.f32 %v2170_v52, %v6312_v8 }
0x153f   :  { %v2172_v41 = vpop.f32.mrf.mxu1 }
0x1540   :  { %v2173_v45 = vadd.f32 %v6392_v50, %v2172_v41  ;;  %v2200_v35 = vsel %vm231_vm1, %v2192_v34, 0.0 }
0x1541   :  { %2201 = vadd.xlane.f32.xlu1 %v2200_v35  ;;  %v5002_v55 = vpop.f32.mrf.mxu1 }
0x1542   :  { %v2193_v56 = vadd.f32 %v2173_v45, %v6315_v15 }
0x1544   :  { %v2203_v57 = vsel %vm231_vm1, %v2193_v56, 0.0 }
0x1545   :  { %2204 = vadd.xlane.f32.xlu1 %v2203_v57 }
0x1573   :  { %v1911_v59 = vpop.xlane.xlu1 %1910 }
0x1574   :  { %v1919_v60 = vmul.f32 0.03125, %v1911_v59 }
0x1576   :  { %v1925_v61 = vadd.f32 1e-05, %v1919_v60 }
0x1577   :  { %v1914_v10 = vpop.xlane.xlu1 %1913 }
0x1578   :  { %5520 = vrsqrt.f32 %v1925_v61  ;;  %v1920_v6 = vmul.f32 0.03125, %v1914_v10 }
0x157a   :  { %v1926_v13 = vadd.f32 1e-05, %v1920_v6 }
0x157c   :  { %5522 = vrsqrt.f32 %v1926_v13  ;;  %v6435_v13 = vld [vmem:[%s7051_s9] ss:$0 sm:$0xff] }
0x1585   :  { %v5521_v8 = vpop.eup %5520 }
0x1586   :  { %v1937_v14 = vmul.f32 %v5521_v8, %v1889_v43 }
0x1588   :  { %v1949_v19 = vmul.f32 %v6302_v28, %v1937_v14 }
0x1589   :  { %v5523_v39 = vpop.eup %5522 }
0x158a   :  { %v1938_v4 = vmul.f32 %v5523_v39, %v1890_v11  ;;  %v6403_v15 = vadd.f32 %v6308_v54, %v1949_v19 }
0x158c   :  { %v1950_v2 = vmul.f32 %v6302_v28, %v1938_v4  ;;  %v6441_v4 = vld [vmem:[%s7052_s10] ss:$0 sm:$0xff] }
0x158e   :  { %v6406_v22 = vadd.f32 %v6308_v54, %v1950_v2 }
0x1590   :  { %v1965_v18 = vpack.c.bf16 %v6406_v22, %v6403_v15 }
0x1592   :  { %4980 = vmatmul.mubr.msk.bf16.gmra.mxu0 %vm231_vm1, %v1965_v18 }
0x1593   :  { %5015 = vmatprep.mubr.msk.bf16.mxu0 %vm5649_vm0, %v5648_v0 }
0x15c4   :  { %v2177_v23 = vpop.f32.mrf.mxu1 }
0x15c5   :  { %v2178_v27 = vadd.f32 %v6392_v50, %v2177_v23 }
0x15c6   :  { %v5005_v62 = vpop.f32.mrf.mxu1 }
0x15c7   :  { %v2194_v28 = vadd.f32 %v2178_v27, %v6358_v58 }
0x15c8   :  { %v2180_v42 = vpop.f32.mrf.mxu1 }
0x15c9   :  { %v2181_v3 = vadd.f32 %v6392_v50, %v2180_v42  ;;  %v2206_v54 = vsel %vm231_vm1, %v2194_v28, 0.0 }
0x15ca   :  { %v2202_v1 = vpop.xlane.xlu1 %2201  ;;  %2207 = vadd.xlane.f32.xlu1 %v2206_v54  ;;  %v5006_v24 = vpop.f32.mrf.mxu1 }
0x15cb   :  { %v2195_v30 = vadd.f32 %v2181_v3, %v6361_v5  ;;  %v2218_v31 = vmul.f32 0.03125, %v2202_v1  ;;  %v5400_v5 = vld [vmem:[%s7040_s3 + $0x18] sm:$0xff]  }
0x15cc   :  { %5012 = vmatpush3.bf16.msra.mxu0 %v5400_v5 }
0x15cd   :  { %v2224_v26 = vsub.f32 %v2192_v34, %v2218_v31  ;;  %v2209_v44 = vsel %vm231_vm1, %v2195_v30, 0.0  ;;  %5013 = vmatprep.subr.bf16.mxu0 %v5648_v0 }
0x15ce   :  { %v2205_v9 = vpop.xlane.xlu1 %2204  ;;  %2210 = vadd.xlane.f32.xlu1 %v2209_v44 }
0x15cf   :  { %v2219_v43 = vmul.f32 0.03125, %v2205_v9  ;;  %v2230_v47 = vmul.f32 %v2224_v26, %v2224_v26 }
0x15d0   :  { %5014 = vmatpush3.bf16.msra.mxu0 %v5401_v12 }
0x15d1   :  { %v2225_v48 = vsub.f32 %v2193_v56, %v2219_v43  ;;  %v2236_v58 = vsel %vm231_vm1, %v2230_v47, 0.0 }
0x15d2   :  { %2237 = vadd.xlane.f32.xlu1 %v2236_v58 }
0x15d3   :  { %v2231_v7 = vmul.f32 %v2225_v48, %v2225_v48 }
0x15d5   :  { %v2239_v11 = vsel %vm231_vm1, %v2231_v7, 0.0 }
0x15d6   :  { %2240 = vadd.xlane.f32.xlu0 %v2239_v11 }
0x1652   :  { %v2048_v63 = vpop.f32.mrf.mxu0 }
0x1653   :  { %v2208_v32 = vpop.xlane.xlu1 %2207  ;;  %v2049_v16 = vadd.f32 %v6377_v25, %v2048_v63 }
0x1654   :  { %v2220_v40 = vmul.f32 0.03125, %v2208_v32  ;;  %v4981_v36 = vpop.f32.mrf.mxu0 }
0x1655   :  { %v2059_v52 = vmax.f32 %v2049_v16, 0.0 }
0x1656   :  { %v2226_v21 = vsub.f32 %v2194_v28, %v2220_v40  ;;  %v2051_v33 = vpop.f32.mrf.mxu0 }
0x1657   :  { %v2052_v37 = vadd.f32 %v6377_v25, %v2051_v33  ;;  %v2211_v38 = vpop.xlane.xlu1 %2210 }
0x1658   :  { %v2221_v46 = vmul.f32 0.03125, %v2211_v38  ;;  %v4982_v49 = vpop.f32.mrf.mxu0  ;;  %v2232_v51 = vmul.f32 %v2226_v21, %v2226_v21 }
0x1659   :  { %v2060_v53 = vmax.f32 %v2052_v37, 0.0 }
0x165a   :  { %v2227_v34 = vsub.f32 %v2195_v30, %v2221_v46  ;;  %v2242_v41 = vsel %vm231_vm1, %v2232_v51, 0.0 }
0x165b   :  { %v2063_v45 = vpack.c.bf16 %v2060_v53, %v2059_v52  ;;  %2243 = vadd.xlane.f32.xlu1 %v2242_v41  ;;  %v2238_v35 = vpop.xlane.xlu1 %2237 }
0x165c   :  { %v2254_v55 = vmul.f32 0.03125, %v2238_v35  ;;  %v2233_v56 = vmul.f32 %v2227_v34, %v2227_v34 }
0x165d   :  { %5008 = vmatmul.mubr.bf16.gmra.mxu1 %v2063_v45 }
0x165e   :  { %v2260_v57 = vadd.f32 1e-05, %v2254_v55  ;;  %v2245_v59 = vsel %vm231_vm1, %v2233_v56, 0.0 }
0x165f   :  { %v2241_v60 = vpop.xlane.xlu0 %2240  ;;  %2246 = vadd.xlane.f32.xlu0 %v2245_v59 }
0x1660   :  { %5524 = vrsqrt.f32 %v2260_v57  ;;  %v2255_v25 = vmul.f32 0.03125, %v2241_v60 }
0x1662   :  { %v2261_v61 = vadd.f32 1e-05, %v2255_v25 }
0x1664   :  { %5526 = vrsqrt.f32 %v2261_v61 }
0x166d   :  { %v5525_v10 = vpop.eup %5524 }
0x166e   :  { %v2272_v6 = vmul.f32 %v5525_v10, %v2224_v26 }
0x1670   :  { %v2284_v14 = vmul.f32 %v6435_v13, %v2272_v6 }
0x1671   :  { %v5527_v8 = vpop.eup %5526 }
0x1672   :  { %v2273_v39 = vmul.f32 %v5527_v8, %v2225_v48  ;;  %v6445_v2 = vadd.f32 %v6441_v4, %v2284_v14 }
0x1674   :  { %v2285_v19 = vmul.f32 %v6435_v13, %v2273_v39 }
0x1676   :  { %v6448_v18 = vadd.f32 %v6441_v4, %v2285_v19 }
0x1678   :  { %v2302_v23 = vpack.c.bf16 %v6448_v18, %v6445_v2 }
0x167a   :  { %5016 = vmatmul.mubr.msk.bf16.vlgmr.msra.gmra.mxu0 %vm231_vm1, %v2302_v23 }
0x167b   :  { %5019 = vmatprep.mubr.msk.bf16.mxu0 %vm5649_vm0, %v5648_v0 }
0x16e4   :  { %v2244_v27 = vpop.xlane.xlu1 %2243 }
0x16e5   :  { %v2256_v62 = vmul.f32 0.03125, %v2244_v27 }
0x16e7   :  { %v2262_v28 = vadd.f32 1e-05, %v2256_v62 }
0x16e8   :  { %v2247_v42 = vpop.xlane.xlu0 %2246 }
0x16e9   :  { %5528 = vrsqrt.f32 %v2262_v28  ;;  %v2257_v3 = vmul.f32 0.03125, %v2247_v42 }
0x16eb   :  { %v2263_v54 = vadd.f32 1e-05, %v2257_v3 }
0x16ed   :  { %5530 = vrsqrt.f32 %v2263_v54 }
0x16f6   :  { %v5529_v1 = vpop.eup %5528 }
0x16f7   :  { %v2274_v24 = vmul.f32 %v5529_v1, %v2226_v21  ;;  %v6477_v21 = vld [vmem:[%s7042_s4 + $0x1] ss:$0 sm:$0xff]  ;;  %s7074_s4 = smov 72  }
0x16f9   :  { %v2286_v26 = vmul.f32 %v6435_v13, %v2274_v24 }
0x16fa   :  { %v5531_v30 = vpop.eup %5530 }
0x16fb   :  { %v2275_v31 = vmul.f32 %v5531_v30, %v2227_v34  ;;  %v6458_v9 = vadd.f32 %v6441_v4, %v2286_v26 }
0x16fd   :  { %v2287_v44 = vmul.f32 %v6435_v13, %v2275_v31 }
0x16ff   :  { %v6461_v43 = vadd.f32 %v6441_v4, %v2287_v44 }
0x1701   :  { %v2303_v47 = vpack.c.bf16 %v6461_v43, %v6458_v9 }
0x1703   :  { %5020 = vmatmul.mubr.msk.bf16.gmra.mxu0 %vm231_vm1, %v2303_v47 }
0x1704   :  { %5023 = vmatprep.mubr.msk.bf16.mxu0 %vm5649_vm0, %v5648_v0 }
0x171d   :  { %v2185_v48 = vpop.f32.mrf.mxu1 }
0x171e   :  { %v2186_v58 = vadd.f32 %v6392_v50, %v2185_v48 }
0x171f   :  { %v5009_v7 = vpop.f32.mrf.mxu1 }
0x1720   :  { %v2196_v11 = vadd.f32 %v2186_v58, %v6403_v15 }
0x1721   :  { %v2188_v5 = vpop.f32.mrf.mxu1 }
0x1722   :  { %v2189_v12 = vadd.f32 %v6392_v50, %v2188_v5  ;;  %v2212_v63 = vsel %vm231_vm1, %v2196_v11, 0.0 }
0x1723   :  { %2213 = vadd.xlane.f32.xlu1 %v2212_v63  ;;  %v5010_v32 = vpop.f32.mrf.mxu1 }
0x1724   :  { %v2197_v40 = vadd.f32 %v2189_v12, %v6406_v22 }
0x1726   :  { %v2215_v36 = vsel %vm231_vm1, %v2197_v40, 0.0 }
0x1727   :  { %2216 = vadd.xlane.f32.xlu0 %v2215_v36 }
0x173a   :  { %v2373_v16 = vpop.f32.mrf.mxu0 }
0x173b   :  { %v2374_v37 = vadd.f32 %v6477_v21, %v2373_v16 }
0x173c   :  { %v5017_v33 = vpop.f32.mrf.mxu0 }
0x173e   :  { %v2376_v15 = vpop.f32.mrf.mxu0 }
0x173f   :  { %v2377_v50 = vadd.f32 %v6477_v21, %v2376_v15 }
0x1740   :  { %v5018_v38 = vpop.f32.mrf.mxu0 }
0x1741   :  { %v6481_v46 = vpack.c.bf16 %v2377_v50, %v2374_v37 }
0x17ac   :  { %v2214_v49 = vpop.xlane.xlu1 %2213 }
0x17ad   :  { %v2222_v22 = vmul.f32 0.03125, %v2214_v49 }
0x17af   :  { %v2228_v51 = vsub.f32 %v2196_v11, %v2222_v22 }
0x17b0   :  { %v2217_v52 = vpop.xlane.xlu0 %2216 }
0x17b1   :  { %v2223_v53 = vmul.f32 0.03125, %v2217_v52  ;;  %v2234_v34 = vmul.f32 %v2228_v51, %v2228_v51 }
0x17b3   :  { %v2229_v41 = vsub.f32 %v2197_v40, %v2223_v53  ;;  %v2248_v45 = vsel %vm231_vm1, %v2234_v34, 0.0 }
0x17b4   :  { %2249 = vadd.xlane.f32.xlu1 %v2248_v45 }
0x17b5   :  { %v2235_v35 = vmul.f32 %v2229_v41, %v2229_v41 }
0x17b7   :  { %v2251_v55 = vsel %vm231_vm1, %v2235_v35, 0.0 }
0x17b8   :  { %2252 = vadd.xlane.f32.xlu0 %v2251_v55 }
0x17c3   :  { %v2381_v56 = vpop.f32.mrf.mxu0 }
0x17c4   :  { %v2382_v57 = vadd.f32 %v6477_v21, %v2381_v56 }
0x17c5   :  { %v5021_v59 = vpop.f32.mrf.mxu0 }
0x17c6   :  { %v6486_v60 = vpack.c.bf16 %v2382_v57, %v2382_v57 }
0x17c7   :  { %v2384_v25 = vpop.f32.mrf.mxu0 }
0x17c8   :  { %2402 = vrot.lane.b32.xlu1 %v6486_v60, %s5650_s1  ;;  %v2385_v5 = vadd.f32 %v6477_v21, %v2384_v25 }
0x17c9   :  { %v5022_v61 = vpop.f32.mrf.mxu0 }
0x17cc   :  { %2573 = vrot.lane.b32.xlu1 %v6486_v60, %s5654_s30 }
0x17ce   :  { %2400 = vrot.lane.b32.xlu0 %v6481_v46, %s5650_s1 }
0x17d0   :  { %2571 = vrot.lane.b32.xlu1 %v6481_v46, %s5654_s30 }
0x17d2   :  { %2569 = vrot.lane.b32.xlu0 %v6486_v60, %s5656_s18 }
0x17d4   :  { %2567 = vrot.lane.b32.xlu1 %v6481_v46, %s5656_s18 }
0x183d   :  { %v2250_v10 = vpop.xlane.xlu1 %2249 }
0x183e   :  { %v2258_v6 = vmul.f32 0.03125, %v2250_v10 }
0x1840   :  { %v2264_v8 = vadd.f32 1e-05, %v2258_v6 }
0x1841   :  { %v2403_v14 = vpop.permute.xlu1 %2402  ;;  %v2253_v39 = vpop.xlane.xlu0 %2252 }
0x1842   :  { %5532 = vrsqrt.f32 %v2264_v8  ;;  %v2259_v19 = vmul.f32 0.03125, %v2253_v39  ;;  %5247 = vmatprep.subr.msk.bf16.mxu0 %vm306_vm2, %v2403_v14  ;;  %v2414_v23 = vsel %vm306_vm2, %v2403_v14, 0 }
0x1843   :  { %5028 = vmatpush3.bf16.xpose.msra.mxu0 %v2414_v23 }
0x1844   :  { %v2265_v27 = vadd.f32 1e-05, %v2259_v19 }
0x1845   :  { %v2401_v62 = vpop.permute.xlu0 %2400  ;;  %v2574_v42 = vpop.permute.xlu1 %2573 }
0x1846   :  { %5534 = vrsqrt.f32 %v2265_v27  ;;  %5248 = vmatprep.subr.msk.bf16.mxu0 %vm306_vm2, %v2401_v62  ;;  %v2411_v28 = vsel %vm306_vm2, %v2401_v62, 0 }
0x1849   :  { %v2572_v48 = vpop.permute.xlu1 %2571  ;;  %v2570_v7 = vpop.permute.xlu0 %2569 }
0x184b   :  { %5030 = vmatpush3.bf16.xpose.msra.mxu0 %v2411_v28 }
0x184c   :  { %5250 = vmatprep.subr.msk.bf16.mxu0 %vm306_vm2, %v2574_v42 }
0x184d   :  { %v2568_v58 = vpop.permute.xlu1 %2567 }
0x184f   :  { %v5533_v3 = vpop.eup %5532 }
0x1850   :  { %v2276_v54 = vmul.f32 %v5533_v3, %v2228_v51 }
0x1852   :  { %v2288_v30 = vmul.f32 %v6435_v13, %v2276_v54 }
0x1853   :  { %v5535_v1 = vpop.eup %5534 }
0x1854   :  { %v2277_v24 = vmul.f32 %v5535_v1, %v2229_v41  ;;  %v6508_v26 = vadd.f32 %v6441_v4, %v2288_v30 }
0x1856   :  { %v2289_v31 = vmul.f32 %v6435_v13, %v2277_v24  ;;  %v2585_v13 = vsel %vm306_vm2, %v2574_v42, 0 }
0x1858   :  { %v6511_v44 = vadd.f32 %v6441_v4, %v2289_v31  ;;  %v2582_v4 = vsel %vm306_vm2, %v2572_v48, 0 }
0x185a   :  { %v2304_v47 = vpack.c.bf16 %v6511_v44, %v6508_v26 }
0x185c   :  { %5024 = vmatmul.mubr.msk.bf16.gmra.mxu0 %vm231_vm1, %v2304_v47 }
0x185d   :  { %5031 = vmatprep.mubr.msk.bf16.mxu0 %vm306_vm2, %v6481_v46 }
0x1864   :  { %5032 = vmatmul.mubr.msk.bf16.vlgmr.msra.gmra.mxu0 %vm306_vm2, %v6486_v60 }
0x1865   :  { %5044 = vmatpush3.bf16.xpose.msra.mxu0 %v2585_v13  ;;  %5047 = vmatprep.mubr.msk.bf16.mxu0 %vm306_vm2, %v2568_v58 }
0x1866   :  { %5251 = vmatprep.subr.msk.bf16.mxu0 %vm306_vm2, %v2572_v48 }
0x186d   :  { %5046 = vmatpush3.bf16.xpose.msra.mxu0 %v2582_v4 }
0x1874   :  { %5048 = vmatmul.mubr.msk.bf16.vlgmr.msra.gmra.mxu0 %vm306_vm2, %v2570_v7 }
0x191c   :  { %v2389_v11 = vpop.f32.mrf.mxu0 }
0x191d   :  { %v2390_v12 = vadd.f32 %v6477_v21, %v2389_v11 }
0x191e   :  { %v5025_v63 = vpop.f32.mrf.mxu0 }
0x191f   :  { %v6527_v32 = vpack.c.bf16 %v2390_v12, %v2385_v5 }
0x1920   :  { %v6529_v40 = vpop.f32.mrf.mxu0 }
0x1922   :  { %v5026_v36 = vpop.f32.mrf.mxu0 }
0x1924   :  { %v5033_v16 = vpop.f32.mrf.mxu0 }
0x1925   :  { %v2466_v49 = vmul.f32 0.35355338, %v5033_v16 }
0x1926   :  { %v2450_v33 = vpop.f32.mrf.mxu0 }
0x1927   :  { %v2464_v15 = vmul.f32 0.35355338, %v2450_v33  ;;  %v2469_v53 = vadd.f32 %v2466_v49, %v5887_v17 }
0x1928   :  { %v5034_v37 = vpop.f32.mrf.mxu0 }
0x1929   :  { %v2467_v50 = vadd.f32 %v2464_v15, %v5889_v20  ;;  %v2476_v41 = vsel %vm373_vm5, %v2469_v53, -inf }
0x192a   :  { %v2453_v38 = vpop.f32.mrf.mxu0 }
0x192b   :  { %v2465_v22 = vmul.f32 0.35355338, %v2453_v38  ;;  %v2470_v51 = vsel %vm373_vm5, %v2467_v50, -inf }
0x192c   :  { %2471 = vmax.xlane.f32.xlu1 %v2470_v51 }
0x192d   :  { %v2468_v52 = vadd.f32 %v2465_v22, %v5894_v29 }
0x192f   :  { %v2473_v34 = vsel %vm373_vm5, %v2468_v52, -inf }
0x1930   :  { %2474 = vmax.xlane.f32.xlu0 %v2473_v34 }
0x1934   :  { %v5049_v45 = vpop.f32.mrf.mxu0  ;;  %2477 = vmax.xlane.f32.xlu0 %v2476_v41 }
0x1935   :  { %v2637_v55 = vmul.f32 0.35355338, %v5049_v45 }
0x1936   :  { %v2621_v35 = vpop.f32.mrf.mxu0 }
0x1937   :  { %v2635_v56 = vmul.f32 0.35355338, %v2621_v35  ;;  %v2640_v61 = vadd.f32 %v2637_v55, %v5887_v17 }
0x1938   :  { %v5050_v57 = vpop.f32.mrf.mxu0 }
0x1939   :  { %v2638_v59 = vadd.f32 %v2635_v56, %v5889_v20  ;;  %v2647_v14 = vsel %vm373_vm5, %v2640_v61, -inf }
0x193a   :  { %v2624_v25 = vpop.f32.mrf.mxu0 }
0x193b   :  { %v2636_v10 = vmul.f32 0.35355338, %v2624_v25  ;;  %v2641_v6 = vsel %vm373_vm5, %v2638_v59, -inf }
0x193c   :  { %2642 = vmax.xlane.f32.xlu0 %v2641_v6 }
0x193d   :  { %v2639_v8 = vadd.f32 %v2636_v10, %v5894_v29 }
0x193f   :  { %v2644_v39 = vsel %vm373_vm5, %v2639_v8, -inf }
0x1940   :  { %2648 = vmax.xlane.f32.xlu0 %v2647_v14  ;;  %2645 = vmax.xlane.f32.xlu1 %v2644_v39 }
0x1951   :  { %2507 = vrot.lane.b32.xlu1 %v6486_v60, %s5652_s28 }
0x19b5   :  { %v2472_v19 = vpop.xlane.xlu1 %2471 }
0x19b6   :  { %v2479_v62 = vsub.f32 %v2467_v50, %v2472_v19 }
0x19b8   :  { %v2482_v54 = vmul.f32 1.442695, %v2479_v62 }
0x19b9   :  { %v2475_v23 = vpop.xlane.xlu0 %2474 }
0x19ba   :  { %v2480_v27 = vsub.f32 %v2468_v52, %v2475_v23 }
0x19bc   :  { %v2484_v28 = vmul.f32 1.442695, %v2480_v27 }
0x19bd   :  { %v2478_v42 = vpop.xlane.xlu0 %2477 }
0x19be   :  { %5536 = vpow2.f32 %v2484_v28  ;;  %v2481_v3 = vsub.f32 %v2469_v53, %v2478_v42 }
0x19c0   :  { %v2486_v1 = vmul.f32 1.442695, %v2481_v3 }
0x19c2   :  { %5538 = vpow2.f32 %v2486_v1 }
0x19c3   :  { %5540 = vpow2.f32 %v2482_v54 }
0x19c5   :  { %v2643_v24 = vpop.xlane.xlu0 %2642 }
0x19c6   :  { %v2650_v30 = vsub.f32 %v2638_v59, %v2643_v24 }
0x19c8   :  { %v2653_v7 = vmul.f32 1.442695, %v2650_v30 }
0x19c9   :  { %v2646_v31 = vpop.xlane.xlu1 %2645  ;;  %v2649_v47 = vpop.xlane.xlu0 %2648 }
0x19ca   :  { %v2652_v48 = vsub.f32 %v2640_v61, %v2649_v47  ;;  %v2651_v38 = vsub.f32 %v2639_v8, %v2646_v31 }
0x19cb   :  { %v5537_v58 = vpop.eup %5536 }
0x19cc   :  { %v2657_v13 = vmul.f32 1.442695, %v2652_v48  ;;  %v2491_v4 = vsel %vm373_vm5, %v5537_v58, 0.0  ;;  %v2655_v49 = vmul.f32 1.442695, %v2651_v38 }
0x19cd   :  { %v2508_v11 = vpop.permute.xlu1 %2507  ;;  %2492 = vadd.xlane.f32.xlu0 %v2491_v4 }
0x19ce   :  { %5249 = vmatprep.subr.msk.bf16.mxu1 %vm420_vm7, %v2508_v11  ;;  %v2517_v5 = vsel %vm420_vm7, %v2508_v11, 0  ;;  %5542 = vpow2.f32 %v2657_v13 }
0x19cf   :  { %v5539_v12 = vpop.eup %5538  ;;  %5036 = vmatpush3.bf16.msra.mxu1 %v2517_v5  ;;  %5544 = vpow2.f32 %v2653_v7 }
0x19d0   :  { %v2494_v63 = vsel %vm373_vm5, %v5539_v12, 0.0  ;;  %v5541_v36 = vpop.eup %5540  ;;  %5546 = vpow2.f32 %v2655_v49 }
0x19d1   :  { %2495 = vadd.xlane.f32.xlu1 %v2494_v63  ;;  %v2488_v16 = vsel %vm373_vm5, %v5541_v36, 0.0 }
0x19d5   :  { %2489 = vadd.xlane.f32.xlu1 %v2488_v16 }
0x19db   :  { %v5543_v33 = vpop.eup %5542 }
0x19dc   :  { %v2665_v15 = vsel %vm373_vm5, %v5543_v33, 0.0  ;;  %v5545_v37 = vpop.eup %5544 }
0x19dd   :  { %2666 = vadd.xlane.f32.xlu0 %v2665_v15  ;;  %v2659_v50 = vsel %vm373_vm5, %v5545_v37, 0.0  ;;  %v5547_v22 = vpop.eup %5546 }
0x19de   :  { %v2662_v51 = vsel %vm373_vm5, %v5547_v22, 0.0 }
0x19e1   :  { %2660 = vadd.xlane.f32.xlu0 %v2659_v50 }
0x19e6   :  { %2678 = vrot.lane.b32.xlu1 %v6486_v60, %s5657_s19 }
0x19ea   :  { %2676 = vrot.lane.b32.xlu1 %v6481_v46, %s5657_s19 }
0x19f7   :  { %2505 = vrot.lane.b32.xlu0 %v6481_v46, %s5652_s28 }
0x19fb   :  { %2742 = vrot.lane.b32.xlu0 %v6481_v46, %s5655_s29 }
0x19ff   :  { %2740 = vrot.lane.b32.xlu0 %v6486_v60, %s5653_s2 }
0x1a0e   :  { %2663 = vadd.xlane.f32.xlu1 %v2662_v51 }
0x1a1f   :  { %2744 = vrot.lane.b32.xlu1 %v6486_v60, %s5655_s29 }
0x1a23   :  { %2738 = vrot.lane.b32.xlu1 %v6481_v46, %s5653_s2 }
0x1a56   :  { %v2493_v52 = vpop.xlane.xlu0 %2492 }
0x1a57   :  { %5548 = vrcp.f32 %v2493_v52 }
0x1a5a   :  { %v2496_v53 = vpop.xlane.xlu1 %2495 }
0x1a5b   :  { %5550 = vrcp.f32 %v2496_v53 }
0x1a5e   :  { %v2490_v34 = vpop.xlane.xlu1 %2489 }
0x1a5f   :  { %5552 = vrcp.f32 %v2490_v34 }
0x1a62   :  { %v2679_v61 = vpop.permute.xlu1 %2678 }
0x1a63   :  { %v2688_v14 = vsel %vm420_vm7, %v2679_v61, 0 }
0x1a64   :  { %v5549_v45 = vpop.eup %5548 }
0x1a65   :  { %v2500_v59 = vmul.f32 %v5549_v45, %v5537_v58 }
0x1a66   :  { %v2667_v41 = vpop.xlane.xlu0 %2666  ;;  %v2677_v39 = vpop.permute.xlu1 %2676 }
0x1a67   :  { %5554 = vrcp.f32 %v2667_v41 }
0x1a68   :  { %v5551_v35 = vpop.eup %5550 }
0x1a69   :  { %v2502_v25 = vmul.f32 %v5551_v35, %v5539_v12 }
0x1a6a   :  { %v2661_v55 = vpop.xlane.xlu0 %2660 }
0x1a6b   :  { %v2504_v8 = vpack.c.bf16 %v2502_v25, %v2502_v25  ;;  %5556 = vrcp.f32 %v2661_v55 }
0x1a6c   :  { %v5553_v56 = vpop.eup %5552 }
0x1a6d   :  { %v2498_v57 = vmul.f32 %v5553_v56, %v5541_v36 }
0x1a6e   :  { %v2506_v10 = vpop.permute.xlu0 %2505 }
0x1a6f   :  { %v2503_v6 = vpack.c.bf16 %v2500_v59, %v2498_v57  ;;  %5037 = vmatprep.subr.bf16.mxu1 %v2506_v10 }
0x1a70   :  { %5038 = vmatpush3.bf16.msra.mxu1 %v2506_v10 }
0x1a71   :  { %5039 = vmatprep.mubr.msk.bf16.mxu1 %vm373_vm5, %v2503_v6  ;;  %5252 = vmatprep.subr.msk.bf16.mxu1 %vm420_vm7, %v2679_v61 }
0x1a72   :  { %v2743_v47 = vpop.permute.xlu0 %2742 }
0x1a73   :  { %5040 = vmatmul.mubr.msk.bf16.vlgmr.msra.gmra.mxu1 %vm373_vm5, %v2504_v8  ;;  %v2753_v48 = vsel %vm306_vm2, %v2743_v47, 0 }
0x1a74   :  { %5052 = vmatpush3.bf16.msra.mxu1 %v2688_v14  ;;  %v5555_v27 = vpop.eup %5554 }
0x1a75   :  { %5053 = vmatprep.subr.bf16.mxu1 %v2677_v39  ;;  %v2673_v42 = vmul.f32 %v5555_v27, %v5543_v33 }
0x1a76   :  { %v2741_v58 = vpop.permute.xlu0 %2740 }
0x1a77   :  { %v2675_v24 = vpack.c.bf16 %v2673_v42, %v2673_v42 }
0x1a78   :  { %5054 = vmatpush3.bf16.msra.mxu1 %v2677_v39  ;;  %v5557_v62 = vpop.eup %5556 }
0x1a79   :  { %v2669_v3 = vmul.f32 %v5557_v62, %v5545_v37 }
0x1a97   :  { %v2664_v19 = vpop.xlane.xlu1 %2663 }
0x1a98   :  { %5558 = vrcp.f32 %v2664_v19 }
0x1a9b   :  { %v2745_v23 = vpop.permute.xlu1 %2744 }
0x1a9c   :  { %5253 = vmatprep.subr.msk.bf16.mxu1 %vm306_vm2, %v2745_v23  ;;  %v2756_v30 = vsel %vm306_vm2, %v2745_v23, 0 }
0x1a9f   :  { %v2739_v31 = vpop.permute.xlu1 %2738 }
0x1aa5   :  { %v5559_v28 = vpop.eup %5558 }
0x1aa6   :  { %v2671_v54 = vmul.f32 %v5559_v28, %v5547_v22 }
0x1aa8   :  { %v2674_v1 = vpack.c.bf16 %v2671_v54, %v2669_v3 }
0x1aaa   :  { %5055 = vmatprep.mubr.msk.bf16.mxu1 %vm373_vm5, %v2674_v1 }
0x1aab   :  { %5056 = vmatmul.mubr.msk.bf16.vlgmr.msra.gmra.mxu1 %vm373_vm5, %v2675_v24 }
0x1aac   :  { %5060 = vmatpush3.bf16.xpose.msra.mxu1 %v2756_v30  ;;  %5063 = vmatprep.mubr.msk.bf16.mxu1 %vm306_vm2, %v2739_v31 }
0x1aad   :  { %5254 = vmatprep.subr.msk.bf16.mxu1 %vm306_vm2, %v2743_v47 }
0x1ab4   :  { %5062 = vmatpush3.bf16.xpose.msra.mxu1 %v2753_v48 }
0x1abb   :  { %5064 = vmatmul.mubr.msk.bf16.vlgmr.msra.gmra.mxu1 %vm306_vm2, %v2741_v58 }
0x1b33   :  { %v6579_v13 = vpop.f32.mrf.mxu1 }
0x1b35   :  { %v6581_v4 = vpop.f32.mrf.mxu1 }
0x1b37   :  { %v5042_v7 = vpop.f32.mrf.mxu1 }
0x1b39   :  { %v6583_v11 = vpop.f32.mrf.mxu1 }
0x1b6b   :  { %v6585_v5 = vpop.f32.mrf.mxu1 }
0x1b6d   :  { %v6587_v12 = vpop.f32.mrf.mxu1 }
0x1b6f   :  { %v5058_v63 = vpop.f32.mrf.mxu1 }
0x1b71   :  { %v6589_v36 = vpop.f32.mrf.mxu1 }
0x1b72   :  { %v5333_v16 = vpack.i.bf16 %v6589_v36, %v6587_v12 }
0x1b7b   :  { %v5065_v33 = vpop.f32.mrf.mxu1 }
0x1b7c   :  { %v2808_v22 = vmul.f32 0.35355338, %v5065_v33 }
0x1b7d   :  { %v2792_v15 = vpop.f32.mrf.mxu1 }
0x1b7e   :  { %v2806_v37 = vmul.f32 0.35355338, %v2792_v15  ;;  %v2811_v34 = vadd.f32 %v2808_v22, %v5887_v17 }
0x1b7f   :  { %v5066_v50 = vpop.f32.mrf.mxu1 }
0x1b80   :  { %v2809_v38 = vadd.f32 %v2806_v37, %v5889_v20  ;;  %v2818_v45 = vsel %vm373_vm5, %v2811_v34, -inf }
0x1b81   :  { %v2795_v49 = vpop.f32.mrf.mxu1 }
0x1b82   :  { %v2807_v51 = vmul.f32 0.35355338, %v2795_v49  ;;  %v2812_v52 = vsel %vm373_vm5, %v2809_v38, -inf }
0x1b83   :  { %2813 = vmax.xlane.f32.xlu1 %v2812_v52 }
0x1b84   :  { %v2810_v53 = vadd.f32 %v2807_v51, %v5894_v29 }
0x1b86   :  { %v2815_v41 = vsel %vm373_vm5, %v2810_v53, -inf }
0x1b87   :  { %2816 = vmax.xlane.f32.xlu0 %v2815_v41 }
0x1b8b   :  { %2819 = vmax.xlane.f32.xlu0 %v2818_v45 }
0x1b94   :  { %2849 = vrot.lane.b32.xlu1 %v6486_v60, %s5658_s26 }
0x1c0c   :  { %v2814_v35 = vpop.xlane.xlu1 %2813 }
0x1c0d   :  { %v2821_v25 = vsub.f32 %v2809_v38, %v2814_v35 }
0x1c0f   :  { %v2824_v8 = vmul.f32 1.442695, %v2821_v25 }
0x1c10   :  { %v2850_v55 = vpop.permute.xlu1 %2849  ;;  %v2817_v56 = vpop.xlane.xlu0 %2816 }
0x1c11   :  { %v2859_v57 = vsel %vm420_vm7, %v2850_v55, 0  ;;  %v2822_v59 = vsub.f32 %v2810_v53, %v2817_v56  ;;  %5255 = vmatprep.subr.msk.bf16.mxu0 %vm420_vm7, %v2850_v55 }
0x1c12   :  { %5068 = vmatpush3.bf16.msra.mxu0 %v2859_v57 }
0x1c13   :  { %v2826_v61 = vmul.f32 1.442695, %v2822_v59 }
0x1c14   :  { %v2820_v10 = vpop.xlane.xlu0 %2819 }
0x1c15   :  { %5560 = vpow2.f32 %v2826_v61  ;;  %v2823_v6 = vsub.f32 %v2811_v34, %v2820_v10 }
0x1c17   :  { %v2828_v14 = vmul.f32 1.442695, %v2823_v6 }
0x1c19   :  { %5562 = vpow2.f32 %v2828_v14 }
0x1c1a   :  { %5564 = vpow2.f32 %v2824_v8 }
0x1c22   :  { %v5561_v39 = vpop.eup %5560 }
0x1c23   :  { %v2833_v19 = vsel %vm373_vm5, %v5561_v39, 0.0 }
0x1c24   :  { %2834 = vadd.xlane.f32.xlu1 %v2833_v19 }
0x1c26   :  { %v5563_v23 = vpop.eup %5562 }
0x1c27   :  { %v2836_v27 = vsel %vm373_vm5, %v5563_v23, 0.0  ;;  %v5565_v62 = vpop.eup %5564 }
0x1c28   :  { %2837 = vadd.xlane.f32.xlu0 %v2836_v27  ;;  %v2830_v28 = vsel %vm373_vm5, %v5565_v62, 0.0 }
0x1c2c   :  { %2831 = vadd.xlane.f32.xlu0 %v2830_v28 }
0x1c35   :  { %2915 = vrot.lane.b32.xlu1 %v6486_v60, %s7074_s4 }
0x1c39   :  { %2913 = vrot.lane.b32.xlu1 %v6481_v46, %s7074_s4 }
0x1c3d   :  { %2909 = vrot.lane.b32.xlu1 %v6481_v46, %s7075_s20 }
0x1c42   :  { %2847 = vrot.lane.b32.xlu0 %v6481_v46, %s5658_s26 }
0x1c46   :  { %2911 = vrot.lane.b32.xlu0 %v6486_v60, %s7075_s20 }
0x1cad   :  { %v2835_v42 = vpop.xlane.xlu1 %2834 }
0x1cb1   :  { %v2838_v3 = vpop.xlane.xlu0 %2837  ;;  %v2916_v24 = vpop.permute.xlu1 %2915 }
0x1cb2   :  { %5566 = vrcp.f32 %v2838_v3  ;;  %v2927_v37 = vsel %vm306_vm2, %v2916_v24, 0 }
0x1cb3   :  { %5568 = vrcp.f32 %v2835_v42 }
0x1cb5   :  { %v2832_v54 = vpop.xlane.xlu0 %2831  ;;  %v2914_v48 = vpop.permute.xlu1 %2913 }
0x1cb6   :  { %5570 = vrcp.f32 %v2832_v54  ;;  %v2924_v38 = vsel %vm306_vm2, %v2914_v48, 0 }
0x1cb9   :  { %v2848_v1 = vpop.permute.xlu0 %2847  ;;  %v2910_v50 = vpop.permute.xlu1 %2909 }
0x1cba   :  { %5069 = vmatprep.subr.bf16.mxu0 %v2848_v1 }
0x1cbb   :  { %5070 = vmatpush3.bf16.msra.mxu0 %v2848_v1 }
0x1cbc   :  { %5256 = vmatprep.subr.msk.bf16.mxu0 %vm306_vm2, %v2916_v24 }
0x1cbd   :  { %v2912_v49 = vpop.permute.xlu0 %2911 }
0x1cbf   :  { %v5567_v30 = vpop.eup %5566 }
0x1cc0   :  { %v5569_v31 = vpop.eup %5568  ;;  %v2844_v58 = vmul.f32 %v5567_v30, %v5563_v23 }
0x1cc1   :  { %v2842_v63 = vmul.f32 %v5569_v31, %v5561_v39 }
0x1cc2   :  { %v2846_v15 = vpack.c.bf16 %v2844_v58, %v2844_v58 }
0x1cc3   :  { %v5571_v47 = vpop.eup %5570 }
0x1cc4   :  { %v2840_v7 = vmul.f32 %v5571_v47, %v5565_v62 }
0x1cc6   :  { %v2845_v33 = vpack.c.bf16 %v2842_v63, %v2840_v7  ;;  %v2393_v7 = vadd.f32 %v6477_v21, %v6529_v40 }
0x1cc8   :  { %5071 = vmatprep.mubr.msk.bf16.mxu0 %vm373_vm5, %v2845_v33  ;;  %v6647_v63 = vpack.c.bf16 %v2393_v7, %v2393_v7 }
0x1cc9   :  { %5072 = vmatmul.mubr.msk.bf16.vlgmr.msra.gmra.mxu0 %vm373_vm5, %v2846_v15 }
0x1cca   :  { %5076 = vmatpush3.bf16.xpose.msra.mxu0 %v2927_v37  ;;  %5079 = vmatprep.mubr.msk.bf16.mxu0 %vm306_vm2, %v2910_v50 }
0x1ccb   :  { %5257 = vmatprep.subr.msk.bf16.mxu0 %vm306_vm2, %v2914_v48 }
0x1cd2   :  { %5078 = vmatpush3.bf16.xpose.msra.mxu0 %v2924_v38 }
0x1cd9   :  { %5080 = vmatmul.mubr.msk.bf16.vlgmr.msra.gmra.mxu0 %vm306_vm2, %v2912_v49 }
0x1d89   :  { %v6624_v22 = vpop.f32.mrf.mxu0 }
0x1d8b   :  { %v6626_v51 = vpop.f32.mrf.mxu0 }
0x1d8d   :  { %v5074_v52 = vpop.f32.mrf.mxu0 }
0x1d8f   :  { %v6628_v53 = vpop.f32.mrf.mxu0 }
0x1d90   :  { %v5338_v34 = vpack.i.bf16 %v6628_v53, %v6626_v51 }
0x1d99   :  { %v5081_v41 = vpop.f32.mrf.mxu0 }
0x1d9a   :  { %v2979_v59 = vmul.f32 0.35355338, %v5081_v41 }
0x1d9b   :  { %v2963_v45 = vpop.f32.mrf.mxu0 }
0x1d9c   :  { %v2977_v35 = vmul.f32 0.35355338, %v2963_v45  ;;  %v2982_v6 = vadd.f32 %v2979_v59, %v5887_v17 }
0x1d9d   :  { %v5082_v55 = vpop.f32.mrf.mxu0 }
0x1d9e   :  { %v2980_v56 = vadd.f32 %v2977_v35, %v5889_v20  ;;  %v2989_v14 = vsel %vm373_vm5, %v2982_v6, -inf }
0x1d9f   :  { %v2966_v57 = vpop.f32.mrf.mxu0 }
0x1da0   :  { %v2978_v25 = vmul.f32 0.35355338, %v2966_v57  ;;  %v2983_v61 = vsel %vm373_vm5, %v2980_v56, -inf }
0x1da1   :  { %2984 = vmax.xlane.f32.xlu1 %v2983_v61 }
0x1da2   :  { %v2981_v10 = vadd.f32 %v2978_v25, %v5894_v29 }
0x1da4   :  { %v2986_v8 = vsel %vm373_vm5, %v2981_v10, -inf }
0x1da5   :  { %2987 = vmax.xlane.f32.xlu0 %v2986_v8 }
0x1da9   :  { %2990 = vmax.xlane.f32.xlu0 %v2989_v14 }
0x1db2   :  { %3020 = vrot.lane.b32.xlu1 %v6486_v60, %s7076_s25 }
0x1e2a   :  { %v2985_v39 = vpop.xlane.xlu1 %2984 }
0x1e2b   :  { %v2992_v28 = vsub.f32 %v2980_v56, %v2985_v39 }
0x1e2d   :  { %v2995_v1 = vmul.f32 1.442695, %v2992_v28 }
0x1e2e   :  { %v3021_v19 = vpop.permute.xlu1 %3020  ;;  %v2988_v23 = vpop.xlane.xlu0 %2987 }
0x1e2f   :  { %v3030_v27 = vsel %vm420_vm7, %v3021_v19, 0  ;;  %v2993_v62 = vsub.f32 %v2981_v10, %v2988_v23  ;;  %5258 = vmatprep.subr.msk.bf16.mxu1 %vm420_vm7, %v3021_v19 }
0x1e30   :  { %5084 = vmatpush3.bf16.msra.mxu1 %v3030_v27 }
0x1e31   :  { %v2997_v42 = vmul.f32 1.442695, %v2993_v62 }
0x1e32   :  { %v2991_v3 = vpop.xlane.xlu0 %2990 }
0x1e33   :  { %5572 = vpow2.f32 %v2997_v42  ;;  %v2994_v54 = vsub.f32 %v2982_v6, %v2991_v3 }
0x1e35   :  { %v2999_v24 = vmul.f32 1.442695, %v2994_v54 }
0x1e37   :  { %5574 = vpow2.f32 %v2999_v24 }
0x1e38   :  { %5576 = vpow2.f32 %v2995_v1 }
0x1e40   :  { %v5573_v30 = vpop.eup %5572 }
0x1e41   :  { %v3004_v60 = vsel %vm373_vm5, %v5573_v30, 0.0 }
0x1e42   :  { %3005 = vadd.xlane.f32.xlu1 %v3004_v60 }
0x1e44   :  { %v5575_v31 = vpop.eup %5574 }
0x1e45   :  { %v3007_v47 = vsel %vm373_vm5, %v5575_v31, 0.0  ;;  %v5577_v48 = vpop.eup %5576 }
0x1e46   :  { %3008 = vadd.xlane.f32.xlu0 %v3007_v47  ;;  %v3001_v58 = vsel %vm373_vm5, %v5577_v48, 0.0 }
0x1e4a   :  { %3002 = vadd.xlane.f32.xlu0 %v3001_v58 }
0x1e53   :  { %3131 = vrot.lane.b32.xlu1 %v6647_v63, %s5650_s1 }
0x1e57   :  { %3129 = vrot.lane.b32.xlu1 %v6527_v32, %s5650_s1  ;;  %s7077_s1 = smov 8  }
0x1e60   :  { %3018 = vrot.lane.b32.xlu0 %v6481_v46, %s7076_s25 }
0x1ecb   :  { %v3006_v33 = vpop.xlane.xlu1 %3005 }
0x1ecf   :  { %v3009_v15 = vpop.xlane.xlu0 %3008  ;;  %v3132_v21 = vpop.permute.xlu1 %3131 }
0x1ed0   :  { %5578 = vrcp.f32 %v3009_v15  ;;  %v3143_v55 = vsel %vm306_vm2, %v3132_v21, 0 }
0x1ed1   :  { %5580 = vrcp.f32 %v3006_v33 }
0x1ed3   :  { %v3003_v37 = vpop.xlane.xlu0 %3002  ;;  %v3130_v56 = vpop.permute.xlu1 %3129 }
0x1ed4   :  { %5582 = vrcp.f32 %v3003_v37  ;;  %v3140_v57 = vsel %vm306_vm2, %v3130_v56, 0 }
0x1ed7   :  { %v3019_v50 = vpop.permute.xlu0 %3018 }
0x1ed8   :  { %5085 = vmatprep.subr.bf16.mxu1 %v3019_v50 }
0x1ed9   :  { %5086 = vmatpush3.bf16.msra.mxu1 %v3019_v50 }
0x1eda   :  { %5259 = vmatprep.subr.msk.bf16.mxu1 %vm306_vm2, %v3132_v21 }
0x1edd   :  { %v5579_v40 = vpop.eup %5578 }
0x1ede   :  { %v5581_v38 = vpop.eup %5580  ;;  %v3015_v52 = vmul.f32 %v5579_v40, %v5575_v31 }
0x1edf   :  { %v3013_v45 = vmul.f32 %v5581_v38, %v5573_v30 }
0x1ee0   :  { %v3017_v46 = vpack.c.bf16 %v3015_v52, %v3015_v52 }
0x1ee1   :  { %v5583_v49 = vpop.eup %5582 }
0x1ee2   :  { %v3011_v41 = vmul.f32 %v5583_v49, %v5577_v48 }
0x1ee4   :  { %v3016_v35 = vpack.c.bf16 %v3013_v45, %v3011_v41 }
0x1ee6   :  { %5087 = vmatprep.mubr.msk.bf16.mxu1 %vm373_vm5, %v3016_v35 }
0x1ee7   :  { %5088 = vmatmul.mubr.msk.bf16.vlgmr.msra.gmra.mxu1 %vm373_vm5, %v3017_v46 }
0x1ee8   :  { %5092 = vmatpush3.bf16.xpose.msra.mxu1 %v3143_v55  ;;  %5095 = vmatprep.mubr.msk.bf16.mxu1 %vm306_vm2, %v6527_v32 }
0x1ee9   :  { %5260 = vmatprep.subr.msk.bf16.mxu1 %vm306_vm2, %v3130_v56 }
0x1ef0   :  { %5094 = vmatpush3.bf16.xpose.msra.mxu1 %v3140_v57 }
0x1ef7   :  { %5096 = vmatmul.mubr.msk.bf16.vlgmr.msra.gmra.mxu1 %vm306_vm2, %v6647_v63 }
0x1fa7   :  { %v6665_v59 = vpop.f32.mrf.mxu1 }
0x1fa9   :  { %v6667_v25 = vpop.f32.mrf.mxu1 }
0x1fab   :  { %v5090_v61 = vpop.f32.mrf.mxu1 }
0x1fad   :  { %v6669_v10 = vpop.f32.mrf.mxu1 }
0x1fae   :  { %v5343_v6 = vpack.i.bf16 %v6669_v10, %v6667_v25 }
0x1fb7   :  { %v5097_v8 = vpop.f32.mrf.mxu1 }
0x1fb8   :  { %v3195_v62 = vmul.f32 0.35355338, %v5097_v8 }
0x1fb9   :  { %v3179_v14 = vpop.f32.mrf.mxu1 }
0x1fba   :  { %v3193_v39 = vmul.f32 0.35355338, %v3179_v14  ;;  %v3198_v54 = vadd.f32 %v3195_v62, %v5887_v17 }
0x1fbb   :  { %v5098_v19 = vpop.f32.mrf.mxu1 }
0x1fbc   :  { %v3196_v23 = vadd.f32 %v3193_v39, %v5889_v20  ;;  %v3205_v24 = vsel %vm373_vm5, %v3198_v54, -inf }
0x1fbd   :  { %v3182_v27 = vpop.f32.mrf.mxu1 }
0x1fbe   :  { %v3194_v28 = vmul.f32 0.35355338, %v3182_v27  ;;  %v3199_v42 = vsel %vm373_vm5, %v3196_v23, -inf }
0x1fbf   :  { %3200 = vmax.xlane.f32.xlu1 %v3199_v42 }
0x1fc0   :  { %v3197_v3 = vadd.f32 %v3194_v28, %v5894_v29 }
0x1fc2   :  { %v3202_v1 = vsel %vm373_vm5, %v3197_v3, -inf }
0x1fc3   :  { %3203 = vmax.xlane.f32.xlu0 %v3202_v1 }
0x1fc7   :  { %3206 = vmax.xlane.f32.xlu0 %v3205_v24 }
0x1fd0   :  { %3236 = vrot.lane.b32.xlu1 %v6647_v63, %s5652_s28 }
0x2048   :  { %v3201_v30 = vpop.xlane.xlu1 %3200 }
0x2049   :  { %v3208_v58 = vsub.f32 %v3196_v23, %v3201_v30 }
0x204b   :  { %v3211_v37 = vmul.f32 1.442695, %v3208_v58 }
0x204c   :  { %v3237_v60 = vpop.permute.xlu1 %3236  ;;  %v3204_v31 = vpop.xlane.xlu0 %3203 }
0x204d   :  { %v3246_v47 = vsel %vm420_vm7, %v3237_v60, 0  ;;  %v3209_v48 = vsub.f32 %v3197_v3, %v3204_v31  ;;  %5261 = vmatprep.subr.msk.bf16.mxu0 %vm420_vm7, %v3237_v60 }
0x204e   :  { %5100 = vmatpush3.bf16.msra.mxu0 %v3246_v47 }
0x204f   :  { %v3213_v7 = vmul.f32 1.442695, %v3209_v48 }
0x2050   :  { %v3207_v33 = vpop.xlane.xlu0 %3206 }
0x2051   :  { %5584 = vpow2.f32 %v3213_v7  ;;  %v3210_v15 = vsub.f32 %v3198_v54, %v3207_v33 }
0x2053   :  { %v3215_v50 = vmul.f32 1.442695, %v3210_v15 }
0x2055   :  { %5586 = vpow2.f32 %v3215_v50 }
0x2056   :  { %5588 = vpow2.f32 %v3211_v37 }
0x205e   :  { %v5585_v21 = vpop.eup %5584 }
0x205f   :  { %v3220_v40 = vsel %vm373_vm5, %v5585_v21, 0.0 }
0x2060   :  { %3221 = vadd.xlane.f32.xlu1 %v3220_v40 }
0x2062   :  { %v5587_v38 = vpop.eup %5586 }
0x2063   :  { %v3223_v49 = vsel %vm373_vm5, %v5587_v38, 0.0  ;;  %v5589_v52 = vpop.eup %5588 }
0x2064   :  { %3224 = vadd.xlane.f32.xlu0 %v3223_v49  ;;  %v3217_v41 = vsel %vm373_vm5, %v5589_v52, 0.0 }
0x2068   :  { %3218 = vadd.xlane.f32.xlu0 %v3217_v41 }
0x2071   :  { %3302 = vrot.lane.b32.xlu1 %v6647_v63, %s5654_s30 }
0x2075   :  { %3300 = vrot.lane.b32.xlu1 %v6527_v32, %s5654_s30 }
0x2079   :  { %3296 = vrot.lane.b32.xlu1 %v6527_v32, %s5656_s18 }
0x207e   :  { %3234 = vrot.lane.b32.xlu0 %v6527_v32, %s5652_s28  ;;  %s7078_s28 = smov 16  }
0x2082   :  { %3298 = vrot.lane.b32.xlu0 %v6647_v63, %s5656_s18 }
0x20e9   :  { %v3222_v45 = vpop.xlane.xlu1 %3221 }
0x20ed   :  { %v3225_v35 = vpop.xlane.xlu0 %3224  ;;  %v3303_v56 = vpop.permute.xlu1 %3302 }
0x20ee   :  { %5590 = vrcp.f32 %v3225_v35  ;;  %v3314_v28 = vsel %vm306_vm2, %v3303_v56, 0 }
0x20ef   :  { %5592 = vrcp.f32 %v3222_v45 }
0x20f1   :  { %v3219_v46 = vpop.xlane.xlu0 %3218  ;;  %v3301_v14 = vpop.permute.xlu1 %3300 }
0x20f2   :  { %5594 = vrcp.f32 %v3219_v46  ;;  %v3311_v3 = vsel %vm306_vm2, %v3301_v14, 0 }
0x20f5   :  { %v3235_v55 = vpop.permute.xlu0 %3234  ;;  %v3297_v42 = vpop.permute.xlu1 %3296 }
0x20f6   :  { %5101 = vmatprep.subr.bf16.mxu0 %v3235_v55 }
0x20f7   :  { %5102 = vmatpush3.bf16.msra.mxu0 %v3235_v55 }
0x20f8   :  { %5262 = vmatprep.subr.msk.bf16.mxu0 %vm306_vm2, %v3303_v56 }
0x20f9   :  { %v3299_v54 = vpop.permute.xlu0 %3298 }
0x20fb   :  { %v5591_v57 = vpop.eup %5590 }
0x20fc   :  { %v5593_v61 = vpop.eup %5592  ;;  %v3231_v39 = vmul.f32 %v5591_v57, %v5587_v38 }
0x20fd   :  { %v3229_v23 = vmul.f32 %v5593_v61, %v5585_v21 }
0x20fe   :  { %v3233_v62 = vpack.c.bf16 %v3231_v39, %v3231_v39 }
0x20ff   :  { %v5595_v8 = vpop.eup %5594 }
0x2100   :  { %v3227_v19 = vmul.f32 %v5595_v8, %v5589_v52 }
0x2102   :  { %v3232_v27 = vpack.c.bf16 %v3229_v23, %v3227_v19 }
0x2104   :  { %5103 = vmatprep.mubr.msk.bf16.mxu0 %vm373_vm5, %v3232_v27 }
0x2105   :  { %5104 = vmatmul.mubr.msk.bf16.vlgmr.msra.gmra.mxu0 %vm373_vm5, %v3233_v62 }
0x2106   :  { %5108 = vmatpush3.bf16.xpose.msra.mxu0 %v3314_v28  ;;  %5111 = vmatprep.mubr.msk.bf16.mxu0 %vm306_vm2, %v3297_v42 }
0x2107   :  { %5263 = vmatprep.subr.msk.bf16.mxu0 %vm306_vm2, %v3301_v14 }
0x210e   :  { %5110 = vmatpush3.bf16.xpose.msra.mxu0 %v3311_v3 }
0x2115   :  { %5112 = vmatmul.mubr.msk.bf16.vlgmr.msra.gmra.mxu0 %vm306_vm2, %v3299_v54 }
0x21c5   :  { %v6704_v1 = vpop.f32.mrf.mxu0 }
0x21c7   :  { %v6706_v24 = vpop.f32.mrf.mxu0 }
0x21c9   :  { %v5106_v30 = vpop.f32.mrf.mxu0 }
0x21cb   :  { %v6708_v60 = vpop.f32.mrf.mxu0 }
0x21d5   :  { %v5113_v31 = vpop.f32.mrf.mxu0 }
0x21d6   :  { %v3366_v15 = vmul.f32 0.35355338, %v5113_v31 }
0x21d7   :  { %v3350_v47 = vpop.f32.mrf.mxu0 }
0x21d8   :  { %v3364_v48 = vmul.f32 0.35355338, %v3350_v47  ;;  %v3369_v40 = vadd.f32 %v3366_v15, %v5887_v17 }
0x21d9   :  { %v5114_v58 = vpop.f32.mrf.mxu0 }
0x21da   :  { %v3367_v7 = vadd.f32 %v3364_v48, %v5889_v20  ;;  %v3376_v49 = vsel %vm373_vm5, %v3369_v40, -inf }
0x21db   :  { %v3353_v33 = vpop.f32.mrf.mxu0 }
0x21dc   :  { %v3365_v37 = vmul.f32 0.35355338, %v3353_v33  ;;  %v3370_v50 = vsel %vm373_vm5, %v3367_v7, -inf }
0x21dd   :  { %3371 = vmax.xlane.f32.xlu1 %v3370_v50 }
0x21de   :  { %v3368_v21 = vadd.f32 %v3365_v37, %v5894_v29 }
0x21e0   :  { %v3373_v38 = vsel %vm373_vm5, %v3368_v21, -inf }
0x21e1   :  { %3374 = vmax.xlane.f32.xlu0 %v3373_v38 }
0x21e5   :  { %3377 = vmax.xlane.f32.xlu0 %v3376_v49 }
0x21ee   :  { %3407 = vrot.lane.b32.xlu1 %v6647_v63, %s5657_s19 }
0x2266   :  { %v3372_v52 = vpop.xlane.xlu1 %3371 }
0x2267   :  { %v3379_v55 = vsub.f32 %v3367_v7, %v3372_v52 }
0x2269   :  { %v3382_v8 = vmul.f32 1.442695, %v3379_v55 }
0x226a   :  { %v3408_v41 = vpop.permute.xlu1 %3407  ;;  %v3375_v45 = vpop.xlane.xlu0 %3374 }
0x226b   :  { %v3417_v35 = vsel %vm420_vm7, %v3408_v41, 0  ;;  %v3380_v46 = vsub.f32 %v3368_v21, %v3375_v45  ;;  %5264 = vmatprep.subr.msk.bf16.mxu1 %vm420_vm7, %v3408_v41 }
0x226c   :  { %5116 = vmatpush3.bf16.msra.mxu1 %v3417_v35 }
0x226d   :  { %v3384_v56 = vmul.f32 1.442695, %v3380_v46 }
0x226e   :  { %v3378_v57 = vpop.xlane.xlu0 %3377 }
0x226f   :  { %5596 = vpow2.f32 %v3384_v56  ;;  %v3381_v61 = vsub.f32 %v3369_v40, %v3378_v57 }
0x2271   :  { %v3386_v14 = vmul.f32 1.442695, %v3381_v61 }
0x2273   :  { %5598 = vpow2.f32 %v3386_v14 }
0x2274   :  { %5600 = vpow2.f32 %v3382_v8 }
0x227c   :  { %v5597_v39 = vpop.eup %5596 }
0x227d   :  { %v3391_v19 = vsel %vm373_vm5, %v5597_v39, 0.0 }
0x227e   :  { %3392 = vadd.xlane.f32.xlu1 %v3391_v19 }
0x2280   :  { %v5599_v23 = vpop.eup %5598 }
0x2281   :  { %v3394_v27 = vsel %vm373_vm5, %v5599_v23, 0.0  ;;  %v5601_v62 = vpop.eup %5600 }
0x2282   :  { %3395 = vadd.xlane.f32.xlu0 %v3394_v27  ;;  %v3388_v28 = vsel %vm373_vm5, %v5601_v62, 0.0 }
0x2286   :  { %3389 = vadd.xlane.f32.xlu0 %v3388_v28 }
0x228f   :  { %3473 = vrot.lane.b32.xlu1 %v6647_v63, %s5655_s29 }
0x2293   :  { %3471 = vrot.lane.b32.xlu1 %v6527_v32, %s5655_s29 }
0x2297   :  { %3467 = vrot.lane.b32.xlu1 %v6527_v32, %s5653_s2 }
0x229c   :  { %3405 = vrot.lane.b32.xlu0 %v6527_v32, %s5657_s19 }
0x22a0   :  { %3469 = vrot.lane.b32.xlu0 %v6647_v63, %s5653_s2  ;;  %s7079_s2 = smov 24  }
0x2307   :  { %v3393_v42 = vpop.xlane.xlu1 %3392 }
0x230b   :  { %v3396_v3 = vpop.xlane.xlu0 %3395  ;;  %v3474_v31 = vpop.permute.xlu1 %3473 }
0x230c   :  { %5602 = vrcp.f32 %v3396_v3  ;;  %v3485_v40 = vsel %vm306_vm2, %v3474_v31, 0 }
0x230d   :  { %5604 = vrcp.f32 %v3393_v42 }
0x230f   :  { %v3390_v54 = vpop.xlane.xlu0 %3389  ;;  %v3472_v7 = vpop.permute.xlu1 %3471 }
0x2310   :  { %5606 = vrcp.f32 %v3390_v54  ;;  %v3482_v49 = vsel %vm306_vm2, %v3472_v7, 0 }
0x2313   :  { %v3406_v30 = vpop.permute.xlu0 %3405  ;;  %v3468_v38 = vpop.permute.xlu1 %3467 }
0x2314   :  { %5117 = vmatprep.subr.bf16.mxu1 %v3406_v30 }
0x2315   :  { %5118 = vmatpush3.bf16.msra.mxu1 %v3406_v30 }
0x2316   :  { %5265 = vmatprep.subr.msk.bf16.mxu1 %vm306_vm2, %v3474_v31 }
0x2317   :  { %v3470_v52 = vpop.permute.xlu0 %3469 }
0x2319   :  { %v5603_v47 = vpop.eup %5602 }
0x231a   :  { %v5605_v48 = vpop.eup %5604  ;;  %v3402_v33 = vmul.f32 %v5603_v47, %v5599_v23 }
0x231b   :  { %v3400_v37 = vmul.f32 %v5605_v48, %v5597_v39 }
0x231c   :  { %v3404_v21 = vpack.c.bf16 %v3402_v33, %v3402_v33 }
0x231d   :  { %v5607_v58 = vpop.eup %5606 }
0x231e   :  { %v3398_v15 = vmul.f32 %v5607_v58, %v5601_v62 }
0x2320   :  { %v3403_v50 = vpack.c.bf16 %v3400_v37, %v3398_v15 }
0x2322   :  { %5119 = vmatprep.mubr.msk.bf16.mxu1 %vm373_vm5, %v3403_v50 }
0x2323   :  { %5120 = vmatmul.mubr.msk.bf16.vlgmr.msra.gmra.mxu1 %vm373_vm5, %v3404_v21 }
0x2324   :  { %5124 = vmatpush3.bf16.xpose.msra.mxu1 %v3485_v40  ;;  %5127 = vmatprep.mubr.msk.bf16.mxu1 %vm306_vm2, %v3468_v38 }
0x2325   :  { %5266 = vmatprep.subr.msk.bf16.mxu1 %vm306_vm2, %v3472_v7 }
0x232c   :  { %5126 = vmatpush3.bf16.xpose.msra.mxu1 %v3482_v49 }
0x2333   :  { %5128 = vmatmul.mubr.msk.bf16.vlgmr.msra.gmra.mxu1 %vm306_vm2, %v3470_v52 }
0x23e3   :  { %v6741_v41 = vpop.f32.mrf.mxu1 }
0x23e5   :  { %v6743_v45 = vpop.f32.mrf.mxu1 }
0x23e7   :  { %v5122_v35 = vpop.f32.mrf.mxu1 }
0x23e9   :  { %v6745_v46 = vpop.f32.mrf.mxu1 }
0x23ea   :  { %v5363_v55 = vpack.i.bf16 %v6741_v41, %v6745_v46 }
0x23f3   :  { %v5129_v56 = vpop.f32.mrf.mxu1 }
0x23f4   :  { %v3537_v19 = vmul.f32 0.35355338, %v5129_v56 }
0x23f5   :  { %v3521_v57 = vpop.f32.mrf.mxu1 }
0x23f6   :  { %v3535_v61 = vmul.f32 0.35355338, %v3521_v57  ;;  %v3540_v28 = vadd.f32 %v3537_v19, %v5887_v17 }
0x23f7   :  { %v5130_v8 = vpop.f32.mrf.mxu1 }
0x23f8   :  { %v3538_v14 = vadd.f32 %v3535_v61, %v5889_v20  ;;  %v3547_v3 = vsel %vm373_vm5, %v3540_v28, -inf }
0x23f9   :  { %v3524_v39 = vpop.f32.mrf.mxu1 }
0x23fa   :  { %v3536_v23 = vmul.f32 0.35355338, %v3524_v39  ;;  %v3541_v27 = vsel %vm373_vm5, %v3538_v14, -inf }
0x23fb   :  { %3542 = vmax.xlane.f32.xlu1 %v3541_v27 }
0x23fc   :  { %v3539_v62 = vadd.f32 %v3536_v23, %v5894_v29 }
0x23fe   :  { %v3544_v42 = vsel %vm373_vm5, %v3539_v62, -inf }
0x23ff   :  { %3545 = vmax.xlane.f32.xlu0 %v3544_v42 }
0x2403   :  { %3548 = vmax.xlane.f32.xlu0 %v3547_v3 }
0x240c   :  { %3578 = vrot.lane.b32.xlu1 %v6647_v63, %s5658_s26 }
0x2484   :  { %v3543_v54 = vpop.xlane.xlu1 %3542 }
0x2485   :  { %v3550_v58 = vsub.f32 %v3538_v14, %v3543_v54 }
0x2487   :  { %v3553_v37 = vmul.f32 1.442695, %v3550_v58 }
0x2488   :  { %v3579_v30 = vpop.permute.xlu1 %3578  ;;  %v3546_v31 = vpop.xlane.xlu0 %3545 }
0x2489   :  { %v3588_v47 = vsel %vm420_vm7, %v3579_v30, 0  ;;  %v3551_v48 = vsub.f32 %v3539_v62, %v3546_v31  ;;  %5267 = vmatprep.subr.msk.bf16.mxu0 %vm420_vm7, %v3579_v30 }
0x248a   :  { %5132 = vmatpush3.bf16.msra.mxu0 %v3588_v47 }
0x248b   :  { %v3555_v7 = vmul.f32 1.442695, %v3551_v48 }
0x248c   :  { %v3549_v33 = vpop.xlane.xlu0 %3548 }
0x248d   :  { %5608 = vpow2.f32 %v3555_v7  ;;  %v3552_v15 = vsub.f32 %v3540_v28, %v3549_v33 }
0x248f   :  { %v3557_v50 = vmul.f32 1.442695, %v3552_v15 }
0x2491   :  { %5610 = vpow2.f32 %v3557_v50 }
0x2492   :  { %5612 = vpow2.f32 %v3553_v37 }
0x249a   :  { %v5609_v21 = vpop.eup %5608 }
0x249b   :  { %v3562_v40 = vsel %vm373_vm5, %v5609_v21, 0.0 }
0x249c   :  { %3563 = vadd.xlane.f32.xlu1 %v3562_v40 }
0x249e   :  { %v5611_v38 = vpop.eup %5610 }
0x249f   :  { %v3565_v49 = vsel %vm373_vm5, %v5611_v38, 0.0  ;;  %v5613_v52 = vpop.eup %5612 }
0x24a0   :  { %3566 = vadd.xlane.f32.xlu0 %v3565_v49  ;;  %v3559_v35 = vsel %vm373_vm5, %v5613_v52, 0.0 }
0x24a4   :  { %3560 = vadd.xlane.f32.xlu0 %v3559_v35 }
0x24ad   :  { %3644 = vrot.lane.b32.xlu1 %v6647_v63, %s7074_s4 }
0x24b1   :  { %3642 = vrot.lane.b32.xlu1 %v6527_v32, %s7074_s4 }
0x24b5   :  { %3638 = vrot.lane.b32.xlu1 %v6527_v32, %s7075_s20 }
0x24ba   :  { %3576 = vrot.lane.b32.xlu0 %v6527_v32, %s5658_s26 }
0x24be   :  { %3640 = vrot.lane.b32.xlu0 %v6647_v63, %s7075_s20 }
0x2525   :  { %v3564_v56 = vpop.xlane.xlu1 %3563 }
0x2529   :  { %v3567_v57 = vpop.xlane.xlu0 %3566  ;;  %v3645_v14 = vpop.permute.xlu1 %3644 }
0x252a   :  { %5614 = vrcp.f32 %v3567_v57  ;;  %v3656_v30 = vsel %vm306_vm2, %v3645_v14, 0 }
0x252b   :  { %5616 = vrcp.f32 %v3564_v56 }
0x252d   :  { %v3561_v61 = vpop.xlane.xlu0 %3560  ;;  %v3643_v27 = vpop.permute.xlu1 %3642 }
0x252e   :  { %5618 = vrcp.f32 %v3561_v61  ;;  %v3653_v47 = vsel %vm306_vm2, %v3643_v27, 0 }
0x2531   :  { %v3577_v8 = vpop.permute.xlu0 %3576  ;;  %v3639_v31 = vpop.permute.xlu1 %3638 }
0x2532   :  { %5133 = vmatprep.subr.bf16.mxu0 %v3577_v8 }
0x2533   :  { %5134 = vmatpush3.bf16.msra.mxu0 %v3577_v8 }
0x2534   :  { %5268 = vmatprep.subr.msk.bf16.mxu0 %vm306_vm2, %v3645_v14 }
0x2535   :  { %v3641_v48 = vpop.permute.xlu0 %3640 }
0x2537   :  { %v5615_v39 = vpop.eup %5614 }
0x2538   :  { %v5617_v19 = vpop.eup %5616  ;;  %v3573_v62 = vmul.f32 %v5615_v39, %v5611_v38 }
0x2539   :  { %v3571_v42 = vmul.f32 %v5617_v19, %v5609_v21 }
0x253a   :  { %v3575_v54 = vpack.c.bf16 %v3573_v62, %v3573_v62 }
0x253b   :  { %v5619_v23 = vpop.eup %5618 }
0x253c   :  { %v3569_v28 = vmul.f32 %v5619_v23, %v5613_v52 }
0x253e   :  { %v3574_v3 = vpack.c.bf16 %v3571_v42, %v3569_v28 }
0x2540   :  { %5135 = vmatprep.mubr.msk.bf16.mxu0 %vm373_vm5, %v3574_v3 }
0x2541   :  { %5136 = vmatmul.mubr.msk.bf16.vlgmr.msra.gmra.mxu0 %vm373_vm5, %v3575_v54 }
0x2542   :  { %5140 = vmatpush3.bf16.xpose.msra.mxu0 %v3656_v30  ;;  %5143 = vmatprep.mubr.msk.bf16.mxu0 %vm306_vm2, %v3639_v31 }
0x2543   :  { %5269 = vmatprep.subr.msk.bf16.mxu0 %vm306_vm2, %v3643_v27 }
0x254a   :  { %5142 = vmatpush3.bf16.xpose.msra.mxu0 %v3653_v47 }
0x254b   :  { %5171 = vmatprep.subr.bf16.mxu0 %v5648_v0 }
0x2551   :  { %5144 = vmatmul.mubr.msk.bf16.vlgmr.msra.gmra.mxu0 %vm306_vm2, %v3641_v48 }
0x2552   :  { %5175 = vmatprep.mubr.msk.bf16.mxu0 %vm5649_vm0, %v5648_v0 }
0x2601   :  { %v6783_v58 = vpop.f32.mrf.mxu0 }
0x2603   :  { %v3624_v7 = vpop.f32.mrf.mxu0 }
0x2605   :  { %v5138_v33 = vpop.f32.mrf.mxu0 }
0x2606   :  { %v5348_v33 = vpack.i.bf16 %v6743_v45, %v6585_v5 }
0x2607   :  { %v6785_v15 = vpop.f32.mrf.mxu0 }
0x2608   :  { %v5368_v37 = vpack.i.bf16 %v6783_v58, %v6785_v15 }
0x2611   :  { %v5145_v50 = vpop.f32.mrf.mxu0 }
0x2612   :  { %v3708_v35 = vmul.f32 0.35355338, %v5145_v50 }
0x2613   :  { %v3692_v21 = vpop.f32.mrf.mxu0 }
0x2614   :  { %v3706_v40 = vmul.f32 0.35355338, %v3692_v21  ;;  %v3711_v8 = vadd.f32 %v3708_v35, %v5887_v17  ;;  %v5402_v21 = vld [vmem:[%s7043_s5 + $0x18] sm:$0xff]  }
0x2615   :  { %v5146_v38 = vpop.f32.mrf.mxu0 }
0x2616   :  { %v3709_v49 = vadd.f32 %v3706_v40, %v5889_v20  ;;  %v3718_v39 = vsel %vm373_vm5, %v3711_v8, -inf }
0x2617   :  { %v3695_v52 = vpop.f32.mrf.mxu0 }
0x2618   :  { %v3707_v56 = vmul.f32 0.35355338, %v3695_v52  ;;  %v3712_v57 = vsel %vm373_vm5, %v3709_v49, -inf }
0x2619   :  { %3713 = vmax.xlane.f32.xlu1 %v3712_v57 }
0x261a   :  { %v3710_v61 = vadd.f32 %v3707_v56, %v5894_v29 }
0x261c   :  { %v3715_v14 = vsel %vm373_vm5, %v3710_v61, -inf }
0x261d   :  { %3716 = vmax.xlane.f32.xlu0 %v3715_v14 }
0x2621   :  { %3719 = vmax.xlane.f32.xlu0 %v3718_v39 }
0x26a2   :  { %v3714_v19 = vpop.xlane.xlu1 %3713 }
0x26a3   :  { %v3721_v20 = vsub.f32 %v3709_v49, %v3714_v19 }
0x26a5   :  { %v3724_v3 = vmul.f32 1.442695, %v3721_v20 }
0x26a6   :  { %v3717_v23 = vpop.xlane.xlu0 %3716 }
0x26a7   :  { %v3722_v27 = vsub.f32 %v3710_v61, %v3717_v23  ;;  %v5403_v61 = vld [vmem:[%s7043_s5 + $0x10] sm:$0xff]  }
0x26a9   :  { %v3726_v62 = vmul.f32 1.442695, %v3722_v27 }
0x26aa   :  { %v3720_v28 = vpop.xlane.xlu0 %3719 }
0x26ab   :  { %5620 = vpow2.f32 %v3726_v62  ;;  %v3723_v42 = vsub.f32 %v3711_v8, %v3720_v28 }
0x26ad   :  { %v3728_v54 = vmul.f32 1.442695, %v3723_v42 }
0x26af   :  { %5622 = vpow2.f32 %v3728_v54 }
0x26b0   :  { %5624 = vpow2.f32 %v3724_v3 }
0x26b8   :  { %v5621_v29 = vpop.eup %5620 }
0x26b9   :  { %v3733_v17 = vsel %vm373_vm5, %v5621_v29, 0.0 }
0x26ba   :  { %3734 = vadd.xlane.f32.xlu1 %v3733_v17 }
0x26bc   :  { %v5623_v30 = vpop.eup %5622 }
0x26bd   :  { %v3736_v31 = vsel %vm373_vm5, %v5623_v30, 0.0  ;;  %v5625_v47 = vpop.eup %5624 }
0x26be   :  { %3737 = vadd.xlane.f32.xlu0 %v3736_v31  ;;  %v3730_v48 = vsel %vm373_vm5, %v5625_v47, 0.0 }
0x26c2   :  { %3731 = vadd.xlane.f32.xlu0 %v3730_v48 }
0x26cb   :  { %3749 = vrot.lane.b32.xlu1 %v6647_v63, %s7076_s25  ;;  %v5353_v63 = vpack.i.bf16 %v3624_v7, %v6624_v22 }
0x26cf   :  { %5334 = vrot.lane.b32.xlu1 %v5333_v16, %s7077_s1 }
0x26d3   :  { %5339 = vrot.lane.b32.xlu1 %v5338_v34, %s7078_s28 }
0x26d7   :  { %5344 = vrot.lane.b32.xlu1 %v5343_v6, %s7079_s2 }
0x26d8   :  { %3747 = vrot.lane.b32.xlu0 %v6527_v32, %s7076_s25 }
0x26db   :  { %5354 = vrot.lane.b32.xlu1 %v5353_v63, %s7078_s28 }
0x26dc   :  { %5349 = vrot.lane.b32.xlu0 %v5348_v33, %s7077_s1 }
0x26df   :  { %5364 = vrot.lane.b32.xlu1 %v5363_v55, %s7077_s1 }
0x2743   :  { %v3735_v12 = vpop.xlane.xlu1 %3734 }
0x2747   :  { %v3750_v36 = vpop.permute.xlu1 %3749  ;;  %v3738_v16 = vpop.xlane.xlu0 %3737 }
0x2748   :  { %v3759_v51 = vsel %vm420_vm7, %v3750_v36, 0  ;;  %5270 = vmatprep.subr.msk.bf16.mxu1 %vm420_vm7, %v3750_v36  ;;  %5626 = vrcp.f32 %v3738_v16 }
0x2749   :  { %5148 = vmatpush3.bf16.msra.mxu1 %v3759_v51  ;;  %5628 = vrcp.f32 %v3735_v12 }
0x274b   :  { %v3732_v32 = vpop.xlane.xlu0 %3731  ;;  %v5335_v5 = vpop.permute.xlu1 %5334 }
0x274c   :  { %5630 = vrcp.f32 %v3732_v32  ;;  %v5337_v55 = vunpack.i.h.bf16 %v5335_v5  ;;  %v5336_v7 = vunpack.i.l.bf16 %v5335_v5 }
0x274e   :  { %v3117_v56 = vsel %vm306_vm2, %v6583_v11, %v5337_v55  ;;  %v3116_v57 = vsel %vm306_vm2, %v6581_v4, %v5336_v7 }
0x274f   :  { %v3748_v22 = vpop.permute.xlu0 %3747  ;;  %v5340_v53 = vpop.permute.xlu1 %5339 }
0x2750   :  { %5149 = vmatprep.subr.bf16.mxu1 %v3748_v22  ;;  %v5342_v40 = vunpack.i.h.bf16 %v5340_v53  ;;  %v5341_v38 = vunpack.i.l.bf16 %v5340_v53 }
0x2751   :  { %5150 = vmatpush3.bf16.msra.mxu1 %v3748_v22 }
0x2752   :  { %5155 = vmatprep.subr.bf16.mxu1 %v5648_v0  ;;  %v3119_v8 = vsel %vm1024_vm8, %v3116_v57, %v5341_v38  ;;  %v3120_v14 = vsel %vm1024_vm8, %v3117_v56, %v5342_v40 }
0x2753   :  { %v5345_v46 = vpop.permute.xlu1 %5344  ;;  %v5350_v48 = vpop.permute.xlu0 %5349 }
0x2754   :  { %v5347_v52 = vunpack.i.h.bf16 %v5345_v46  ;;  %v5346_v35 = vunpack.i.l.bf16 %v5345_v46  ;;  %v5352_v63 = vunpack.i.h.bf16 %v5350_v48  ;;  %v5351_v33 = vunpack.i.l.bf16 %v5350_v48 }
0x2755   :  { %v5627_v34 = vpop.eup %5626 }
0x2756   :  { %v5629_v25 = vpop.eup %5628  ;;  %v3744_v6 = vmul.f32 %v5627_v34, %v5623_v30  ;;  %v3122_v39 = vsel %vm373_vm5, %v3119_v8, %v5346_v35  ;;  %v3123_v11 = vsel %vm373_vm5, %v3120_v14, %v5347_v52  ;;  %v3118_v32 = vsel %vm306_vm2, %v6579_v13, %v5351_v33 }
0x2757   :  { %v3742_v45 = vmul.f32 %v5629_v25, %v5621_v29  ;;  %v3854_v4 = vpack.c.bf16 %v3123_v11, %v3122_v39 }
0x2758   :  { %v3746_v49 = vpack.c.bf16 %v3744_v6, %v3744_v6 }
0x2759   :  { %v5631_v10 = vpop.eup %5630 }
0x275a   :  { %v3740_v41 = vmul.f32 %v5631_v10, %v5625_v47 }
0x275c   :  { %v3745_v50 = vpack.c.bf16 %v3742_v45, %v3740_v41 }
0x275e   :  { %5151 = vmatprep.mubr.msk.bf16.mxu1 %vm373_vm5, %v3745_v50 }
0x275f   :  { %5152 = vmatmul.mubr.msk.bf16.vlgmr.msra.gmra.mxu1 %vm373_vm5, %v3746_v49 }
0x2760   :  { %5156 = vmatpush3.bf16.msra.mxu1 %v5402_v21  ;;  %5159 = vmatprep.mubr.msk.bf16.mxu1 %vm5649_vm0, %v5648_v0 }
0x2761   :  { %5157 = vmatprep.subr.bf16.mxu1 %v5648_v0 }
0x2764   :  { %5158 = vmatpush3.bf16.msra.mxu1 %v5403_v61 }
0x2765   :  { %5187 = vmatprep.subr.bf16.mxu1 %v5648_v0 }
0x2767   :  { %5160 = vmatmul.mubr.msk.bf16.vlgmr.msra.gmra.mxu1 %vm231_vm1, %v3854_v4 }
0x2768   :  { %5163 = vmatprep.mubr.msk.bf16.mxu1 %vm5649_vm0, %v5648_v0 }
0x281f   :  { %v5153_v19 = vpop.f32.mrf.mxu1 }
0x2821   :  { %v3795_v23 = vpop.f32.mrf.mxu1 }
0x2822   :  { %v5358_v27 = vpack.i.bf16 %v3795_v23, %v6665_v59  ;;  %v6859_v59 = vld [vmem:[%s7044_s6 + $0x1] ss:$0 sm:$0xff] }
0x2823   :  { %v5154_v20 = vpop.f32.mrf.mxu1 }
0x2824   :  { %5359 = vrot.lane.b32.xlu0 %v5358_v27, %s7079_s2 }
0x2825   :  { %v3798_v62 = vpop.f32.mrf.mxu1 }
0x2826   :  { %v5373_v28 = vpack.i.bf16 %v5153_v19, %v3798_v62 }
0x2827   :  { %v3925_v42 = vpop.f32.mrf.mxu1 }
0x2828   :  { %5369 = vrot.lane.b32.xlu0 %v5368_v37, %s7078_s28  ;;  %5374 = vrot.lane.b32.xlu1 %v5373_v28, %s7079_s2  ;;  %v3926_v17 = vadd.f32 %v6859_v59, %v3925_v42  ;;  %v5355_v37 = vpop.permute.xlu1 %5354 }
0x2829   :  { %v5161_v3 = vpop.f32.mrf.mxu1  ;;  %v5357_v12 = vunpack.i.h.bf16 %v5355_v37  ;;  %v5356_v36 = vunpack.i.l.bf16 %v5355_v37 }
0x282a   :  { %v3948_v30 = vadd.f32 %v3926_v17, %v6445_v2  ;;  %v3845_v2 = vsel %vm306_vm2, %v6706_v24, %v5352_v63 }
0x282b   :  { %v3928_v54 = vpop.f32.mrf.mxu1  ;;  %v3121_v22 = vsel %vm1024_vm8, %v3118_v32, %v5356_v36  ;;  %v3848_v53 = vsel %vm1024_vm8, %v3845_v2, %v5357_v12 }
0x282c   :  { %v3929_v31 = vadd.f32 %v6859_v59, %v3928_v54  ;;  %v3958_v47 = vsel %vm231_vm1, %v3948_v30, 0.0  ;;  %v5365_v16 = vpop.permute.xlu1 %5364 }
0x282d   :  { %v5162_v29 = vpop.f32.mrf.mxu1  ;;  %v5367_v34 = vunpack.i.h.bf16 %v5365_v16  ;;  %v5366_v25 = vunpack.i.l.bf16 %v5365_v16 }
0x282e   :  { %v3949_v58 = vadd.f32 %v3929_v31, %v6448_v18 }
0x282f   :  { %v3847_v13 = vsel %vm306_vm2, %v6704_v1, %v5367_v34  ;;  %v3846_v21 = vsel %vm306_vm2, %v6708_v60, %v5366_v25 }
0x2830   :  { %v3961_v15 = vsel %vm231_vm1, %v3949_v58, 0.0 }
0x2847   :  { %3959 = vadd.xlane.f32.xlu0 %v3958_v47 }
0x284c   :  { %3962 = vadd.xlane.f32.xlu1 %v3961_v15 }
0x2896   :  { %v5360_v51 = vpop.permute.xlu0 %5359 }
0x2897   :  { %v5362_v5 = vunpack.i.h.bf16 %v5360_v51  ;;  %v5361_v18 = vunpack.i.l.bf16 %v5360_v51 }
0x2899   :  { %v3124_v10 = vsel %vm373_vm5, %v3121_v22, %v5361_v18  ;;  %v3851_v6 = vsel %vm373_vm5, %v3848_v53, %v5362_v5 }
0x289a   :  { %v3855_v41 = vpack.c.bf16 %v3851_v6, %v3124_v10  ;;  %v5375_v45 = vpop.permute.xlu1 %5374  ;;  %v5370_v46 = vpop.permute.xlu0 %5369 }
0x289b   :  { %v5377_v55 = vunpack.i.h.bf16 %v5375_v45  ;;  %v5376_v24 = vunpack.i.l.bf16 %v5375_v45  ;;  %v5372_v7 = vunpack.i.h.bf16 %v5370_v46  ;;  %v5371_v50 = vunpack.i.l.bf16 %v5370_v46 }
0x289c   :  { %5164 = vmatmul.mubr.msk.bf16.gmra.mxu1 %vm231_vm1, %v3855_v41 }
0x289d   :  { %v3850_v40 = vsel %vm1024_vm8, %v3847_v13, %v5372_v7  ;;  %v3849_v38 = vsel %vm1024_vm8, %v3846_v21, %v5371_v50  ;;  %5167 = vmatprep.mubr.msk.bf16.mxu1 %vm5649_vm0, %v5648_v0 }
0x289e   :  { %v3852_v49 = vsel %vm373_vm5, %v3849_v38, %v5376_v24  ;;  %v3853_v52 = vsel %vm373_vm5, %v3850_v40, %v5377_v55 }
0x289f   :  { %v3856_v35 = vpack.c.bf16 %v3853_v52, %v3852_v49  ;;  %v6934_v49 = vld [vmem:[%s7046_s7 + $0x1] ss:$0 sm:$0xff] }
0x28a4   :  { %5168 = vmatmul.mubr.msk.bf16.gmra.mxu1 %vm231_vm1, %v3856_v35 }
0x28a5   :  { %5203 = vmatprep.mubr.msk.bf16.mxu1 %vm5649_vm0, %v5648_v0 }
0x28d0   :  { %v3960_v56 = vpop.xlane.xlu0 %3959 }
0x28d1   :  { %v3976_v14 = vmul.f32 0.03125, %v3960_v56 }
0x28d3   :  { %v3982_v20 = vsub.f32 %v3948_v30, %v3976_v14  ;;  %v5406_v14 = vld [vmem:[%s7048_s13 + $0x78] sm:$0xff]  }
0x28d4   :  { %5188 = vmatpush3.bf16.msra.mxu1 %v5406_v14 }
0x28d5   :  { %v3963_v4 = vpop.xlane.xlu1 %3962  ;;  %v3988_v47 = vmul.f32 %v3982_v20, %v3982_v20  ;;  %5189 = vmatprep.subr.bf16.mxu1 %v5648_v0 }
0x28d6   :  { %v3977_v62 = vmul.f32 0.03125, %v3963_v4  ;;  %v5409_v4 = vld [vmem:[%s7048_s13 + $0x60] sm:$0xff]  }
0x28d7   :  { %v3994_v15 = vsel %vm231_vm1, %v3988_v47, 0.0 }
0x28d8   :  { %v3983_v29 = vsub.f32 %v3949_v58, %v3977_v62  ;;  %v5405_v58 = vld [vmem:[%s7045_s11 + $0x10] sm:$0xff]  }
0x28da   :  { %v3989_v48 = vmul.f32 %v3983_v29, %v3983_v29 }
0x295c   :  { %v3933_v1 = vpop.f32.mrf.mxu1 }
0x295d   :  { %v3934_v60 = vadd.f32 %v6859_v59, %v3933_v1 }
0x295e   :  { %v5165_v57 = vpop.f32.mrf.mxu1 }
0x295f   :  { %v3950_v61 = vadd.f32 %v3934_v60, %v6458_v9  ;;  %v6940_v60 = vld [vmem:[%s7047_s8 + $0x1] ss:$0 sm:$0xff] }
0x2960   :  { %v3936_v8 = vpop.f32.mrf.mxu1 }
0x2961   :  { %v3937_v39 = vadd.f32 %v6859_v59, %v3936_v8  ;;  %v3964_v11 = vsel %vm231_vm1, %v3950_v61, 0.0 }
0x2962   :  { %3965 = vadd.xlane.f32.xlu0 %v3964_v11  ;;  %v5166_v19 = vpop.f32.mrf.mxu1  ;;  %v5408_v11 = vld [vmem:[%s7048_s13 + $0x68] sm:$0xff]  }
0x2963   :  { %v3951_v23 = vadd.f32 %v3937_v39, %v6461_v43  ;;  %v5407_v39 = vld [vmem:[%s7048_s13 + $0x70] sm:$0xff]   ;;  %v5410_v19 = vld [vmem:[%s7048_s13 + $0x58] sm:$0xff]  }
0x2964   :  { %v3941_v27 = vpop.f32.mrf.mxu1  ;;  %5190 = vmatpush3.bf16.msra.mxu1 %v5407_v39 }
0x2965   :  { %v3942_v28 = vadd.f32 %v6859_v59, %v3941_v27  ;;  %v3967_v42 = vsel %vm231_vm1, %v3951_v23, 0.0  ;;  %5191 = vmatprep.subr.bf16.mxu1 %v5648_v0  ;;  %v5412_v27 = vld [vmem:[%s7048_s13 + $0x48] sm:$0xff]  }
0x2966   :  { %3968 = vadd.xlane.f32.xlu0 %v3967_v42  ;;  %v5169_v9 = vpop.f32.mrf.mxu1 }
0x2967   :  { %v3952_v3 = vadd.f32 %v3942_v28, %v6508_v26  ;;  %v3997_v26 = vsel %vm231_vm1, %v3989_v48, 0.0 }
0x2968   :  { %v3944_v54 = vpop.f32.mrf.mxu1  ;;  %5192 = vmatpush3.bf16.msra.mxu1 %v5408_v11 }
0x2969   :  { %v3945_v17 = vadd.f32 %v6859_v59, %v3944_v54  ;;  %v3970_v31 = vsel %vm231_vm1, %v3952_v3, 0.0  ;;  %v5404_v59 = vld [vmem:[%s7045_s11 + $0x18] sm:$0xff]   ;;  %5193 = vmatprep.subr.bf16.mxu1 %v5648_v0 }
0x296a   :  { %3971 = vadd.xlane.f32.xlu0 %v3970_v31  ;;  %v5170_v43 = vpop.f32.mrf.mxu1  ;;  %5172 = vmatpush3.bf16.msra.mxu0 %v5404_v59 }
0x296b   :  { %v3953_v30 = vadd.f32 %v3945_v17, %v6511_v44  ;;  %5173 = vmatprep.subr.bf16.mxu0 %v5648_v0 }
0x296c   :  { %5194 = vmatpush3.bf16.msra.mxu1 %v5409_v4 }
0x296d   :  { %v3973_v37 = vsel %vm231_vm1, %v3953_v30, 0.0  ;;  %5195 = vmatprep.subr.bf16.mxu1 %v5648_v0 }
0x296e   :  { %3995 = vadd.xlane.f32.xlu0 %v3994_v15  ;;  %3974 = vadd.xlane.f32.xlu1 %v3973_v37 }
0x296f   :  { %5174 = vmatpush3.bf16.msra.mxu0 %v5405_v58 }
0x2970   :  { %5215 = vmatprep.subr.bf16.mxu0 %v5648_v0  ;;  %5196 = vmatpush3.bf16.msra.mxu1 %v5410_v19 }
0x2971   :  { %5197 = vmatprep.subr.bf16.mxu1 %v5648_v0 }
0x2972   :  { %3998 = vadd.xlane.f32.xlu1 %v3997_v26 }
0x29eb   :  { %v3966_v44 = vpop.xlane.xlu0 %3965 }
0x29ec   :  { %v3978_v63 = vmul.f32 0.03125, %v3966_v44 }
0x29ee   :  { %v6911_v33 = vsub.f32 %v3950_v61, %v3978_v63 }
0x29ef   :  { %v3969_v12 = vpop.xlane.xlu0 %3968 }
0x29f0   :  { %v3979_v36 = vmul.f32 0.03125, %v3969_v12  ;;  %v3990_v16 = vmul.f32 %v6911_v33, %v6911_v33 }
0x29f2   :  { %v6915_v51 = vsub.f32 %v3951_v23, %v3979_v36  ;;  %v4000_v2 = vsel %vm231_vm1, %v3990_v16, 0.0  ;;  %v5411_v23 = vld [vmem:[%s7048_s13 + $0x50] sm:$0xff]  }
0x29f3   :  { %4001 = vadd.xlane.f32.xlu0 %v4000_v2  ;;  %v3972_v32 = vpop.xlane.xlu0 %3971  ;;  %5198 = vmatpush3.bf16.msra.mxu1 %v5411_v23 }
0x29f4   :  { %v3980_v5 = vmul.f32 0.03125, %v3972_v32  ;;  %v3991_v18 = vmul.f32 %v6915_v51, %v6915_v51  ;;  %5199 = vmatprep.subr.bf16.mxu1 %v5648_v0 }
0x29f6   :  { %v6920_v22 = vsub.f32 %v3952_v3, %v3980_v5  ;;  %v4003_v53 = vsel %vm231_vm1, %v3991_v18, 0.0 }
0x29f7   :  { %v3996_v34 = vpop.xlane.xlu0 %3995  ;;  %4004 = vadd.xlane.f32.xlu1 %v4003_v53  ;;  %v3975_v25 = vpop.xlane.xlu1 %3974  ;;  %5200 = vmatpush3.bf16.msra.mxu1 %v5412_v27  ;;  %v4568_v27 = vld [vmem:[%s7050_s14 + $0x1] ss:$0 sm:$0xff] }
0x29f8   :  { %v4012_v10 = vmul.f32 0.03125, %v3996_v34  ;;  %v3981_v6 = vmul.f32 0.03125, %v3975_v25  ;;  %v3992_v41 = vmul.f32 %v6920_v22, %v6920_v22  ;;  %5201 = vmatprep.subr.bf16.mxu1 %v5648_v0 }
0x29fa   :  { %v4018_v45 = vadd.f32 1e-05, %v4012_v10  ;;  %v6925_v46 = vsub.f32 %v3953_v30, %v3981_v6  ;;  %v4006_v55 = vsel %vm231_vm1, %v3992_v41, 0.0 }
0x29fb   :  { %4007 = vadd.xlane.f32.xlu0 %v4006_v55  ;;  %v3999_v24 = vpop.xlane.xlu1 %3998 }
0x29fc   :  { %5632 = vrsqrt.f32 %v4018_v45  ;;  %v4013_v7 = vmul.f32 0.03125, %v3999_v24  ;;  %v3993_v50 = vmul.f32 %v6925_v46, %v6925_v46 }
0x29fe   :  { %v4019_v13 = vadd.f32 1e-05, %v4013_v7  ;;  %v4009_v21 = vsel %vm231_vm1, %v3993_v50, 0.0 }
0x29ff   :  { %4010 = vadd.xlane.f32.xlu1 %v4009_v21 }
0x2a00   :  { %5634 = vrsqrt.f32 %v4019_v13 }
0x2a09   :  { %v5633_v40 = vpop.eup %5632 }
0x2a0a   :  { %v4030_v38 = vmul.f32 %v5633_v40, %v3982_v20  ;;  %v5413_v20 = vld [vmem:[%s7048_s13 + $0x40] sm:$0xff]  }
0x2a0b   :  { %5202 = vmatpush3.bf16.msra.mxu1 %v5413_v20 }
0x2a0c   :  { %v4042_v1 = vmul.f32 %v6934_v49, %v4030_v38 }
0x2a0d   :  { %v5635_v52 = vpop.eup %5634 }
0x2a0e   :  { %v4031_v35 = vmul.f32 %v5635_v52, %v3983_v29  ;;  %v4054_v57 = vadd.f32 %v6940_v60, %v4042_v1 }
0x2a10   :  { %v4043_v56 = vmul.f32 %v6934_v49, %v4031_v35 }
0x2a12   :  { %v6945_v61 = vadd.f32 %v6940_v60, %v4043_v56 }
0x2a14   :  { %v4060_v8 = vpack.c.bf16 %v6945_v61, %v4054_v57 }
0x2a16   :  { %5176 = vmatmul.mubr.msk.bf16.vlgmr.msra.gmra.mxu0 %vm231_vm1, %v4060_v8 }
0x2a17   :  { %5179 = vmatprep.mubr.msk.bf16.mxu0 %vm5649_vm0, %v5648_v0 }
0x2a7c   :  { %v4002_v62 = vpop.xlane.xlu0 %4001 }
0x2a7d   :  { %v4014_v28 = vmul.f32 0.03125, %v4002_v62 }
0x2a7f   :  { %v4020_v42 = vadd.f32 1e-05, %v4014_v28 }
0x2a80   :  { %v4005_v9 = vpop.xlane.xlu1 %4004 }
0x2a81   :  { %5636 = vrsqrt.f32 %v4020_v42  ;;  %v4015_v3 = vmul.f32 0.03125, %v4005_v9 }
0x2a83   :  { %v4021_v54 = vadd.f32 1e-05, %v4015_v3 }
0x2a84   :  { %v4008_v29 = vpop.xlane.xlu0 %4007 }
0x2a85   :  { %5638 = vrsqrt.f32 %v4021_v54  ;;  %v4016_v17 = vmul.f32 0.03125, %v4008_v29 }
0x2a87   :  { %v4022_v31 = vadd.f32 1e-05, %v4016_v17 }
0x2a88   :  { %v4011_v47 = vpop.xlane.xlu1 %4010 }
0x2a89   :  { %5640 = vrsqrt.f32 %v4022_v31  ;;  %v4017_v43 = vmul.f32 0.03125, %v4011_v47 }
0x2a8b   :  { %v4023_v30 = vadd.f32 1e-05, %v4017_v43 }
0x2a8d   :  { %5642 = vrsqrt.f32 %v4023_v30 }
0x2a8e   :  { %v5637_v15 = vpop.eup %5636 }
0x2a8f   :  { %v4032_v37 = vmul.f32 %v5637_v15, %v6911_v33 }
0x2a91   :  { %v4044_v59 = vmul.f32 %v6934_v49, %v4032_v37 }
0x2a92   :  { %v5639_v48 = vpop.eup %5638 }
0x2a93   :  { %v4033_v26 = vmul.f32 %v5639_v48, %v6915_v51  ;;  %v4056_v63 = vadd.f32 %v6940_v60, %v4044_v59 }
0x2a95   :  { %v4045_v58 = vmul.f32 %v6934_v49, %v4033_v26 }
0x2a96   :  { %v5641_v44 = vpop.eup %5640 }
0x2a97   :  { %v4057_v12 = vadd.f32 %v6940_v60, %v4045_v58  ;;  %v4034_v36 = vmul.f32 %v5641_v44, %v6920_v22  ;;  %v4545_v22 = vld [vmem:[%s7049_s12 + $0x1] ss:$0 sm:$0xff] }
0x2a99   :  { %v4061_v16 = vpack.c.bf16 %v4057_v12, %v4056_v63  ;;  %v4046_v32 = vmul.f32 %v6934_v49, %v4034_v36 }
0x2a9a   :  { %v5643_v2 = vpop.eup %5642 }
0x2a9b   :  { %5180 = vmatmul.mubr.msk.bf16.gmra.mxu0 %vm231_vm1, %v4061_v16  ;;  %v4035_v33 = vmul.f32 %v5643_v2, %v6925_v46  ;;  %v4058_v5 = vadd.f32 %v6940_v60, %v4046_v32  ;;  %v5415_v32 = vld [vmem:[%s7053_s15] sm:$0xff]  }
0x2a9c   :  { %5183 = vmatprep.mubr.msk.bf16.mxu0 %vm5649_vm0, %v5648_v0 }
0x2a9d   :  { %v4047_v51 = vmul.f32 %v6934_v49, %v4035_v33  ;;  %v5414_v33 = vld [vmem:[%s7053_s15 + $0x8] sm:$0xff]  }
0x2a9e   :  { %5216 = vmatpush3.bf16.msra.mxu0 %v5414_v33 }
0x2a9f   :  { %v4059_v18 = vadd.f32 %v6940_v60, %v4047_v51  ;;  %5217 = vmatprep.subr.bf16.mxu0 %v5648_v0 }
0x2aa1   :  { %v4062_v53 = vpack.c.bf16 %v4059_v18, %v4058_v5 }
0x2aa2   :  { %5218 = vmatpush3.bf16.msra.mxu0 %v5415_v32 }
0x2aa3   :  { %5184 = vmatmul.mubr.msk.bf16.gmra.mxu0 %vm231_vm1, %v4062_v53 }
0x2aa4   :  { %5219 = vmatprep.mubr.msk.bf16.mxu0 %vm5649_vm0, %v5648_v0 }
0x2ad6   :  { %v4131_v34 = vpop.f32.mrf.mxu0 }
0x2ad7   :  { %v4132_v10 = vadd.f32 %v4545_v22, %v4131_v34 }
0x2ad8   :  { %v5177_v25 = vpop.f32.mrf.mxu0 }
0x2ad9   :  { %v4154_v46 = vmax.f32 %v4132_v10, 0.0 }
0x2ada   :  { %v4134_v6 = vpop.f32.mrf.mxu0 }
0x2adb   :  { %v4135_v41 = vadd.f32 %v4545_v22, %v4134_v6  ;;  %v4579_v6 = vld [vmem:[%s7051_s9 + $0x1] ss:$0 sm:$0xff] }
0x2adc   :  { %v5178_v45 = vpop.f32.mrf.mxu0 }
0x2add   :  { %v4155_v55 = vmax.f32 %v4135_v41, 0.0 }
0x2adf   :  { %v4160_v24 = vpack.c.bf16 %v4155_v55, %v4154_v46  ;;  %v4580_v46 = vld [vmem:[%s7052_s10 + $0x1] ss:$0 sm:$0xff] }
0x2ae1   :  { %5204 = vmatmul.mubr.bf16.vlgmr.msra.gmra.mxu1 %v4160_v24 }
0x2ae2   :  { %5207 = vmatprep.mubr.msk.bf16.mxu1 %vm5649_vm0, %v5648_v0 }
0x2b5b   :  { %v4139_v7 = vpop.f32.mrf.mxu0 }
0x2b5c   :  { %v4140_v13 = vadd.f32 %v4545_v22, %v4139_v7 }
0x2b5d   :  { %v5181_v50 = vpop.f32.mrf.mxu0 }
0x2b5e   :  { %v4156_v49 = vmax.f32 %v4140_v13, 0.0  ;;  %v4581_v13 = vld [vmem:[%s7054_s16] ss:$0 sm:$0xff] }
0x2b5f   :  { %v4142_v21 = vpop.f32.mrf.mxu0 }
0x2b60   :  { %v4143_v40 = vadd.f32 %v4545_v22, %v4142_v21 }
0x2b61   :  { %v5182_v38 = vpop.f32.mrf.mxu0 }
0x2b62   :  { %v4157_v52 = vmax.f32 %v4143_v40, 0.0 }
0x2b63   :  { %v4147_v35 = vpop.f32.mrf.mxu0 }
0x2b64   :  { %v4161_v1 = vpack.c.bf16 %v4157_v52, %v4156_v49  ;;  %v4148_v56 = vadd.f32 %v4545_v22, %v4147_v35 }
0x2b65   :  { %v5185_v60 = vpop.f32.mrf.mxu0 }
0x2b66   :  { %5208 = vmatmul.mubr.bf16.gmra.mxu1 %v4161_v1  ;;  %v4158_v39 = vmax.f32 %v4148_v56, 0.0 }
0x2b67   :  { %v4150_v57 = vpop.f32.mrf.mxu0  ;;  %5211 = vmatprep.mubr.msk.bf16.mxu1 %vm5649_vm0, %v5648_v0 }
0x2b68   :  { %v4151_v8 = vadd.f32 %v4545_v22, %v4150_v57 }
0x2b69   :  { %v5186_v14 = vpop.f32.mrf.mxu0 }
0x2b6a   :  { %v4159_v11 = vmax.f32 %v4151_v8, 0.0 }
0x2b6c   :  { %v4162_v4 = vpack.c.bf16 %v4159_v11, %v4158_v39 }
0x2b6e   :  { %5212 = vmatmul.mubr.bf16.gmra.mxu1 %v4162_v4 }
0x2ba1   :  { %v4270_v19 = vpop.f32.mrf.mxu1 }
0x2ba3   :  { %v5205_v23 = vpop.f32.mrf.mxu1 }
0x2ba5   :  { %v4272_v20 = vpop.f32.mrf.mxu1 }
0x2ba6   :  { %v4273_v62 = vadd.f32 %v4568_v27, %v4272_v20 }
0x2ba7   :  { %v5206_v28 = vpop.f32.mrf.mxu1 }
0x2ba8   :  { %v4289_v42 = vadd.f32 %v4273_v62, %v6945_v61 }
0x2baa   :  { %v4295_v9 = vsel %vm231_vm1, %v4289_v42, 0.0 }
0x2bab   :  { %4296 = vadd.xlane.f32.xlu0 %v4295_v9 }
0x2c26   :  { %v4277_v3 = vpop.f32.mrf.mxu1 }
0x2c28   :  { %v5209_v54 = vpop.f32.mrf.mxu1 }
0x2c2a   :  { %v4279_v29 = vpop.f32.mrf.mxu1 }
0x2c2c   :  { %v5210_v17 = vpop.f32.mrf.mxu1 }
0x2c2e   :  { %v4283_v31 = vpop.f32.mrf.mxu1 }
0x2c2f   :  { %v4284_v47 = vadd.f32 %v4568_v27, %v4283_v31 }
0x2c30   :  { %v5213_v43 = vpop.f32.mrf.mxu1 }
0x2c31   :  { %v4290_v30 = vadd.f32 %v4284_v47, %v4058_v5 }
0x2c32   :  { %v4286_v15 = vpop.f32.mrf.mxu1 }
0x2c33   :  { %v4298_v37 = vsel %vm231_vm1, %v4290_v30, 0.0 }
0x2c34   :  { %v4297_v48 = vpop.xlane.xlu0 %4296  ;;  %4299 = vadd.xlane.f32.xlu1 %v4298_v37  ;;  %v5214_v26 = vpop.f32.mrf.mxu1 }
0x2c35   :  { %v4301_v59 = vmul.f32 0.03125, %v4297_v48 }
0x2c37   :  { %v4303_v58 = vsub.f32 %v4289_v42, %v4301_v59 }
0x2c39   :  { %v4305_v61 = vmul.f32 %v4303_v58, %v4303_v58 }
0x2c3b   :  { %v4307_v44 = vsel %vm231_vm1, %v4305_v61, 0.0 }
0x2c3c   :  { %4308 = vadd.xlane.f32.xlu0 %v4307_v44 }
0x2cbd   :  { %v4300_v63 = vpop.xlane.xlu1 %4299 }
0x2cbe   :  { %v4302_v12 = vmul.f32 0.03125, %v4300_v63 }
0x2cc0   :  { %v4304_v36 = vsub.f32 %v4290_v30, %v4302_v12 }
0x2cc2   :  { %v4306_v16 = vmul.f32 %v4304_v36, %v4304_v36 }
0x2cc4   :  { %v4310_v2 = vsel %vm231_vm1, %v4306_v16, 0.0 }
0x2cc5   :  { %4311 = vadd.xlane.f32.xlu1 %v4310_v2  ;;  %v4309_v51 = vpop.xlane.xlu0 %4308 }
0x2cc6   :  { %v4313_v5 = vmul.f32 0.03125, %v4309_v51 }
0x2cc8   :  { %v4315_v18 = vadd.f32 1e-05, %v4313_v5 }
0x2cca   :  { %5644 = vrsqrt.f32 %v4315_v18 }
0x2cd7   :  { %v5645_v25 = vpop.eup %5644 }
0x2cd8   :  { %v4319_v10 = vmul.f32 %v5645_v25, %v4303_v58 }
0x2cda   :  { %v4327_v41 = vmul.f32 %v4579_v6, %v4319_v10 }
0x2cdc   :  { %v4335_v24 = vadd.f32 %v4580_v46, %v4327_v41 }
0x2d4e   :  { %v4312_v53 = vpop.xlane.xlu1 %4311 }
0x2d4f   :  { %v4314_v22 = vmul.f32 0.03125, %v4312_v53 }
0x2d51   :  { %v4316_v34 = vadd.f32 1e-05, %v4314_v22 }
0x2d53   :  { %5646 = vrsqrt.f32 %v4316_v34 }
0x2d60   :  { %v5647_v0 = vpop.eup %5646 }
0x2d61   :  { %v4320_v45 = vmul.f32 %v5647_v0, %v4304_v36 }
0x2d63   :  { %v4328_v55 = vmul.f32 %v4579_v6, %v4320_v45 }
0x2d65   :  { %v4336_v7 = vadd.f32 %v4580_v46, %v4328_v55 }
0x2d67   :  { %v4337_v50 = vpack.c.bf16 %v4336_v7, %v4335_v24 }
0x2d69   :  { %5220 = vmatmul.mubr.msk.bf16.vlgmr.msra.gmra.mxu0 %vm231_vm1, %v4337_v50 }
0x2e29   :  { %v4398_v21 = vpop.f32.mrf.mxu0 }
0x2e2a   :  { %v4399_v40 = vadd.f32 %v4581_v13, %v4398_v21 }
0x2e2b   :  { %v5221_v38 = vpop.f32.mrf.mxu0 }
0x2e2c   :  { %4405 = vst [vmem:[%s7055_s17] sm:$0xff] %v4399_v40 }
0x2e2d   :  { %v4401_v49 = vpop.f32.mrf.mxu0 }
0x2e2e   :  { %v4402_v52 = vadd.f32 %v4581_v13, %v4401_v49 }
0x2e2f   :  { %v5222_v35 = vpop.f32.mrf.mxu0 }
0x2e30   :  { %4406 = vst [vmem:[%s7055_s17 + $0x8] sm:$0xff] %v4402_v52 }

</bundles_post_ra>
